<compile_context>
chip_gen: v6e
topology: v6e:2x2x1
jax: 0.10.0
libtpu: 0.0.40
codegen_flags: <defaults>
</compile_context>

<pallas_src>
import numpy as np
import jax
import jax.numpy as jnp
from jax import lax
from jax.experimental import pallas as pl
from jax.experimental.pallas import tpu as pltpu

EPS = 1e-5  # PyTorch BatchNorm1d default eps


def dan_kernel(ids_ref,                       # SMEM (N,) int32  (scalar prefetch)
               emb_hbm,                       # ANY/HBM (V, D) f32
               attn_ref,                      # VMEM (D, 1)
               g_ref,                         # VMEM (N, B)  row -> batch one-hot
               gt_ref,                        # VMEM (B, N)  batch -> row one-hot
               w1_ref, b1_ref, g1_ref, be1_ref,
               w2_ref, b2_ref, g2_ref, be2_ref,
               w3_ref, b3_ref,
               out_ref,                       # VMEM (B, 1)
               emb_buf, sem):                 # VMEM (N, D) scratch, DMA sem
    N, D = emb_buf.shape

    # ---- fused embedding gather (word dropout already folded into ids) ----
    # Issue all N row DMAs with a static (unrolled) loop; every copy signals
    # the same DMA semaphore.  All SMEM id reads happen before any wait.
    for i in range(N):
        pltpu.make_async_copy(
            emb_hbm.at[pl.ds(ids_ref[i], 1), :],
            emb_buf.at[pl.ds(i, 1), :],
            sem).start()

    # Single wait: every copy above has identical (1, D) size, so one
    # descriptor covering the full (N, D) block waits for all N completions
    # at once.  (If per-row copy sizes ever differ, this must go back to
    # per-copy waits.)
    pltpu.make_async_copy(emb_hbm.at[pl.ds(0, N), :], emb_buf, sem).wait()

    emb = emb_buf[...]                                          # (N, D) f32

    # ---- attention: flat MXU score + segment softmax + MXU weighted sum ----
    score = jnp.dot(emb, attn_ref[...],
                    preferred_element_type=jnp.float32)         # (N, 1)
    # softmax is shift-invariant, so subtracting the *global* max is exact
    # for every batch segment and keeps exp() in range.
    p = jnp.exp(score - jnp.max(score))                         # (N, 1)
    denom_b = jnp.dot(gt_ref[...], p,
                      preferred_element_type=jnp.float32)       # (B, 1) per-batch sum
    denom_row = jnp.dot(g_ref[...], denom_b,
                        preferred_element_type=jnp.float32)     # (N, 1) broadcast back
    w = p * pl.reciprocal(denom_row, approx=True)               # softmax weights
    weighted = emb * w                                          # (N, D), VPU lane-bcast
    condensed = jnp.dot(gt_ref[...], weighted,
                        preferred_element_type=jnp.float32)     # (B, D)

    # ---- linear1 -> ReLU -> BatchNorm1d (training-mode batch stats) ----
    h1 = jnp.dot(condensed, w1_ref[...],
                 preferred_element_type=jnp.float32) + b1_ref[...]
    h1 = jnp.maximum(h1, 0.0)
    m1 = jnp.mean(h1, axis=0, keepdims=True)
    v1 = jnp.mean((h1 - m1) ** 2, axis=0, keepdims=True)        # biased variance
    h1 = (h1 - m1) * lax.rsqrt(v1 + EPS) * g1_ref[...] + be1_ref[...]

    # ---- linear2 -> ReLU -> BatchNorm1d ----
    h2 = jnp.dot(h1, w2_ref[...],
                 preferred_element_type=jnp.float32) + b2_ref[...]
    h2 = jnp.maximum(h2, 0.0)
    m2 = jnp.mean(h2, axis=0, keepdims=True)
    v2 = jnp.mean((h2 - m2) ** 2, axis=0, keepdims=True)
    h2 = (h2 - m2) * lax.rsqrt(v2 + EPS) * g2_ref[...] + be2_ref[...]

    # ---- linear3 -> sigmoid ----
    logit = jnp.dot(h2, w3_ref[...],
                    preferred_element_type=jnp.float32) + b3_ref[...]
    out_ref[...] = jax.nn.sigmoid(logit)                        # (B, 1)


def init_params(key, vocab=50000, emb_dim=300, h1=100, h2=25):
    ks = jax.random.split(key, 8)
    return {
        # frozen embedding table (nn.Embedding _weight)
        "emb_table": jax.random.normal(ks[0], (vocab, emb_dim), jnp.float32),
        # Attention parameter (300, 1), xavier_normal_
        "attn": (jax.random.normal(ks[1], (emb_dim, 1), jnp.float32)
                 * np.sqrt(2.0 / (emb_dim + 1))),
        # Linear layers stored transposed vs PyTorch, i.e. [in, out]
        "w1": jax.random.uniform(ks[2], (emb_dim, h1), jnp.float32,
                                 -1.0 / np.sqrt(emb_dim), 1.0 / np.sqrt(emb_dim)),
        "b1": jax.random.uniform(ks[3], (1, h1), jnp.float32,
                                 -1.0 / np.sqrt(emb_dim), 1.0 / np.sqrt(emb_dim)),
        "g1": jnp.ones((1, h1), jnp.float32),
        "be1": jnp.zeros((1, h1), jnp.float32),
        "w2": jax.random.uniform(ks[4], (h1, h2), jnp.float32,
                                 -1.0 / np.sqrt(h1), 1.0 / np.sqrt(h1)),
        "b2": jax.random.uniform(ks[5], (1, h2), jnp.float32,
                                 -1.0 / np.sqrt(h1), 1.0 / np.sqrt(h1)),
        "g2": jnp.ones((1, h2), jnp.float32),
        "be2": jnp.zeros((1, h2), jnp.float32),
        "w3": jax.random.uniform(ks[6], (h2, 1), jnp.float32,
                                 -1.0 / np.sqrt(h2), 1.0 / np.sqrt(h2)),
        "b3": jax.random.uniform(ks[7], (1, 1), jnp.float32,
                                 -1.0 / np.sqrt(h2), 1.0 / np.sqrt(h2)),
    }


def dan_forward(token_ids, params, drop_index):
    emb_table = params["emb_table"]
    V, D = emb_table.shape
    B, S = token_ids.shape

    # word_dropout: drop one token *index column* if seq length >= 4 — no
    # (B, S, D) activation copy, just a tiny int gather on the id matrix.
    # TODO(synk): drop_index is a trace-time Python int (same as the PyTorch
    # module's np.random.randint); a per-call random column would need a
    # traced dynamic index.
    if S >= 4:
        keep = np.array([c for c in range(S) if c != drop_index], dtype=np.int32)
        ids = jnp.take(token_ids, jnp.asarray(keep), axis=1)
    else:
        ids = token_ids
    B, Sp = ids.shape
    N = B * Sp
    # Clamp so an out-of-range id can never become an out-of-bounds HBM DMA.
    flat_ids = jnp.clip(ids.reshape(-1), 0, V - 1).astype(jnp.int32)   # (N,)

    # Row->batch one-hot segment matrices (trace-time constants, ~3 KiB each).
    g_np = np.zeros((N, B), dtype=np.float32)
    g_np[np.arange(N), np.arange(N) // Sp] = 1.0
    g_mat = jnp.asarray(g_np)                                   # (N, B)
    gt_mat = jnp.asarray(np.ascontiguousarray(g_np.T))          # (B, N)

    H1 = params["w1"].shape[1]
    H2 = params["w2"].shape[1]

    tensor_inputs = [params["attn"], g_mat, gt_mat,
                     params["w1"], params["b1"], params["g1"], params["be1"],
                     params["w2"], params["b2"], params["g2"], params["be2"],
                     params["w3"], params["b3"]]

    # Embedding table stays in HBM; everything else is a full-size VMEM block.
    in_specs = [pl.BlockSpec(memory_space=pl.ANY)]
    in_specs += [pl.BlockSpec(x.shape, lambda i, ids_ref, n=x.ndim: (0,) * n)
                 for x in tensor_inputs]

    grid_spec = pltpu.PrefetchScalarGridSpec(
        num_scalar_prefetch=1,
        grid=(1,),
        in_specs=in_specs,
        out_specs=pl.BlockSpec((B, 1), lambda i, ids_ref: (0, 0)),
        scratch_shapes=[pltpu.VMEM((N, D), jnp.float32),
                        pltpu.SemaphoreType.DMA(())],
    )

    flops = (2 * N * D                   # score matmul
             + 4 * N * B                 # segment-sum / broadcast matmuls
             + N * D                     # weighting
             + 2 * B * N * D             # condensed matmul
             + 2 * B * (D * H1 + H1 * H2 + H2))
    bytes_accessed = 4 * (N * D + D * H1 + H1 * H2 + H2 + D
                          + 2 * N * B + 4 * H1 + 4 * H2 + N + B)
    cost = pl.CostEstimate(flops=int(flops),
                           transcendentals=int(N + 4 * B),
                           bytes_accessed=int(bytes_accessed))

    out = pl.pallas_call(
        dan_kernel,
        out_shape=jax.ShapeDtypeStruct((B, 1), jnp.float32),
        grid_spec=grid_spec,
        compiler_params=pltpu.CompilerParams(
            dimension_semantics=("arbitrary",)),
        cost_estimate=cost,
    )(flat_ids, emb_table, *tensor_inputs)
    return out


def dan_reference(token_ids, params, drop_index):
    """Pure-JAX reference mirroring the PyTorch module (training-mode BN)."""
    emb = params["emb_table"][token_ids]                        # (B, S, D)
    S = emb.shape[1]
    if S >= 4:
        emb = jnp.concatenate([emb[:, :drop_index], emb[:, drop_index + 1:]],
                              axis=1)
    a = params["attn"][:, 0]
    score = jnp.einsum('bsd,d->bs', emb, a)
    w = jax.nn.softmax(score, axis=1)
    condensed = jnp.einsum('bs,bsd->bd', w, emb)
    h1 = jnp.maximum(condensed @ params["w1"] + params["b1"], 0.0)
    h1 = ((h1 - h1.mean(0)) / jnp.sqrt(h1.var(0) + EPS)
          * params["g1"] + params["be1"])
    h2 = jnp.maximum(h1 @ params["w2"] + params["b2"], 0.0)
    h2 = ((h2 - h2.mean(0)) / jnp.sqrt(h2.var(0) + EPS)
          * params["g2"] + params["be2"])
    return jax.nn.sigmoid(h2 @ params["w3"] + params["b3"])


if __name__ == "__main__":
    key = jax.random.PRNGKey(0)
    k_param, k_tok = jax.random.split(key)

    B, S, VOCAB = 8, 12, 50000
    params = init_params(k_param, vocab=VOCAB)

    token_ids = jax.random.randint(k_tok, (B, S), 0, VOCAB, dtype=jnp.int32)

    # word_dropout uses np.random.randint in the PyTorch module; seed so the
    # run is deterministic.
    np.random.seed(0)
    drop_index = int(np.random.randint(S)) if S >= 4 else 0

    out = dan_forward(token_ids, params, drop_index)
    out = jax.block_until_ready(out)

    ref = jax.block_until_ready(dan_reference(token_ids, params, drop_index))

    assert out.shape == (B, 1)
    assert bool(jnp.all(jnp.isfinite(out)))
    max_err = float(jnp.max(jnp.abs(out - ref)))
    assert max_err < 1e-2, f"mismatch vs reference: {max_err}"
    print("KERNEL_OK")
</pallas_src>

<mosaic_0001>
module attributes {stable_mosaic.version = 11 : i64} {
  func.func @dan_kernel(%arg0: i32, %arg1: memref<88xi32, #tpu.memory_space<smem>>, %arg2: memref<50000x300xf32, #tpu.memory_space<any>>, %arg3: memref<300x1xf32, #tpu.memory_space<vmem>>, %arg4: memref<88x8xf32, #tpu.memory_space<vmem>>, %arg5: memref<8x88xf32, #tpu.memory_space<vmem>>, %arg6: memref<300x100xf32, #tpu.memory_space<vmem>>, %arg7: memref<1x100xf32, #tpu.memory_space<vmem>>, %arg8: memref<1x100xf32, #tpu.memory_space<vmem>>, %arg9: memref<1x100xf32, #tpu.memory_space<vmem>>, %arg10: memref<100x25xf32, #tpu.memory_space<vmem>>, %arg11: memref<1x25xf32, #tpu.memory_space<vmem>>, %arg12: memref<1x25xf32, #tpu.memory_space<vmem>>, %arg13: memref<1x25xf32, #tpu.memory_space<vmem>>, %arg14: memref<25x1xf32, #tpu.memory_space<vmem>>, %arg15: memref<1x1xf32, #tpu.memory_space<vmem>>, %arg16: memref<8x1xf32, #tpu.memory_space<vmem>>, %arg17: memref<88x300xf32, #tpu.memory_space<vmem>>, %arg18: memref<!tpu.dma_semaphore, #tpu.memory_space<semaphore_mem>>) attributes {dimension_semantics = [#tpu.dimension_semantics<arbitrary>], iteration_bounds = array<i64: 1>, scalar_prefetch = 1 : i64, scratch_operands = 2 : i64, tpu.core_type = #tpu.core_type<tc>, window_params = [{}, {pipeline_mode = #tpu.pipeline_mode<synchronous>, transform_indices = @transform_1, window_bounds = array<i64: 300, 1>}, {pipeline_mode = #tpu.pipeline_mode<synchronous>, transform_indices = @transform_2, window_bounds = array<i64: 88, 8>}, {pipeline_mode = #tpu.pipeline_mode<synchronous>, transform_indices = @transform_3, window_bounds = array<i64: 8, 88>}, {pipeline_mode = #tpu.pipeline_mode<synchronous>, transform_indices = @transform_4, window_bounds = array<i64: 300, 100>}, {pipeline_mode = #tpu.pipeline_mode<synchronous>, transform_indices = @transform_5, window_bounds = array<i64: 1, 100>}, {pipeline_mode = #tpu.pipeline_mode<synchronous>, transform_indices = @transform_6, window_bounds = array<i64: 1, 100>}, {pipeline_mode = #tpu.pipeline_mode<synchronous>, transform_indices = @transform_7, window_bounds = array<i64: 1, 100>}, {pipeline_mode = #tpu.pipeline_mode<synchronous>, transform_indices = @transform_8, window_bounds = array<i64: 100, 25>}, {pipeline_mode = #tpu.pipeline_mode<synchronous>, transform_indices = @transform_9, window_bounds = array<i64: 1, 25>}, {pipeline_mode = #tpu.pipeline_mode<synchronous>, transform_indices = @transform_10, window_bounds = array<i64: 1, 25>}, {pipeline_mode = #tpu.pipeline_mode<synchronous>, transform_indices = @transform_11, window_bounds = array<i64: 1, 25>}, {pipeline_mode = #tpu.pipeline_mode<synchronous>, transform_indices = @transform_12, window_bounds = array<i64: 25, 1>}, {pipeline_mode = #tpu.pipeline_mode<synchronous>, transform_indices = @transform_13, window_bounds = array<i64: 1, 1>}, {pipeline_mode = #tpu.pipeline_mode<synchronous>, transform_indices = @transform_14, window_bounds = array<i64: 8, 1>}]} {
    %c0 = arith.constant 0 : index
    %0 = memref.load %arg1[%c0] : memref<88xi32, #tpu.memory_space<smem>>
    %c0_i32 = arith.constant 0 : i32
    %1 = tpu.memref_slice %arg2[%0, %c0_i32] : memref<50000x300xf32, #tpu.memory_space<any>> -> memref<1x300xf32, #tpu.memory_space<any>>
    %c0_i32_0 = arith.constant 0 : i32
    %c0_i32_1 = arith.constant 0 : i32
    %2 = tpu.memref_slice %arg17[%c0_i32_0, %c0_i32_1] : memref<88x300xf32, #tpu.memory_space<vmem>> -> memref<1x300xf32, #tpu.memory_space<vmem>>
    tpu.enqueue_dma source(%1 : memref<1x300xf32, #tpu.memory_space<any>>) target(%2 : memref<1x300xf32, #tpu.memory_space<vmem>>) target_semaphore(%arg18 : memref<!tpu.dma_semaphore, #tpu.memory_space<semaphore_mem>>)
    %c1 = arith.constant 1 : index
    %3 = memref.load %arg1[%c1] : memref<88xi32, #tpu.memory_space<smem>>
    %c0_i32_2 = arith.constant 0 : i32
    %4 = tpu.memref_slice %arg2[%3, %c0_i32_2] : memref<50000x300xf32, #tpu.memory_space<any>> -> memref<1x300xf32, #tpu.memory_space<any>>
    %c1_i32 = arith.constant 1 : i32
    %c0_i32_3 = arith.constant 0 : i32
    %5 = tpu.memref_slice %arg17[%c1_i32, %c0_i32_3] : memref<88x300xf32, #tpu.memory_space<vmem>> -> memref<1x300xf32, #tpu.memory_space<vmem>>
    tpu.enqueue_dma source(%4 : memref<1x300xf32, #tpu.memory_space<any>>) target(%5 : memref<1x300xf32, #tpu.memory_space<vmem>>) target_semaphore(%arg18 : memref<!tpu.dma_semaphore, #tpu.memory_space<semaphore_mem>>)
    %c2 = arith.constant 2 : index
    %6 = memref.load %arg1[%c2] : memref<88xi32, #tpu.memory_space<smem>>
    %c0_i32_4 = arith.constant 0 : i32
    %7 = tpu.memref_slice %arg2[%6, %c0_i32_4] : memref<50000x300xf32, #tpu.memory_space<any>> -> memref<1x300xf32, #tpu.memory_space<any>>
    %c2_i32 = arith.constant 2 : i32
    %c0_i32_5 = arith.constant 0 : i32
    %8 = tpu.memref_slice %arg17[%c2_i32, %c0_i32_5] : memref<88x300xf32, #tpu.memory_space<vmem>> -> memref<1x300xf32, #tpu.memory_space<vmem>>
    tpu.enqueue_dma source(%7 : memref<1x300xf32, #tpu.memory_space<any>>) target(%8 : memref<1x300xf32, #tpu.memory_space<vmem>>) target_semaphore(%arg18 : memref<!tpu.dma_semaphore, #tpu.memory_space<semaphore_mem>>)
    %c3 = arith.constant 3 : index
    %9 = memref.load %arg1[%c3] : memref<88xi32, #tpu.memory_space<smem>>
    %c0_i32_6 = arith.constant 0 : i32
    %10 = tpu.memref_slice %arg2[%9, %c0_i32_6] : memref<50000x300xf32, #tpu.memory_space<any>> -> memref<1x300xf32, #tpu.memory_space<any>>
    %c3_i32 = arith.constant 3 : i32
    %c0_i32_7 = arith.constant 0 : i32
    %11 = tpu.memref_slice %arg17[%c3_i32, %c0_i32_7] : memref<88x300xf32, #tpu.memory_space<vmem>> -> memref<1x300xf32, #tpu.memory_space<vmem>>
    tpu.enqueue_dma source(%10 : memref<1x300xf32, #tpu.memory_space<any>>) target(%11 : memref<1x300xf32, #tpu.memory_space<vmem>>) target_semaphore(%arg18 : memref<!tpu.dma_semaphore, #tpu.memory_space<semaphore_mem>>)
    %c4 = arith.constant 4 : index
    %12 = memref.load %arg1[%c4] : memref<88xi32, #tpu.memory_space<smem>>
    %c0_i32_8 = arith.constant 0 : i32
    %13 = tpu.memref_slice %arg2[%12, %c0_i32_8] : memref<50000x300xf32, #tpu.memory_space<any>> -> memref<1x300xf32, #tpu.memory_space<any>>
    %c4_i32 = arith.constant 4 : i32
    %c0_i32_9 = arith.constant 0 : i32
    %14 = tpu.memref_slice %arg17[%c4_i32, %c0_i32_9] : memref<88x300xf32, #tpu.memory_space<vmem>> -> memref<1x300xf32, #tpu.memory_space<vmem>>
    tpu.enqueue_dma source(%13 : memref<1x300xf32, #tpu.memory_space<any>>) target(%14 : memref<1x300xf32, #tpu.memory_space<vmem>>) target_semaphore(%arg18 : memref<!tpu.dma_semaphore, #tpu.memory_space<semaphore_mem>>)
    %c5 = arith.constant 5 : index
    %15 = memref.load %arg1[%c5] : memref<88xi32, #tpu.memory_space<smem>>
    %c0_i32_10 = arith.constant 0 : i32
    %16 = tpu.memref_slice %arg2[%15, %c0_i32_10] : memref<50000x300xf32, #tpu.memory_space<any>> -> memref<1x300xf32, #tpu.memory_space<any>>
    %c5_i32 = arith.constant 5 : i32
    %c0_i32_11 = arith.constant 0 : i32
    %17 = tpu.memref_slice %arg17[%c5_i32, %c0_i32_11] : memref<88x300xf32, #tpu.memory_space<vmem>> -> memref<1x300xf32, #tpu.memory_space<vmem>>
    tpu.enqueue_dma source(%16 : memref<1x300xf32, #tpu.memory_space<any>>) target(%17 : memref<1x300xf32, #tpu.memory_space<vmem>>) target_semaphore(%arg18 : memref<!tpu.dma_semaphore, #tpu.memory_space<semaphore_mem>>)
    %c6 = arith.constant 6 : index
    %18 = memref.load %arg1[%c6] : memref<88xi32, #tpu.memory_space<smem>>
    %c0_i32_12 = arith.constant 0 : i32
    %19 = tpu.memref_slice %arg2[%18, %c0_i32_12] : memref<50000x300xf32, #tpu.memory_space<any>> -> memref<1x300xf32, #tpu.memory_space<any>>
    %c6_i32 = arith.constant 6 : i32
    %c0_i32_13 = arith.constant 0 : i32
    %20 = tpu.memref_slice %arg17[%c6_i32, %c0_i32_13] : memref<88x300xf32, #tpu.memory_space<vmem>> -> memref<1x300xf32, #tpu.memory_space<vmem>>
    tpu.enqueue_dma source(%19 : memref<1x300xf32, #tpu.memory_space<any>>) target(%20 : memref<1x300xf32, #tpu.memory_space<vmem>>) target_semaphore(%arg18 : memref<!tpu.dma_semaphore, #tpu.memory_space<semaphore_mem>>)
    %c7 = arith.constant 7 : index
    %21 = memref.load %arg1[%c7] : memref<88xi32, #tpu.memory_space<smem>>
    %c0_i32_14 = arith.constant 0 : i32
    %22 = tpu.memref_slice %arg2[%21, %c0_i32_14] : memref<50000x300xf32, #tpu.memory_space<any>> -> memref<1x300xf32, #tpu.memory_space<any>>
    %c7_i32 = arith.constant 7 : i32
    %c0_i32_15 = arith.constant 0 : i32
    %23 = tpu.memref_slice %arg17[%c7_i32, %c0_i32_15] : memref<88x300xf32, #tpu.memory_space<vmem>> -> memref<1x300xf32, #tpu.memory_space<vmem>>
    tpu.enqueue_dma source(%22 : memref<1x300xf32, #tpu.memory_space<any>>) target(%23 : memref<1x300xf32, #tpu.memory_space<vmem>>) target_semaphore(%arg18 : memref<!tpu.dma_semaphore, #tpu.memory_space<semaphore_mem>>)
    %c8 = arith.constant 8 : index
    %24 = memref.load %arg1[%c8] : memref<88xi32, #tpu.memory_space<smem>>
    %c0_i32_16 = arith.constant 0 : i32
    %25 = tpu.memref_slice %arg2[%24, %c0_i32_16] : memref<50000x300xf32, #tpu.memory_space<any>> -> memref<1x300xf32, #tpu.memory_space<any>>
    %c8_i32 = arith.constant 8 : i32
    %c0_i32_17 = arith.constant 0 : i32
    %26 = tpu.memref_slice %arg17[%c8_i32, %c0_i32_17] : memref<88x300xf32, #tpu.memory_space<vmem>> -> memref<1x300xf32, #tpu.memory_space<vmem>>
    tpu.enqueue_dma source(%25 : memref<1x300xf32, #tpu.memory_space<any>>) target(%26 : memref<1x300xf32, #tpu.memory_space<vmem>>) target_semaphore(%arg18 : memref<!tpu.dma_semaphore, #tpu.memory_space<semaphore_mem>>)
    %c9 = arith.constant 9 : index
    %27 = memref.load %arg1[%c9] : memref<88xi32, #tpu.memory_space<smem>>
    %c0_i32_18 = arith.constant 0 : i32
    %28 = tpu.memref_slice %arg2[%27, %c0_i32_18] : memref<50000x300xf32, #tpu.memory_space<any>> -> memref<1x300xf32, #tpu.memory_space<any>>
    %c9_i32 = arith.constant 9 : i32
    %c0_i32_19 = arith.constant 0 : i32
    %29 = tpu.memref_slice %arg17[%c9_i32, %c0_i32_19] : memref<88x300xf32, #tpu.memory_space<vmem>> -> memref<1x300xf32, #tpu.memory_space<vmem>>
    tpu.enqueue_dma source(%28 : memref<1x300xf32, #tpu.memory_space<any>>) target(%29 : memref<1x300xf32, #tpu.memory_space<vmem>>) target_semaphore(%arg18 : memref<!tpu.dma_semaphore, #tpu.memory_space<semaphore_mem>>)
    %c10 = arith.constant 10 : index
    %30 = memref.load %arg1[%c10] : memref<88xi32, #tpu.memory_space<smem>>
    %c0_i32_20 = arith.constant 0 : i32
    %31 = tpu.memref_slice %arg2[%30, %c0_i32_20] : memref<50000x300xf32, #tpu.memory_space<any>> -> memref<1x300xf32, #tpu.memory_space<any>>
    %c10_i32 = arith.constant 10 : i32
    %c0_i32_21 = arith.constant 0 : i32
    %32 = tpu.memref_slice %arg17[%c10_i32, %c0_i32_21] : memref<88x300xf32, #tpu.memory_space<vmem>> -> memref<1x300xf32, #tpu.memory_space<vmem>>
    tpu.enqueue_dma source(%31 : memref<1x300xf32, #tpu.memory_space<any>>) target(%32 : memref<1x300xf32, #tpu.memory_space<vmem>>) target_semaphore(%arg18 : memref<!tpu.dma_semaphore, #tpu.memory_space<semaphore_mem>>)
    %c11 = arith.constant 11 : index
    %33 = memref.load %arg1[%c11] : memref<88xi32, #tpu.memory_space<smem>>
    %c0_i32_22 = arith.constant 0 : i32
    %34 = tpu.memref_slice %arg2[%33, %c0_i32_22] : memref<50000x300xf32, #tpu.memory_space<any>> -> memref<1x300xf32, #tpu.memory_space<any>>
    %c11_i32 = arith.constant 11 : i32
    %c0_i32_23 = arith.constant 0 : i32
    %35 = tpu.memref_slice %arg17[%c11_i32, %c0_i32_23] : memref<88x300xf32, #tpu.memory_space<vmem>> -> memref<1x300xf32, #tpu.memory_space<vmem>>
    tpu.enqueue_dma source(%34 : memref<1x300xf32, #tpu.memory_space<any>>) target(%35 : memref<1x300xf32, #tpu.memory_space<vmem>>) target_semaphore(%arg18 : memref<!tpu.dma_semaphore, #tpu.memory_space<semaphore_mem>>)
    %c12 = arith.constant 12 : index
    %36 = memref.load %arg1[%c12] : memref<88xi32, #tpu.memory_space<smem>>
    %c0_i32_24 = arith.constant 0 : i32
    %37 = tpu.memref_slice %arg2[%36, %c0_i32_24] : memref<50000x300xf32, #tpu.memory_space<any>> -> memref<1x300xf32, #tpu.memory_space<any>>
    %c12_i32 = arith.constant 12 : i32
    %c0_i32_25 = arith.constant 0 : i32
    %38 = tpu.memref_slice %arg17[%c12_i32, %c0_i32_25] : memref<88x300xf32, #tpu.memory_space<vmem>> -> memref<1x300xf32, #tpu.memory_space<vmem>>
    tpu.enqueue_dma source(%37 : memref<1x300xf32, #tpu.memory_space<any>>) target(%38 : memref<1x300xf32, #tpu.memory_space<vmem>>) target_semaphore(%arg18 : memref<!tpu.dma_semaphore, #tpu.memory_space<semaphore_mem>>)
    %c13 = arith.constant 13 : index
    %39 = memref.load %arg1[%c13] : memref<88xi32, #tpu.memory_space<smem>>
    %c0_i32_26 = arith.constant 0 : i32
    %40 = tpu.memref_slice %arg2[%39, %c0_i32_26] : memref<50000x300xf32, #tpu.memory_space<any>> -> memref<1x300xf32, #tpu.memory_space<any>>
    %c13_i32 = arith.constant 13 : i32
    %c0_i32_27 = arith.constant 0 : i32
    %41 = tpu.memref_slice %arg17[%c13_i32, %c0_i32_27] : memref<88x300xf32, #tpu.memory_space<vmem>> -> memref<1x300xf32, #tpu.memory_space<vmem>>
    tpu.enqueue_dma source(%40 : memref<1x300xf32, #tpu.memory_space<any>>) target(%41 : memref<1x300xf32, #tpu.memory_space<vmem>>) target_semaphore(%arg18 : memref<!tpu.dma_semaphore, #tpu.memory_space<semaphore_mem>>)
    %c14 = arith.constant 14 : index
    %42 = memref.load %arg1[%c14] : memref<88xi32, #tpu.memory_space<smem>>
    %c0_i32_28 = arith.constant 0 : i32
    %43 = tpu.memref_slice %arg2[%42, %c0_i32_28] : memref<50000x300xf32, #tpu.memory_space<any>> -> memref<1x300xf32, #tpu.memory_space<any>>
    %c14_i32 = arith.constant 14 : i32
    %c0_i32_29 = arith.constant 0 : i32
    %44 = tpu.memref_slice %arg17[%c14_i32, %c0_i32_29] : memref<88x300xf32, #tpu.memory_space<vmem>> -> memref<1x300xf32, #tpu.memory_space<vmem>>
    tpu.enqueue_dma source(%43 : memref<1x300xf32, #tpu.memory_space<any>>) target(%44 : memref<1x300xf32, #tpu.memory_space<vmem>>) target_semaphore(%arg18 : memref<!tpu.dma_semaphore, #tpu.memory_space<semaphore_mem>>)
    %c15 = arith.constant 15 : index
    %45 = memref.load %arg1[%c15] : memref<88xi32, #tpu.memory_space<smem>>
    %c0_i32_30 = arith.constant 0 : i32
    %46 = tpu.memref_slice %arg2[%45, %c0_i32_30] : memref<50000x300xf32, #tpu.memory_space<any>> -> memref<1x300xf32, #tpu.memory_space<any>>
    %c15_i32 = arith.constant 15 : i32
    %c0_i32_31 = arith.constant 0 : i32
    %47 = tpu.memref_slice %arg17[%c15_i32, %c0_i32_31] : memref<88x300xf32, #tpu.memory_space<vmem>> -> memref<1x300xf32, #tpu.memory_space<vmem>>
    tpu.enqueue_dma source(%46 : memref<1x300xf32, #tpu.memory_space<any>>) target(%47 : memref<1x300xf32, #tpu.memory_space<vmem>>) target_semaphore(%arg18 : memref<!tpu.dma_semaphore, #tpu.memory_space<semaphore_mem>>)
    %c16 = arith.constant 16 : index
    %48 = memref.load %arg1[%c16] : memref<88xi32, #tpu.memory_space<smem>>
    %c0_i32_32 = arith.constant 0 : i32
    %49 = tpu.memref_slice %arg2[%48, %c0_i32_32] : memref<50000x300xf32, #tpu.memory_space<any>> -> memref<1x300xf32, #tpu.memory_space<any>>
    %c16_i32 = arith.constant 16 : i32
    %c0_i32_33 = arith.constant 0 : i32
    %50 = tpu.memref_slice %arg17[%c16_i32, %c0_i32_33] : memref<88x300xf32, #tpu.memory_space<vmem>> -> memref<1x300xf32, #tpu.memory_space<vmem>>
    tpu.enqueue_dma source(%49 : memref<1x300xf32, #tpu.memory_space<any>>) target(%50 : memref<1x300xf32, #tpu.memory_space<vmem>>) target_semaphore(%arg18 : memref<!tpu.dma_semaphore, #tpu.memory_space<semaphore_mem>>)
    %c17 = arith.constant 17 : index
    %51 = memref.load %arg1[%c17] : memref<88xi32, #tpu.memory_space<smem>>
    %c0_i32_34 = arith.constant 0 : i32
    %52 = tpu.memref_slice %arg2[%51, %c0_i32_34] : memref<50000x300xf32, #tpu.memory_space<any>> -> memref<1x300xf32, #tpu.memory_space<any>>
    %c17_i32 = arith.constant 17 : i32
    %c0_i32_35 = arith.constant 0 : i32
    %53 = tpu.memref_slice %arg17[%c17_i32, %c0_i32_35] : memref<88x300xf32, #tpu.memory_space<vmem>> -> memref<1x300xf32, #tpu.memory_space<vmem>>
    tpu.enqueue_dma source(%52 : memref<1x300xf32, #tpu.memory_space<any>>) target(%53 : memref<1x300xf32, #tpu.memory_space<vmem>>) target_semaphore(%arg18 : memref<!tpu.dma_semaphore, #tpu.memory_space<semaphore_mem>>)
    %c18 = arith.constant 18 : index
    %54 = memref.load %arg1[%c18] : memref<88xi32, #tpu.memory_space<smem>>
    %c0_i32_36 = arith.constant 0 : i32
    %55 = tpu.memref_slice %arg2[%54, %c0_i32_36] : memref<50000x300xf32, #tpu.memory_space<any>> -> memref<1x300xf32, #tpu.memory_space<any>>
    %c18_i32 = arith.constant 18 : i32
    %c0_i32_37 = arith.constant 0 : i32
    %56 = tpu.memref_slice %arg17[%c18_i32, %c0_i32_37] : memref<88x300xf32, #tpu.memory_space<vmem>> -> memref<1x300xf32, #tpu.memory_space<vmem>>
    tpu.enqueue_dma source(%55 : memref<1x300xf32, #tpu.memory_space<any>>) target(%56 : memref<1x300xf32, #tpu.memory_space<vmem>>) target_semaphore(%arg18 : memref<!tpu.dma_semaphore, #tpu.memory_space<semaphore_mem>>)
    %c19 = arith.constant 19 : index
    %57 = memref.load %arg1[%c19] : memref<88xi32, #tpu.memory_space<smem>>
    %c0_i32_38 = arith.constant 0 : i32
    %58 = tpu.memref_slice %arg2[%57, %c0_i32_38] : memref<50000x300xf32, #tpu.memory_space<any>> -> memref<1x300xf32, #tpu.memory_space<any>>
    %c19_i32 = arith.constant 19 : i32
    %c0_i32_39 = arith.constant 0 : i32
    %59 = tpu.memref_slice %arg17[%c19_i32, %c0_i32_39] : memref<88x300xf32, #tpu.memory_space<vmem>> -> memref<1x300xf32, #tpu.memory_space<vmem>>
    tpu.enqueue_dma source(%58 : memref<1x300xf32, #tpu.memory_space<any>>) target(%59 : memref<1x300xf32, #tpu.memory_space<vmem>>) target_semaphore(%arg18 : memref<!tpu.dma_semaphore, #tpu.memory_space<semaphore_mem>>)
    %c20 = arith.constant 20 : index
    %60 = memref.load %arg1[%c20] : memref<88xi32, #tpu.memory_space<smem>>
    %c0_i32_40 = arith.constant 0 : i32
    %61 = tpu.memref_slice %arg2[%60, %c0_i32_40] : memref<50000x300xf32, #tpu.memory_space<any>> -> memref<1x300xf32, #tpu.memory_space<any>>
    %c20_i32 = arith.constant 20 : i32
    %c0_i32_41 = arith.constant 0 : i32
    %62 = tpu.memref_slice %arg17[%c20_i32, %c0_i32_41] : memref<88x300xf32, #tpu.memory_space<vmem>> -> memref<1x300xf32, #tpu.memory_space<vmem>>
    tpu.enqueue_dma source(%61 : memref<1x300xf32, #tpu.memory_space<any>>) target(%62 : memref<1x300xf32, #tpu.memory_space<vmem>>) target_semaphore(%arg18 : memref<!tpu.dma_semaphore, #tpu.memory_space<semaphore_mem>>)
    %c21 = arith.constant 21 : index
    %63 = memref.load %arg1[%c21] : memref<88xi32, #tpu.memory_space<smem>>
    %c0_i32_42 = arith.constant 0 : i32
    %64 = tpu.memref_slice %arg2[%63, %c0_i32_42] : memref<50000x300xf32, #tpu.memory_space<any>> -> memref<1x300xf32, #tpu.memory_space<any>>
    %c21_i32 = arith.constant 21 : i32
    %c0_i32_43 = arith.constant 0 : i32
    %65 = tpu.memref_slice %arg17[%c21_i32, %c0_i32_43] : memref<88x300xf32, #tpu.memory_space<vmem>> -> memref<1x300xf32, #tpu.memory_space<vmem>>
    tpu.enqueue_dma source(%64 : memref<1x300xf32, #tpu.memory_space<any>>) target(%65 : memref<1x300xf32, #tpu.memory_space<vmem>>) target_semaphore(%arg18 : memref<!tpu.dma_semaphore, #tpu.memory_space<semaphore_mem>>)
    %c22 = arith.constant 22 : index
    %66 = memref.load %arg1[%c22] : memref<88xi32, #tpu.memory_space<smem>>
    %c0_i32_44 = arith.constant 0 : i32
    %67 = tpu.memref_slice %arg2[%66, %c0_i32_44] : memref<50000x300xf32, #tpu.memory_space<any>> -> memref<1x300xf32, #tpu.memory_space<any>>
    %c22_i32 = arith.constant 22 : i32
    %c0_i32_45 = arith.constant 0 : i32
    %68 = tpu.memref_slice %arg17[%c22_i32, %c0_i32_45] : memref<88x300xf32, #tpu.memory_space<vmem>> -> memref<1x300xf32, #tpu.memory_space<vmem>>
    tpu.enqueue_dma source(%67 : memref<1x300xf32, #tpu.memory_space<any>>) target(%68 : memref<1x300xf32, #tpu.memory_space<vmem>>) target_semaphore(%arg18 : memref<!tpu.dma_semaphore, #tpu.memory_space<semaphore_mem>>)
    %c23 = arith.constant 23 : index
    %69 = memref.load %arg1[%c23] : memref<88xi32, #tpu.memory_space<smem>>
    %c0_i32_46 = arith.constant 0 : i32
    %70 = tpu.memref_slice %arg2[%69, %c0_i32_46] : memref<50000x300xf32, #tpu.memory_space<any>> -> memref<1x300xf32, #tpu.memory_space<any>>
    %c23_i32 = arith.constant 23 : i32
    %c0_i32_47 = arith.constant 0 : i32
    %71 = tpu.memref_slice %arg17[%c23_i32, %c0_i32_47] : memref<88x300xf32, #tpu.memory_space<vmem>> -> memref<1x300xf32, #tpu.memory_space<vmem>>
    tpu.enqueue_dma source(%70 : memref<1x300xf32, #tpu.memory_space<any>>) target(%71 : memref<1x300xf32, #tpu.memory_space<vmem>>) target_semaphore(%arg18 : memref<!tpu.dma_semaphore, #tpu.memory_space<semaphore_mem>>)
    %c24 = arith.constant 24 : index
    %72 = memref.load %arg1[%c24] : memref<88xi32, #tpu.memory_space<smem>>
    %c0_i32_48 = arith.constant 0 : i32
    %73 = tpu.memref_slice %arg2[%72, %c0_i32_48] : memref<50000x300xf32, #tpu.memory_space<any>> -> memref<1x300xf32, #tpu.memory_space<any>>
    %c24_i32 = arith.constant 24 : i32
    %c0_i32_49 = arith.constant 0 : i32
    %74 = tpu.memref_slice %arg17[%c24_i32, %c0_i32_49] : memref<88x300xf32, #tpu.memory_space<vmem>> -> memref<1x300xf32, #tpu.memory_space<vmem>>
    tpu.enqueue_dma source(%73 : memref<1x300xf32, #tpu.memory_space<any>>) target(%74 : memref<1x300xf32, #tpu.memory_space<vmem>>) target_semaphore(%arg18 : memref<!tpu.dma_semaphore, #tpu.memory_space<semaphore_mem>>)
    %c25 = arith.constant 25 : index
    %75 = memref.load %arg1[%c25] : memref<88xi32, #tpu.memory_space<smem>>
    %c0_i32_50 = arith.constant 0 : i32
    %76 = tpu.memref_slice %arg2[%75, %c0_i32_50] : memref<50000x300xf32, #tpu.memory_space<any>> -> memref<1x300xf32, #tpu.memory_space<any>>
    %c25_i32 = arith.constant 25 : i32
    %c0_i32_51 = arith.constant 0 : i32
    %77 = tpu.memref_slice %arg17[%c25_i32, %c0_i32_51] : memref<88x300xf32, #tpu.memory_space<vmem>> -> memref<1x300xf32, #tpu.memory_space<vmem>>
    tpu.enqueue_dma source(%76 : memref<1x300xf32, #tpu.memory_space<any>>) target(%77 : memref<1x300xf32, #tpu.memory_space<vmem>>) target_semaphore(%arg18 : memref<!tpu.dma_semaphore, #tpu.memory_space<semaphore_mem>>)
    %c26 = arith.constant 26 : index
    %78 = memref.load %arg1[%c26] : memref<88xi32, #tpu.memory_space<smem>>
    %c0_i32_52 = arith.constant 0 : i32
    %79 = tpu.memref_slice %arg2[%78, %c0_i32_52] : memref<50000x300xf32, #tpu.memory_space<any>> -> memref<1x300xf32, #tpu.memory_space<any>>
    %c26_i32 = arith.constant 26 : i32
    %c0_i32_53 = arith.constant 0 : i32
    %80 = tpu.memref_slice %arg17[%c26_i32, %c0_i32_53] : memref<88x300xf32, #tpu.memory_space<vmem>> -> memref<1x300xf32, #tpu.memory_space<vmem>>
    tpu.enqueue_dma source(%79 : memref<1x300xf32, #tpu.memory_space<any>>) target(%80 : memref<1x300xf32, #tpu.memory_space<vmem>>) target_semaphore(%arg18 : memref<!tpu.dma_semaphore, #tpu.memory_space<semaphore_mem>>)
    %c27 = arith.constant 27 : index
    %81 = memref.load %arg1[%c27] : memref<88xi32, #tpu.memory_space<smem>>
    %c0_i32_54 = arith.constant 0 : i32
    %82 = tpu.memref_slice %arg2[%81, %c0_i32_54] : memref<50000x300xf32, #tpu.memory_space<any>> -> memref<1x300xf32, #tpu.memory_space<any>>
    %c27_i32 = arith.constant 27 : i32
    %c0_i32_55 = arith.constant 0 : i32
    %83 = tpu.memref_slice %arg17[%c27_i32, %c0_i32_55] : memref<88x300xf32, #tpu.memory_space<vmem>> -> memref<1x300xf32, #tpu.memory_space<vmem>>
    tpu.enqueue_dma source(%82 : memref<1x300xf32, #tpu.memory_space<any>>) target(%83 : memref<1x300xf32, #tpu.memory_space<vmem>>) target_semaphore(%arg18 : memref<!tpu.dma_semaphore, #tpu.memory_space<semaphore_mem>>)
    %c28 = arith.constant 28 : index
    %84 = memref.load %arg1[%c28] : memref<88xi32, #tpu.memory_space<smem>>
    %c0_i32_56 = arith.constant 0 : i32
    %85 = tpu.memref_slice %arg2[%84, %c0_i32_56] : memref<50000x300xf32, #tpu.memory_space<any>> -> memref<1x300xf32, #tpu.memory_space<any>>
    %c28_i32 = arith.constant 28 : i32
    %c0_i32_57 = arith.constant 0 : i32
    %86 = tpu.memref_slice %arg17[%c28_i32, %c0_i32_57] : memref<88x300xf32, #tpu.memory_space<vmem>> -> memref<1x300xf32, #tpu.memory_space<vmem>>
    tpu.enqueue_dma source(%85 : memref<1x300xf32, #tpu.memory_space<any>>) target(%86 : memref<1x300xf32, #tpu.memory_space<vmem>>) target_semaphore(%arg18 : memref<!tpu.dma_semaphore, #tpu.memory_space<semaphore_mem>>)
    %c29 = arith.constant 29 : index
    %87 = memref.load %arg1[%c29] : memref<88xi32, #tpu.memory_space<smem>>
    %c0_i32_58 = arith.constant 0 : i32
    %88 = tpu.memref_slice %arg2[%87, %c0_i32_58] : memref<50000x300xf32, #tpu.memory_space<any>> -> memref<1x300xf32, #tpu.memory_space<any>>
    %c29_i32 = arith.constant 29 : i32
    %c0_i32_59 = arith.constant 0 : i32
    %89 = tpu.memref_slice %arg17[%c29_i32, %c0_i32_59] : memref<88x300xf32, #tpu.memory_space<vmem>> -> memref<1x300xf32, #tpu.memory_space<vmem>>
    tpu.enqueue_dma source(%88 : memref<1x300xf32, #tpu.memory_space<any>>) target(%89 : memref<1x300xf32, #tpu.memory_space<vmem>>) target_semaphore(%arg18 : memref<!tpu.dma_semaphore, #tpu.memory_space<semaphore_mem>>)
    %c30 = arith.constant 30 : index
    %90 = memref.load %arg1[%c30] : memref<88xi32, #tpu.memory_space<smem>>
    %c0_i32_60 = arith.constant 0 : i32
    %91 = tpu.memref_slice %arg2[%90, %c0_i32_60] : memref<50000x300xf32, #tpu.memory_space<any>> -> memref<1x300xf32, #tpu.memory_space<any>>
    %c30_i32 = arith.constant 30 : i32
    %c0_i32_61 = arith.constant 0 : i32
    %92 = tpu.memref_slice %arg17[%c30_i32, %c0_i32_61] : memref<88x300xf32, #tpu.memory_space<vmem>> -> memref<1x300xf32, #tpu.memory_space<vmem>>
    tpu.enqueue_dma source(%91 : memref<1x300xf32, #tpu.memory_space<any>>) target(%92 : memref<1x300xf32, #tpu.memory_space<vmem>>) target_semaphore(%arg18 : memref<!tpu.dma_semaphore, #tpu.memory_space<semaphore_mem>>)
    %c31 = arith.constant 31 : index
    %93 = memref.load %arg1[%c31] : memref<88xi32, #tpu.memory_space<smem>>
    %c0_i32_62 = arith.constant 0 : i32
    %94 = tpu.memref_slice %arg2[%93, %c0_i32_62] : memref<50000x300xf32, #tpu.memory_space<any>> -> memref<1x300xf32, #tpu.memory_space<any>>
    %c31_i32 = arith.constant 31 : i32
    %c0_i32_63 = arith.constant 0 : i32
    %95 = tpu.memref_slice %arg17[%c31_i32, %c0_i32_63] : memref<88x300xf32, #tpu.memory_space<vmem>> -> memref<1x300xf32, #tpu.memory_space<vmem>>
    tpu.enqueue_dma source(%94 : memref<1x300xf32, #tpu.memory_space<any>>) target(%95 : memref<1x300xf32, #tpu.memory_space<vmem>>) target_semaphore(%arg18 : memref<!tpu.dma_semaphore, #tpu.memory_space<semaphore_mem>>)
    %c32 = arith.constant 32 : index
    %96 = memref.load %arg1[%c32] : memref<88xi32, #tpu.memory_space<smem>>
    %c0_i32_64 = arith.constant 0 : i32
    %97 = tpu.memref_slice %arg2[%96, %c0_i32_64] : memref<50000x300xf32, #tpu.memory_space<any>> -> memref<1x300xf32, #tpu.memory_space<any>>
    %c32_i32 = arith.constant 32 : i32
    %c0_i32_65 = arith.constant 0 : i32
    %98 = tpu.memref_slice %arg17[%c32_i32, %c0_i32_65] : memref<88x300xf32, #tpu.memory_space<vmem>> -> memref<1x300xf32, #tpu.memory_space<vmem>>
    tpu.enqueue_dma source(%97 : memref<1x300xf32, #tpu.memory_space<any>>) target(%98 : memref<1x300xf32, #tpu.memory_space<vmem>>) target_semaphore(%arg18 : memref<!tpu.dma_semaphore, #tpu.memory_space<semaphore_mem>>)
    %c33 = arith.constant 33 : index
    %99 = memref.load %arg1[%c33] : memref<88xi32, #tpu.memory_space<smem>>
    %c0_i32_66 = arith.constant 0 : i32
    %100 = tpu.memref_slice %arg2[%99, %c0_i32_66] : memref<50000x300xf32, #tpu.memory_space<any>> -> memref<1x300xf32, #tpu.memory_space<any>>
    %c33_i32 = arith.constant 33 : i32
    %c0_i32_67 = arith.constant 0 : i32
    %101 = tpu.memref_slice %arg17[%c33_i32, %c0_i32_67] : memref<88x300xf32, #tpu.memory_space<vmem>> -> memref<1x300xf32, #tpu.memory_space<vmem>>
    tpu.enqueue_dma source(%100 : memref<1x300xf32, #tpu.memory_space<any>>) target(%101 : memref<1x300xf32, #tpu.memory_space<vmem>>) target_semaphore(%arg18 : memref<!tpu.dma_semaphore, #tpu.memory_space<semaphore_mem>>)
    %c34 = arith.constant 34 : index
    %102 = memref.load %arg1[%c34] : memref<88xi32, #tpu.memory_space<smem>>
    %c0_i32_68 = arith.constant 0 : i32
    %103 = tpu.memref_slice %arg2[%102, %c0_i32_68] : memref<50000x300xf32, #tpu.memory_space<any>> -> memref<1x300xf32, #tpu.memory_space<any>>
    %c34_i32 = arith.constant 34 : i32
    %c0_i32_69 = arith.constant 0 : i32
    %104 = tpu.memref_slice %arg17[%c34_i32, %c0_i32_69] : memref<88x300xf32, #tpu.memory_space<vmem>> -> memref<1x300xf32, #tpu.memory_space<vmem>>
    tpu.enqueue_dma source(%103 : memref<1x300xf32, #tpu.memory_space<any>>) target(%104 : memref<1x300xf32, #tpu.memory_space<vmem>>) target_semaphore(%arg18 : memref<!tpu.dma_semaphore, #tpu.memory_space<semaphore_mem>>)
    %c35 = arith.constant 35 : index
    %105 = memref.load %arg1[%c35] : memref<88xi32, #tpu.memory_space<smem>>
    %c0_i32_70 = arith.constant 0 : i32
    %106 = tpu.memref_slice %arg2[%105, %c0_i32_70] : memref<50000x300xf32, #tpu.memory_space<any>> -> memref<1x300xf32, #tpu.memory_space<any>>
    %c35_i32 = arith.constant 35 : i32
    %c0_i32_71 = arith.constant 0 : i32
    %107 = tpu.memref_slice %arg17[%c35_i32, %c0_i32_71] : memref<88x300xf32, #tpu.memory_space<vmem>> -> memref<1x300xf32, #tpu.memory_space<vmem>>
    tpu.enqueue_dma source(%106 : memref<1x300xf32, #tpu.memory_space<any>>) target(%107 : memref<1x300xf32, #tpu.memory_space<vmem>>) target_semaphore(%arg18 : memref<!tpu.dma_semaphore, #tpu.memory_space<semaphore_mem>>)
    %c36 = arith.constant 36 : index
    %108 = memref.load %arg1[%c36] : memref<88xi32, #tpu.memory_space<smem>>
    %c0_i32_72 = arith.constant 0 : i32
    %109 = tpu.memref_slice %arg2[%108, %c0_i32_72] : memref<50000x300xf32, #tpu.memory_space<any>> -> memref<1x300xf32, #tpu.memory_space<any>>
    %c36_i32 = arith.constant 36 : i32
    %c0_i32_73 = arith.constant 0 : i32
    %110 = tpu.memref_slice %arg17[%c36_i32, %c0_i32_73] : memref<88x300xf32, #tpu.memory_space<vmem>> -> memref<1x300xf32, #tpu.memory_space<vmem>>
    tpu.enqueue_dma source(%109 : memref<1x300xf32, #tpu.memory_space<any>>) target(%110 : memref<1x300xf32, #tpu.memory_space<vmem>>) target_semaphore(%arg18 : memref<!tpu.dma_semaphore, #tpu.memory_space<semaphore_mem>>)
    %c37 = arith.constant 37 : index
    %111 = memref.load %arg1[%c37] : memref<88xi32, #tpu.memory_space<smem>>
    %c0_i32_74 = arith.constant 0 : i32
    %112 = tpu.memref_slice %arg2[%111, %c0_i32_74] : memref<50000x300xf32, #tpu.memory_space<any>> -> memref<1x300xf32, #tpu.memory_space<any>>
    %c37_i32 = arith.constant 37 : i32
    %c0_i32_75 = arith.constant 0 : i32
    %113 = tpu.memref_slice %arg17[%c37_i32, %c0_i32_75] : memref<88x300xf32, #tpu.memory_space<vmem>> -> memref<1x300xf32, #tpu.memory_space<vmem>>
    tpu.enqueue_dma source(%112 : memref<1x300xf32, #tpu.memory_space<any>>) target(%113 : memref<1x300xf32, #tpu.memory_space<vmem>>) target_semaphore(%arg18 : memref<!tpu.dma_semaphore, #tpu.memory_space<semaphore_mem>>)
    %c38 = arith.constant 38 : index
    %114 = memref.load %arg1[%c38] : memref<88xi32, #tpu.memory_space<smem>>
    %c0_i32_76 = arith.constant 0 : i32
    %115 = tpu.memref_slice %arg2[%114, %c0_i32_76] : memref<50000x300xf32, #tpu.memory_space<any>> -> memref<1x300xf32, #tpu.memory_space<any>>
    %c38_i32 = arith.constant 38 : i32
    %c0_i32_77 = arith.constant 0 : i32
    %116 = tpu.memref_slice %arg17[%c38_i32, %c0_i32_77] : memref<88x300xf32, #tpu.memory_space<vmem>> -> memref<1x300xf32, #tpu.memory_space<vmem>>
    tpu.enqueue_dma source(%115 : memref<1x300xf32, #tpu.memory_space<any>>) target(%116 : memref<1x300xf32, #tpu.memory_space<vmem>>) target_semaphore(%arg18 : memref<!tpu.dma_semaphore, #tpu.memory_space<semaphore_mem>>)
    %c39 = arith.constant 39 : index
    %117 = memref.load %arg1[%c39] : memref<88xi32, #tpu.memory_space<smem>>
    %c0_i32_78 = arith.constant 0 : i32
    %118 = tpu.memref_slice %arg2[%117, %c0_i32_78] : memref<50000x300xf32, #tpu.memory_space<any>> -> memref<1x300xf32, #tpu.memory_space<any>>
    %c39_i32 = arith.constant 39 : i32
    %c0_i32_79 = arith.constant 0 : i32
    %119 = tpu.memref_slice %arg17[%c39_i32, %c0_i32_79] : memref<88x300xf32, #tpu.memory_space<vmem>> -> memref<1x300xf32, #tpu.memory_space<vmem>>
    tpu.enqueue_dma source(%118 : memref<1x300xf32, #tpu.memory_space<any>>) target(%119 : memref<1x300xf32, #tpu.memory_space<vmem>>) target_semaphore(%arg18 : memref<!tpu.dma_semaphore, #tpu.memory_space<semaphore_mem>>)
    %c40 = arith.constant 40 : index
    %120 = memref.load %arg1[%c40] : memref<88xi32, #tpu.memory_space<smem>>
    %c0_i32_80 = arith.constant 0 : i32
    %121 = tpu.memref_slice %arg2[%120, %c0_i32_80] : memref<50000x300xf32, #tpu.memory_space<any>> -> memref<1x300xf32, #tpu.memory_space<any>>
    %c40_i32 = arith.constant 40 : i32
    %c0_i32_81 = arith.constant 0 : i32
    %122 = tpu.memref_slice %arg17[%c40_i32, %c0_i32_81] : memref<88x300xf32, #tpu.memory_space<vmem>> -> memref<1x300xf32, #tpu.memory_space<vmem>>
    tpu.enqueue_dma source(%121 : memref<1x300xf32, #tpu.memory_space<any>>) target(%122 : memref<1x300xf32, #tpu.memory_space<vmem>>) target_semaphore(%arg18 : memref<!tpu.dma_semaphore, #tpu.memory_space<semaphore_mem>>)
    %c41 = arith.constant 41 : index
    %123 = memref.load %arg1[%c41] : memref<88xi32, #tpu.memory_space<smem>>
    %c0_i32_82 = arith.constant 0 : i32
    %124 = tpu.memref_slice %arg2[%123, %c0_i32_82] : memref<50000x300xf32, #tpu.memory_space<any>> -> memref<1x300xf32, #tpu.memory_space<any>>
    %c41_i32 = arith.constant 41 : i32
    %c0_i32_83 = arith.constant 0 : i32
    %125 = tpu.memref_slice %arg17[%c41_i32, %c0_i32_83] : memref<88x300xf32, #tpu.memory_space<vmem>> -> memref<1x300xf32, #tpu.memory_space<vmem>>
    tpu.enqueue_dma source(%124 : memref<1x300xf32, #tpu.memory_space<any>>) target(%125 : memref<1x300xf32, #tpu.memory_space<vmem>>) target_semaphore(%arg18 : memref<!tpu.dma_semaphore, #tpu.memory_space<semaphore_mem>>)
    %c42 = arith.constant 42 : index
    %126 = memref.load %arg1[%c42] : memref<88xi32, #tpu.memory_space<smem>>
    %c0_i32_84 = arith.constant 0 : i32
    %127 = tpu.memref_slice %arg2[%126, %c0_i32_84] : memref<50000x300xf32, #tpu.memory_space<any>> -> memref<1x300xf32, #tpu.memory_space<any>>
    %c42_i32 = arith.constant 42 : i32
    %c0_i32_85 = arith.constant 0 : i32
    %128 = tpu.memref_slice %arg17[%c42_i32, %c0_i32_85] : memref<88x300xf32, #tpu.memory_space<vmem>> -> memref<1x300xf32, #tpu.memory_space<vmem>>
    tpu.enqueue_dma source(%127 : memref<1x300xf32, #tpu.memory_space<any>>) target(%128 : memref<1x300xf32, #tpu.memory_space<vmem>>) target_semaphore(%arg18 : memref<!tpu.dma_semaphore, #tpu.memory_space<semaphore_mem>>)
    %c43 = arith.constant 43 : index
    %129 = memref.load %arg1[%c43] : memref<88xi32, #tpu.memory_space<smem>>
    %c0_i32_86 = arith.constant 0 : i32
    %130 = tpu.memref_slice %arg2[%129, %c0_i32_86] : memref<50000x300xf32, #tpu.memory_space<any>> -> memref<1x300xf32, #tpu.memory_space<any>>
    %c43_i32 = arith.constant 43 : i32
    %c0_i32_87 = arith.constant 0 : i32
    %131 = tpu.memref_slice %arg17[%c43_i32, %c0_i32_87] : memref<88x300xf32, #tpu.memory_space<vmem>> -> memref<1x300xf32, #tpu.memory_space<vmem>>
    tpu.enqueue_dma source(%130 : memref<1x300xf32, #tpu.memory_space<any>>) target(%131 : memref<1x300xf32, #tpu.memory_space<vmem>>) target_semaphore(%arg18 : memref<!tpu.dma_semaphore, #tpu.memory_space<semaphore_mem>>)
    %c44 = arith.constant 44 : index
    %132 = memref.load %arg1[%c44] : memref<88xi32, #tpu.memory_space<smem>>
    %c0_i32_88 = arith.constant 0 : i32
    %133 = tpu.memref_slice %arg2[%132, %c0_i32_88] : memref<50000x300xf32, #tpu.memory_space<any>> -> memref<1x300xf32, #tpu.memory_space<any>>
    %c44_i32 = arith.constant 44 : i32
    %c0_i32_89 = arith.constant 0 : i32
    %134 = tpu.memref_slice %arg17[%c44_i32, %c0_i32_89] : memref<88x300xf32, #tpu.memory_space<vmem>> -> memref<1x300xf32, #tpu.memory_space<vmem>>
    tpu.enqueue_dma source(%133 : memref<1x300xf32, #tpu.memory_space<any>>) target(%134 : memref<1x300xf32, #tpu.memory_space<vmem>>) target_semaphore(%arg18 : memref<!tpu.dma_semaphore, #tpu.memory_space<semaphore_mem>>)
    %c45 = arith.constant 45 : index
    %135 = memref.load %arg1[%c45] : memref<88xi32, #tpu.memory_space<smem>>
    %c0_i32_90 = arith.constant 0 : i32
    %136 = tpu.memref_slice %arg2[%135, %c0_i32_90] : memref<50000x300xf32, #tpu.memory_space<any>> -> memref<1x300xf32, #tpu.memory_space<any>>
    %c45_i32 = arith.constant 45 : i32
    %c0_i32_91 = arith.constant 0 : i32
    %137 = tpu.memref_slice %arg17[%c45_i32, %c0_i32_91] : memref<88x300xf32, #tpu.memory_space<vmem>> -> memref<1x300xf32, #tpu.memory_space<vmem>>
    tpu.enqueue_dma source(%136 : memref<1x300xf32, #tpu.memory_space<any>>) target(%137 : memref<1x300xf32, #tpu.memory_space<vmem>>) target_semaphore(%arg18 : memref<!tpu.dma_semaphore, #tpu.memory_space<semaphore_mem>>)
    %c46 = arith.constant 46 : index
    %138 = memref.load %arg1[%c46] : memref<88xi32, #tpu.memory_space<smem>>
    %c0_i32_92 = arith.constant 0 : i32
    %139 = tpu.memref_slice %arg2[%138, %c0_i32_92] : memref<50000x300xf32, #tpu.memory_space<any>> -> memref<1x300xf32, #tpu.memory_space<any>>
    %c46_i32 = arith.constant 46 : i32
    %c0_i32_93 = arith.constant 0 : i32
    %140 = tpu.memref_slice %arg17[%c46_i32, %c0_i32_93] : memref<88x300xf32, #tpu.memory_space<vmem>> -> memref<1x300xf32, #tpu.memory_space<vmem>>
    tpu.enqueue_dma source(%139 : memref<1x300xf32, #tpu.memory_space<any>>) target(%140 : memref<1x300xf32, #tpu.memory_space<vmem>>) target_semaphore(%arg18 : memref<!tpu.dma_semaphore, #tpu.memory_space<semaphore_mem>>)
    %c47 = arith.constant 47 : index
    %141 = memref.load %arg1[%c47] : memref<88xi32, #tpu.memory_space<smem>>
    %c0_i32_94 = arith.constant 0 : i32
    %142 = tpu.memref_slice %arg2[%141, %c0_i32_94] : memref<50000x300xf32, #tpu.memory_space<any>> -> memref<1x300xf32, #tpu.memory_space<any>>
    %c47_i32 = arith.constant 47 : i32
    %c0_i32_95 = arith.constant 0 : i32
    %143 = tpu.memref_slice %arg17[%c47_i32, %c0_i32_95] : memref<88x300xf32, #tpu.memory_space<vmem>> -> memref<1x300xf32, #tpu.memory_space<vmem>>
    tpu.enqueue_dma source(%142 : memref<1x300xf32, #tpu.memory_space<any>>) target(%143 : memref<1x300xf32, #tpu.memory_space<vmem>>) target_semaphore(%arg18 : memref<!tpu.dma_semaphore, #tpu.memory_space<semaphore_mem>>)
    %c48 = arith.constant 48 : index
    %144 = memref.load %arg1[%c48] : memref<88xi32, #tpu.memory_space<smem>>
    %c0_i32_96 = arith.constant 0 : i32
    %145 = tpu.memref_slice %arg2[%144, %c0_i32_96] : memref<50000x300xf32, #tpu.memory_space<any>> -> memref<1x300xf32, #tpu.memory_space<any>>
    %c48_i32 = arith.constant 48 : i32
    %c0_i32_97 = arith.constant 0 : i32
    %146 = tpu.memref_slice %arg17[%c48_i32, %c0_i32_97] : memref<88x300xf32, #tpu.memory_space<vmem>> -> memref<1x300xf32, #tpu.memory_space<vmem>>
    tpu.enqueue_dma source(%145 : memref<1x300xf32, #tpu.memory_space<any>>) target(%146 : memref<1x300xf32, #tpu.memory_space<vmem>>) target_semaphore(%arg18 : memref<!tpu.dma_semaphore, #tpu.memory_space<semaphore_mem>>)
    %c49 = arith.constant 49 : index
    %147 = memref.load %arg1[%c49] : memref<88xi32, #tpu.memory_space<smem>>
    %c0_i32_98 = arith.constant 0 : i32
    %148 = tpu.memref_slice %arg2[%147, %c0_i32_98] : memref<50000x300xf32, #tpu.memory_space<any>> -> memref<1x300xf32, #tpu.memory_space<any>>
    %c49_i32 = arith.constant 49 : i32
    %c0_i32_99 = arith.constant 0 : i32
    %149 = tpu.memref_slice %arg17[%c49_i32, %c0_i32_99] : memref<88x300xf32, #tpu.memory_space<vmem>> -> memref<1x300xf32, #tpu.memory_space<vmem>>
    tpu.enqueue_dma source(%148 : memref<1x300xf32, #tpu.memory_space<any>>) target(%149 : memref<1x300xf32, #tpu.memory_space<vmem>>) target_semaphore(%arg18 : memref<!tpu.dma_semaphore, #tpu.memory_space<semaphore_mem>>)
    %c50 = arith.constant 50 : index
    %150 = memref.load %arg1[%c50] : memref<88xi32, #tpu.memory_space<smem>>
    %c0_i32_100 = arith.constant 0 : i32
    %151 = tpu.memref_slice %arg2[%150, %c0_i32_100] : memref<50000x300xf32, #tpu.memory_space<any>> -> memref<1x300xf32, #tpu.memory_space<any>>
    %c50_i32 = arith.constant 50 : i32
    %c0_i32_101 = arith.constant 0 : i32
    %152 = tpu.memref_slice %arg17[%c50_i32, %c0_i32_101] : memref<88x300xf32, #tpu.memory_space<vmem>> -> memref<1x300xf32, #tpu.memory_space<vmem>>
    tpu.enqueue_dma source(%151 : memref<1x300xf32, #tpu.memory_space<any>>) target(%152 : memref<1x300xf32, #tpu.memory_space<vmem>>) target_semaphore(%arg18 : memref<!tpu.dma_semaphore, #tpu.memory_space<semaphore_mem>>)
    %c51 = arith.constant 51 : index
    %153 = memref.load %arg1[%c51] : memref<88xi32, #tpu.memory_space<smem>>
    %c0_i32_102 = arith.constant 0 : i32
    %154 = tpu.memref_slice %arg2[%153, %c0_i32_102] : memref<50000x300xf32, #tpu.memory_space<any>> -> memref<1x300xf32, #tpu.memory_space<any>>
    %c51_i32 = arith.constant 51 : i32
    %c0_i32_103 = arith.constant 0 : i32
    %155 = tpu.memref_slice %arg17[%c51_i32, %c0_i32_103] : memref<88x300xf32, #tpu.memory_space<vmem>> -> memref<1x300xf32, #tpu.memory_space<vmem>>
    tpu.enqueue_dma source(%154 : memref<1x300xf32, #tpu.memory_space<any>>) target(%155 : memref<1x300xf32, #tpu.memory_space<vmem>>) target_semaphore(%arg18 : memref<!tpu.dma_semaphore, #tpu.memory_space<semaphore_mem>>)
    %c52 = arith.constant 52 : index
    %156 = memref.load %arg1[%c52] : memref<88xi32, #tpu.memory_space<smem>>
    %c0_i32_104 = arith.constant 0 : i32
    %157 = tpu.memref_slice %arg2[%156, %c0_i32_104] : memref<50000x300xf32, #tpu.memory_space<any>> -> memref<1x300xf32, #tpu.memory_space<any>>
    %c52_i32 = arith.constant 52 : i32
    %c0_i32_105 = arith.constant 0 : i32
    %158 = tpu.memref_slice %arg17[%c52_i32, %c0_i32_105] : memref<88x300xf32, #tpu.memory_space<vmem>> -> memref<1x300xf32, #tpu.memory_space<vmem>>
    tpu.enqueue_dma source(%157 : memref<1x300xf32, #tpu.memory_space<any>>) target(%158 : memref<1x300xf32, #tpu.memory_space<vmem>>) target_semaphore(%arg18 : memref<!tpu.dma_semaphore, #tpu.memory_space<semaphore_mem>>)
    %c53 = arith.constant 53 : index
    %159 = memref.load %arg1[%c53] : memref<88xi32, #tpu.memory_space<smem>>
    %c0_i32_106 = arith.constant 0 : i32
    %160 = tpu.memref_slice %arg2[%159, %c0_i32_106] : memref<50000x300xf32, #tpu.memory_space<any>> -> memref<1x300xf32, #tpu.memory_space<any>>
    %c53_i32 = arith.constant 53 : i32
    %c0_i32_107 = arith.constant 0 : i32
    %161 = tpu.memref_slice %arg17[%c53_i32, %c0_i32_107] : memref<88x300xf32, #tpu.memory_space<vmem>> -> memref<1x300xf32, #tpu.memory_space<vmem>>
    tpu.enqueue_dma source(%160 : memref<1x300xf32, #tpu.memory_space<any>>) target(%161 : memref<1x300xf32, #tpu.memory_space<vmem>>) target_semaphore(%arg18 : memref<!tpu.dma_semaphore, #tpu.memory_space<semaphore_mem>>)
    %c54 = arith.constant 54 : index
    %162 = memref.load %arg1[%c54] : memref<88xi32, #tpu.memory_space<smem>>
    %c0_i32_108 = arith.constant 0 : i32
    %163 = tpu.memref_slice %arg2[%162, %c0_i32_108] : memref<50000x300xf32, #tpu.memory_space<any>> -> memref<1x300xf32, #tpu.memory_space<any>>
    %c54_i32 = arith.constant 54 : i32
    %c0_i32_109 = arith.constant 0 : i32
    %164 = tpu.memref_slice %arg17[%c54_i32, %c0_i32_109] : memref<88x300xf32, #tpu.memory_space<vmem>> -> memref<1x300xf32, #tpu.memory_space<vmem>>
    tpu.enqueue_dma source(%163 : memref<1x300xf32, #tpu.memory_space<any>>) target(%164 : memref<1x300xf32, #tpu.memory_space<vmem>>) target_semaphore(%arg18 : memref<!tpu.dma_semaphore, #tpu.memory_space<semaphore_mem>>)
    %c55 = arith.constant 55 : index
    %165 = memref.load %arg1[%c55] : memref<88xi32, #tpu.memory_space<smem>>
    %c0_i32_110 = arith.constant 0 : i32
    %166 = tpu.memref_slice %arg2[%165, %c0_i32_110] : memref<50000x300xf32, #tpu.memory_space<any>> -> memref<1x300xf32, #tpu.memory_space<any>>
    %c55_i32 = arith.constant 55 : i32
    %c0_i32_111 = arith.constant 0 : i32
    %167 = tpu.memref_slice %arg17[%c55_i32, %c0_i32_111] : memref<88x300xf32, #tpu.memory_space<vmem>> -> memref<1x300xf32, #tpu.memory_space<vmem>>
    tpu.enqueue_dma source(%166 : memref<1x300xf32, #tpu.memory_space<any>>) target(%167 : memref<1x300xf32, #tpu.memory_space<vmem>>) target_semaphore(%arg18 : memref<!tpu.dma_semaphore, #tpu.memory_space<semaphore_mem>>)
    %c56 = arith.constant 56 : index
    %168 = memref.load %arg1[%c56] : memref<88xi32, #tpu.memory_space<smem>>
    %c0_i32_112 = arith.constant 0 : i32
    %169 = tpu.memref_slice %arg2[%168, %c0_i32_112] : memref<50000x300xf32, #tpu.memory_space<any>> -> memref<1x300xf32, #tpu.memory_space<any>>
    %c56_i32 = arith.constant 56 : i32
    %c0_i32_113 = arith.constant 0 : i32
    %170 = tpu.memref_slice %arg17[%c56_i32, %c0_i32_113] : memref<88x300xf32, #tpu.memory_space<vmem>> -> memref<1x300xf32, #tpu.memory_space<vmem>>
    tpu.enqueue_dma source(%169 : memref<1x300xf32, #tpu.memory_space<any>>) target(%170 : memref<1x300xf32, #tpu.memory_space<vmem>>) target_semaphore(%arg18 : memref<!tpu.dma_semaphore, #tpu.memory_space<semaphore_mem>>)
    %c57 = arith.constant 57 : index
    %171 = memref.load %arg1[%c57] : memref<88xi32, #tpu.memory_space<smem>>
    %c0_i32_114 = arith.constant 0 : i32
    %172 = tpu.memref_slice %arg2[%171, %c0_i32_114] : memref<50000x300xf32, #tpu.memory_space<any>> -> memref<1x300xf32, #tpu.memory_space<any>>
    %c57_i32 = arith.constant 57 : i32
    %c0_i32_115 = arith.constant 0 : i32
    %173 = tpu.memref_slice %arg17[%c57_i32, %c0_i32_115] : memref<88x300xf32, #tpu.memory_space<vmem>> -> memref<1x300xf32, #tpu.memory_space<vmem>>
    tpu.enqueue_dma source(%172 : memref<1x300xf32, #tpu.memory_space<any>>) target(%173 : memref<1x300xf32, #tpu.memory_space<vmem>>) target_semaphore(%arg18 : memref<!tpu.dma_semaphore, #tpu.memory_space<semaphore_mem>>)
    %c58 = arith.constant 58 : index
    %174 = memref.load %arg1[%c58] : memref<88xi32, #tpu.memory_space<smem>>
    %c0_i32_116 = arith.constant 0 : i32
    %175 = tpu.memref_slice %arg2[%174, %c0_i32_116] : memref<50000x300xf32, #tpu.memory_space<any>> -> memref<1x300xf32, #tpu.memory_space<any>>
    %c58_i32 = arith.constant 58 : i32
    %c0_i32_117 = arith.constant 0 : i32
    %176 = tpu.memref_slice %arg17[%c58_i32, %c0_i32_117] : memref<88x300xf32, #tpu.memory_space<vmem>> -> memref<1x300xf32, #tpu.memory_space<vmem>>
    tpu.enqueue_dma source(%175 : memref<1x300xf32, #tpu.memory_space<any>>) target(%176 : memref<1x300xf32, #tpu.memory_space<vmem>>) target_semaphore(%arg18 : memref<!tpu.dma_semaphore, #tpu.memory_space<semaphore_mem>>)
    %c59 = arith.constant 59 : index
    %177 = memref.load %arg1[%c59] : memref<88xi32, #tpu.memory_space<smem>>
    %c0_i32_118 = arith.constant 0 : i32
    %178 = tpu.memref_slice %arg2[%177, %c0_i32_118] : memref<50000x300xf32, #tpu.memory_space<any>> -> memref<1x300xf32, #tpu.memory_space<any>>
    %c59_i32 = arith.constant 59 : i32
    %c0_i32_119 = arith.constant 0 : i32
    %179 = tpu.memref_slice %arg17[%c59_i32, %c0_i32_119] : memref<88x300xf32, #tpu.memory_space<vmem>> -> memref<1x300xf32, #tpu.memory_space<vmem>>
    tpu.enqueue_dma source(%178 : memref<1x300xf32, #tpu.memory_space<any>>) target(%179 : memref<1x300xf32, #tpu.memory_space<vmem>>) target_semaphore(%arg18 : memref<!tpu.dma_semaphore, #tpu.memory_space<semaphore_mem>>)
    %c60 = arith.constant 60 : index
    %180 = memref.load %arg1[%c60] : memref<88xi32, #tpu.memory_space<smem>>
    %c0_i32_120 = arith.constant 0 : i32
    %181 = tpu.memref_slice %arg2[%180, %c0_i32_120] : memref<50000x300xf32, #tpu.memory_space<any>> -> memref<1x300xf32, #tpu.memory_space<any>>
    %c60_i32 = arith.constant 60 : i32
    %c0_i32_121 = arith.constant 0 : i32
    %182 = tpu.memref_slice %arg17[%c60_i32, %c0_i32_121] : memref<88x300xf32, #tpu.memory_space<vmem>> -> memref<1x300xf32, #tpu.memory_space<vmem>>
    tpu.enqueue_dma source(%181 : memref<1x300xf32, #tpu.memory_space<any>>) target(%182 : memref<1x300xf32, #tpu.memory_space<vmem>>) target_semaphore(%arg18 : memref<!tpu.dma_semaphore, #tpu.memory_space<semaphore_mem>>)
    %c61 = arith.constant 61 : index
    %183 = memref.load %arg1[%c61] : memref<88xi32, #tpu.memory_space<smem>>
    %c0_i32_122 = arith.constant 0 : i32
    %184 = tpu.memref_slice %arg2[%183, %c0_i32_122] : memref<50000x300xf32, #tpu.memory_space<any>> -> memref<1x300xf32, #tpu.memory_space<any>>
    %c61_i32 = arith.constant 61 : i32
    %c0_i32_123 = arith.constant 0 : i32
    %185 = tpu.memref_slice %arg17[%c61_i32, %c0_i32_123] : memref<88x300xf32, #tpu.memory_space<vmem>> -> memref<1x300xf32, #tpu.memory_space<vmem>>
    tpu.enqueue_dma source(%184 : memref<1x300xf32, #tpu.memory_space<any>>) target(%185 : memref<1x300xf32, #tpu.memory_space<vmem>>) target_semaphore(%arg18 : memref<!tpu.dma_semaphore, #tpu.memory_space<semaphore_mem>>)
    %c62 = arith.constant 62 : index
    %186 = memref.load %arg1[%c62] : memref<88xi32, #tpu.memory_space<smem>>
    %c0_i32_124 = arith.constant 0 : i32
    %187 = tpu.memref_slice %arg2[%186, %c0_i32_124] : memref<50000x300xf32, #tpu.memory_space<any>> -> memref<1x300xf32, #tpu.memory_space<any>>
    %c62_i32 = arith.constant 62 : i32
    %c0_i32_125 = arith.constant 0 : i32
    %188 = tpu.memref_slice %arg17[%c62_i32, %c0_i32_125] : memref<88x300xf32, #tpu.memory_space<vmem>> -> memref<1x300xf32, #tpu.memory_space<vmem>>
    tpu.enqueue_dma source(%187 : memref<1x300xf32, #tpu.memory_space<any>>) target(%188 : memref<1x300xf32, #tpu.memory_space<vmem>>) target_semaphore(%arg18 : memref<!tpu.dma_semaphore, #tpu.memory_space<semaphore_mem>>)
    %c63 = arith.constant 63 : index
    %189 = memref.load %arg1[%c63] : memref<88xi32, #tpu.memory_space<smem>>
    %c0_i32_126 = arith.constant 0 : i32
    %190 = tpu.memref_slice %arg2[%189, %c0_i32_126] : memref<50000x300xf32, #tpu.memory_space<any>> -> memref<1x300xf32, #tpu.memory_space<any>>
    %c63_i32 = arith.constant 63 : i32
    %c0_i32_127 = arith.constant 0 : i32
    %191 = tpu.memref_slice %arg17[%c63_i32, %c0_i32_127] : memref<88x300xf32, #tpu.memory_space<vmem>> -> memref<1x300xf32, #tpu.memory_space<vmem>>
    tpu.enqueue_dma source(%190 : memref<1x300xf32, #tpu.memory_space<any>>) target(%191 : memref<1x300xf32, #tpu.memory_space<vmem>>) target_semaphore(%arg18 : memref<!tpu.dma_semaphore, #tpu.memory_space<semaphore_mem>>)
    %c64 = arith.constant 64 : index
    %192 = memref.load %arg1[%c64] : memref<88xi32, #tpu.memory_space<smem>>
    %c0_i32_128 = arith.constant 0 : i32
    %193 = tpu.memref_slice %arg2[%192, %c0_i32_128] : memref<50000x300xf32, #tpu.memory_space<any>> -> memref<1x300xf32, #tpu.memory_space<any>>
    %c64_i32 = arith.constant 64 : i32
    %c0_i32_129 = arith.constant 0 : i32
    %194 = tpu.memref_slice %arg17[%c64_i32, %c0_i32_129] : memref<88x300xf32, #tpu.memory_space<vmem>> -> memref<1x300xf32, #tpu.memory_space<vmem>>
    tpu.enqueue_dma source(%193 : memref<1x300xf32, #tpu.memory_space<any>>) target(%194 : memref<1x300xf32, #tpu.memory_space<vmem>>) target_semaphore(%arg18 : memref<!tpu.dma_semaphore, #tpu.memory_space<semaphore_mem>>)
    %c65 = arith.constant 65 : index
    %195 = memref.load %arg1[%c65] : memref<88xi32, #tpu.memory_space<smem>>
    %c0_i32_130 = arith.constant 0 : i32
    %196 = tpu.memref_slice %arg2[%195, %c0_i32_130] : memref<50000x300xf32, #tpu.memory_space<any>> -> memref<1x300xf32, #tpu.memory_space<any>>
    %c65_i32 = arith.constant 65 : i32
    %c0_i32_131 = arith.constant 0 : i32
    %197 = tpu.memref_slice %arg17[%c65_i32, %c0_i32_131] : memref<88x300xf32, #tpu.memory_space<vmem>> -> memref<1x300xf32, #tpu.memory_space<vmem>>
    tpu.enqueue_dma source(%196 : memref<1x300xf32, #tpu.memory_space<any>>) target(%197 : memref<1x300xf32, #tpu.memory_space<vmem>>) target_semaphore(%arg18 : memref<!tpu.dma_semaphore, #tpu.memory_space<semaphore_mem>>)
    %c66 = arith.constant 66 : index
    %198 = memref.load %arg1[%c66] : memref<88xi32, #tpu.memory_space<smem>>
    %c0_i32_132 = arith.constant 0 : i32
    %199 = tpu.memref_slice %arg2[%198, %c0_i32_132] : memref<50000x300xf32, #tpu.memory_space<any>> -> memref<1x300xf32, #tpu.memory_space<any>>
    %c66_i32 = arith.constant 66 : i32
    %c0_i32_133 = arith.constant 0 : i32
    %200 = tpu.memref_slice %arg17[%c66_i32, %c0_i32_133] : memref<88x300xf32, #tpu.memory_space<vmem>> -> memref<1x300xf32, #tpu.memory_space<vmem>>
    tpu.enqueue_dma source(%199 : memref<1x300xf32, #tpu.memory_space<any>>) target(%200 : memref<1x300xf32, #tpu.memory_space<vmem>>) target_semaphore(%arg18 : memref<!tpu.dma_semaphore, #tpu.memory_space<semaphore_mem>>)
    %c67 = arith.constant 67 : index
    %201 = memref.load %arg1[%c67] : memref<88xi32, #tpu.memory_space<smem>>
    %c0_i32_134 = arith.constant 0 : i32
    %202 = tpu.memref_slice %arg2[%201, %c0_i32_134] : memref<50000x300xf32, #tpu.memory_space<any>> -> memref<1x300xf32, #tpu.memory_space<any>>
    %c67_i32 = arith.constant 67 : i32
    %c0_i32_135 = arith.constant 0 : i32
    %203 = tpu.memref_slice %arg17[%c67_i32, %c0_i32_135] : memref<88x300xf32, #tpu.memory_space<vmem>> -> memref<1x300xf32, #tpu.memory_space<vmem>>
    tpu.enqueue_dma source(%202 : memref<1x300xf32, #tpu.memory_space<any>>) target(%203 : memref<1x300xf32, #tpu.memory_space<vmem>>) target_semaphore(%arg18 : memref<!tpu.dma_semaphore, #tpu.memory_space<semaphore_mem>>)
    %c68 = arith.constant 68 : index
    %204 = memref.load %arg1[%c68] : memref<88xi32, #tpu.memory_space<smem>>
    %c0_i32_136 = arith.constant 0 : i32
    %205 = tpu.memref_slice %arg2[%204, %c0_i32_136] : memref<50000x300xf32, #tpu.memory_space<any>> -> memref<1x300xf32, #tpu.memory_space<any>>
    %c68_i32 = arith.constant 68 : i32
    %c0_i32_137 = arith.constant 0 : i32
    %206 = tpu.memref_slice %arg17[%c68_i32, %c0_i32_137] : memref<88x300xf32, #tpu.memory_space<vmem>> -> memref<1x300xf32, #tpu.memory_space<vmem>>
    tpu.enqueue_dma source(%205 : memref<1x300xf32, #tpu.memory_space<any>>) target(%206 : memref<1x300xf32, #tpu.memory_space<vmem>>) target_semaphore(%arg18 : memref<!tpu.dma_semaphore, #tpu.memory_space<semaphore_mem>>)
    %c69 = arith.constant 69 : index
    %207 = memref.load %arg1[%c69] : memref<88xi32, #tpu.memory_space<smem>>
    %c0_i32_138 = arith.constant 0 : i32
    %208 = tpu.memref_slice %arg2[%207, %c0_i32_138] : memref<50000x300xf32, #tpu.memory_space<any>> -> memref<1x300xf32, #tpu.memory_space<any>>
    %c69_i32 = arith.constant 69 : i32
    %c0_i32_139 = arith.constant 0 : i32
    %209 = tpu.memref_slice %arg17[%c69_i32, %c0_i32_139] : memref<88x300xf32, #tpu.memory_space<vmem>> -> memref<1x300xf32, #tpu.memory_space<vmem>>
    tpu.enqueue_dma source(%208 : memref<1x300xf32, #tpu.memory_space<any>>) target(%209 : memref<1x300xf32, #tpu.memory_space<vmem>>) target_semaphore(%arg18 : memref<!tpu.dma_semaphore, #tpu.memory_space<semaphore_mem>>)
    %c70 = arith.constant 70 : index
    %210 = memref.load %arg1[%c70] : memref<88xi32, #tpu.memory_space<smem>>
    %c0_i32_140 = arith.constant 0 : i32
    %211 = tpu.memref_slice %arg2[%210, %c0_i32_140] : memref<50000x300xf32, #tpu.memory_space<any>> -> memref<1x300xf32, #tpu.memory_space<any>>
    %c70_i32 = arith.constant 70 : i32
    %c0_i32_141 = arith.constant 0 : i32
    %212 = tpu.memref_slice %arg17[%c70_i32, %c0_i32_141] : memref<88x300xf32, #tpu.memory_space<vmem>> -> memref<1x300xf32, #tpu.memory_space<vmem>>
    tpu.enqueue_dma source(%211 : memref<1x300xf32, #tpu.memory_space<any>>) target(%212 : memref<1x300xf32, #tpu.memory_space<vmem>>) target_semaphore(%arg18 : memref<!tpu.dma_semaphore, #tpu.memory_space<semaphore_mem>>)
    %c71 = arith.constant 71 : index
    %213 = memref.load %arg1[%c71] : memref<88xi32, #tpu.memory_space<smem>>
    %c0_i32_142 = arith.constant 0 : i32
    %214 = tpu.memref_slice %arg2[%213, %c0_i32_142] : memref<50000x300xf32, #tpu.memory_space<any>> -> memref<1x300xf32, #tpu.memory_space<any>>
    %c71_i32 = arith.constant 71 : i32
    %c0_i32_143 = arith.constant 0 : i32
    %215 = tpu.memref_slice %arg17[%c71_i32, %c0_i32_143] : memref<88x300xf32, #tpu.memory_space<vmem>> -> memref<1x300xf32, #tpu.memory_space<vmem>>
    tpu.enqueue_dma source(%214 : memref<1x300xf32, #tpu.memory_space<any>>) target(%215 : memref<1x300xf32, #tpu.memory_space<vmem>>) target_semaphore(%arg18 : memref<!tpu.dma_semaphore, #tpu.memory_space<semaphore_mem>>)
    %c72 = arith.constant 72 : index
    %216 = memref.load %arg1[%c72] : memref<88xi32, #tpu.memory_space<smem>>
    %c0_i32_144 = arith.constant 0 : i32
    %217 = tpu.memref_slice %arg2[%216, %c0_i32_144] : memref<50000x300xf32, #tpu.memory_space<any>> -> memref<1x300xf32, #tpu.memory_space<any>>
    %c72_i32 = arith.constant 72 : i32
    %c0_i32_145 = arith.constant 0 : i32
    %218 = tpu.memref_slice %arg17[%c72_i32, %c0_i32_145] : memref<88x300xf32, #tpu.memory_space<vmem>> -> memref<1x300xf32, #tpu.memory_space<vmem>>
    tpu.enqueue_dma source(%217 : memref<1x300xf32, #tpu.memory_space<any>>) target(%218 : memref<1x300xf32, #tpu.memory_space<vmem>>) target_semaphore(%arg18 : memref<!tpu.dma_semaphore, #tpu.memory_space<semaphore_mem>>)
    %c73 = arith.constant 73 : index
    %219 = memref.load %arg1[%c73] : memref<88xi32, #tpu.memory_space<smem>>
    %c0_i32_146 = arith.constant 0 : i32
    %220 = tpu.memref_slice %arg2[%219, %c0_i32_146] : memref<50000x300xf32, #tpu.memory_space<any>> -> memref<1x300xf32, #tpu.memory_space<any>>
    %c73_i32 = arith.constant 73 : i32
    %c0_i32_147 = arith.constant 0 : i32
    %221 = tpu.memref_slice %arg17[%c73_i32, %c0_i32_147] : memref<88x300xf32, #tpu.memory_space<vmem>> -> memref<1x300xf32, #tpu.memory_space<vmem>>
    tpu.enqueue_dma source(%220 : memref<1x300xf32, #tpu.memory_space<any>>) target(%221 : memref<1x300xf32, #tpu.memory_space<vmem>>) target_semaphore(%arg18 : memref<!tpu.dma_semaphore, #tpu.memory_space<semaphore_mem>>)
    %c74 = arith.constant 74 : index
    %222 = memref.load %arg1[%c74] : memref<88xi32, #tpu.memory_space<smem>>
    %c0_i32_148 = arith.constant 0 : i32
    %223 = tpu.memref_slice %arg2[%222, %c0_i32_148] : memref<50000x300xf32, #tpu.memory_space<any>> -> memref<1x300xf32, #tpu.memory_space<any>>
    %c74_i32 = arith.constant 74 : i32
    %c0_i32_149 = arith.constant 0 : i32
    %224 = tpu.memref_slice %arg17[%c74_i32, %c0_i32_149] : memref<88x300xf32, #tpu.memory_space<vmem>> -> memref<1x300xf32, #tpu.memory_space<vmem>>
    tpu.enqueue_dma source(%223 : memref<1x300xf32, #tpu.memory_space<any>>) target(%224 : memref<1x300xf32, #tpu.memory_space<vmem>>) target_semaphore(%arg18 : memref<!tpu.dma_semaphore, #tpu.memory_space<semaphore_mem>>)
    %c75 = arith.constant 75 : index
    %225 = memref.load %arg1[%c75] : memref<88xi32, #tpu.memory_space<smem>>
    %c0_i32_150 = arith.constant 0 : i32
    %226 = tpu.memref_slice %arg2[%225, %c0_i32_150] : memref<50000x300xf32, #tpu.memory_space<any>> -> memref<1x300xf32, #tpu.memory_space<any>>
    %c75_i32 = arith.constant 75 : i32
    %c0_i32_151 = arith.constant 0 : i32
    %227 = tpu.memref_slice %arg17[%c75_i32, %c0_i32_151] : memref<88x300xf32, #tpu.memory_space<vmem>> -> memref<1x300xf32, #tpu.memory_space<vmem>>
    tpu.enqueue_dma source(%226 : memref<1x300xf32, #tpu.memory_space<any>>) target(%227 : memref<1x300xf32, #tpu.memory_space<vmem>>) target_semaphore(%arg18 : memref<!tpu.dma_semaphore, #tpu.memory_space<semaphore_mem>>)
    %c76 = arith.constant 76 : index
    %228 = memref.load %arg1[%c76] : memref<88xi32, #tpu.memory_space<smem>>
    %c0_i32_152 = arith.constant 0 : i32
    %229 = tpu.memref_slice %arg2[%228, %c0_i32_152] : memref<50000x300xf32, #tpu.memory_space<any>> -> memref<1x300xf32, #tpu.memory_space<any>>
    %c76_i32 = arith.constant 76 : i32
    %c0_i32_153 = arith.constant 0 : i32
    %230 = tpu.memref_slice %arg17[%c76_i32, %c0_i32_153] : memref<88x300xf32, #tpu.memory_space<vmem>> -> memref<1x300xf32, #tpu.memory_space<vmem>>
    tpu.enqueue_dma source(%229 : memref<1x300xf32, #tpu.memory_space<any>>) target(%230 : memref<1x300xf32, #tpu.memory_space<vmem>>) target_semaphore(%arg18 : memref<!tpu.dma_semaphore, #tpu.memory_space<semaphore_mem>>)
    %c77 = arith.constant 77 : index
    %231 = memref.load %arg1[%c77] : memref<88xi32, #tpu.memory_space<smem>>
    %c0_i32_154 = arith.constant 0 : i32
    %232 = tpu.memref_slice %arg2[%231, %c0_i32_154] : memref<50000x300xf32, #tpu.memory_space<any>> -> memref<1x300xf32, #tpu.memory_space<any>>
    %c77_i32 = arith.constant 77 : i32
    %c0_i32_155 = arith.constant 0 : i32
    %233 = tpu.memref_slice %arg17[%c77_i32, %c0_i32_155] : memref<88x300xf32, #tpu.memory_space<vmem>> -> memref<1x300xf32, #tpu.memory_space<vmem>>
    tpu.enqueue_dma source(%232 : memref<1x300xf32, #tpu.memory_space<any>>) target(%233 : memref<1x300xf32, #tpu.memory_space<vmem>>) target_semaphore(%arg18 : memref<!tpu.dma_semaphore, #tpu.memory_space<semaphore_mem>>)
    %c78 = arith.constant 78 : index
    %234 = memref.load %arg1[%c78] : memref<88xi32, #tpu.memory_space<smem>>
    %c0_i32_156 = arith.constant 0 : i32
    %235 = tpu.memref_slice %arg2[%234, %c0_i32_156] : memref<50000x300xf32, #tpu.memory_space<any>> -> memref<1x300xf32, #tpu.memory_space<any>>
    %c78_i32 = arith.constant 78 : i32
    %c0_i32_157 = arith.constant 0 : i32
    %236 = tpu.memref_slice %arg17[%c78_i32, %c0_i32_157] : memref<88x300xf32, #tpu.memory_space<vmem>> -> memref<1x300xf32, #tpu.memory_space<vmem>>
    tpu.enqueue_dma source(%235 : memref<1x300xf32, #tpu.memory_space<any>>) target(%236 : memref<1x300xf32, #tpu.memory_space<vmem>>) target_semaphore(%arg18 : memref<!tpu.dma_semaphore, #tpu.memory_space<semaphore_mem>>)
    %c79 = arith.constant 79 : index
    %237 = memref.load %arg1[%c79] : memref<88xi32, #tpu.memory_space<smem>>
    %c0_i32_158 = arith.constant 0 : i32
    %238 = tpu.memref_slice %arg2[%237, %c0_i32_158] : memref<50000x300xf32, #tpu.memory_space<any>> -> memref<1x300xf32, #tpu.memory_space<any>>
    %c79_i32 = arith.constant 79 : i32
    %c0_i32_159 = arith.constant 0 : i32
    %239 = tpu.memref_slice %arg17[%c79_i32, %c0_i32_159] : memref<88x300xf32, #tpu.memory_space<vmem>> -> memref<1x300xf32, #tpu.memory_space<vmem>>
    tpu.enqueue_dma source(%238 : memref<1x300xf32, #tpu.memory_space<any>>) target(%239 : memref<1x300xf32, #tpu.memory_space<vmem>>) target_semaphore(%arg18 : memref<!tpu.dma_semaphore, #tpu.memory_space<semaphore_mem>>)
    %c80 = arith.constant 80 : index
    %240 = memref.load %arg1[%c80] : memref<88xi32, #tpu.memory_space<smem>>
    %c0_i32_160 = arith.constant 0 : i32
    %241 = tpu.memref_slice %arg2[%240, %c0_i32_160] : memref<50000x300xf32, #tpu.memory_space<any>> -> memref<1x300xf32, #tpu.memory_space<any>>
    %c80_i32 = arith.constant 80 : i32
    %c0_i32_161 = arith.constant 0 : i32
    %242 = tpu.memref_slice %arg17[%c80_i32, %c0_i32_161] : memref<88x300xf32, #tpu.memory_space<vmem>> -> memref<1x300xf32, #tpu.memory_space<vmem>>
    tpu.enqueue_dma source(%241 : memref<1x300xf32, #tpu.memory_space<any>>) target(%242 : memref<1x300xf32, #tpu.memory_space<vmem>>) target_semaphore(%arg18 : memref<!tpu.dma_semaphore, #tpu.memory_space<semaphore_mem>>)
    %c81 = arith.constant 81 : index
    %243 = memref.load %arg1[%c81] : memref<88xi32, #tpu.memory_space<smem>>
    %c0_i32_162 = arith.constant 0 : i32
    %244 = tpu.memref_slice %arg2[%243, %c0_i32_162] : memref<50000x300xf32, #tpu.memory_space<any>> -> memref<1x300xf32, #tpu.memory_space<any>>
    %c81_i32 = arith.constant 81 : i32
    %c0_i32_163 = arith.constant 0 : i32
    %245 = tpu.memref_slice %arg17[%c81_i32, %c0_i32_163] : memref<88x300xf32, #tpu.memory_space<vmem>> -> memref<1x300xf32, #tpu.memory_space<vmem>>
    tpu.enqueue_dma source(%244 : memref<1x300xf32, #tpu.memory_space<any>>) target(%245 : memref<1x300xf32, #tpu.memory_space<vmem>>) target_semaphore(%arg18 : memref<!tpu.dma_semaphore, #tpu.memory_space<semaphore_mem>>)
    %c82 = arith.constant 82 : index
    %246 = memref.load %arg1[%c82] : memref<88xi32, #tpu.memory_space<smem>>
    %c0_i32_164 = arith.constant 0 : i32
    %247 = tpu.memref_slice %arg2[%246, %c0_i32_164] : memref<50000x300xf32, #tpu.memory_space<any>> -> memref<1x300xf32, #tpu.memory_space<any>>
    %c82_i32 = arith.constant 82 : i32
    %c0_i32_165 = arith.constant 0 : i32
    %248 = tpu.memref_slice %arg17[%c82_i32, %c0_i32_165] : memref<88x300xf32, #tpu.memory_space<vmem>> -> memref<1x300xf32, #tpu.memory_space<vmem>>
    tpu.enqueue_dma source(%247 : memref<1x300xf32, #tpu.memory_space<any>>) target(%248 : memref<1x300xf32, #tpu.memory_space<vmem>>) target_semaphore(%arg18 : memref<!tpu.dma_semaphore, #tpu.memory_space<semaphore_mem>>)
    %c83 = arith.constant 83 : index
    %249 = memref.load %arg1[%c83] : memref<88xi32, #tpu.memory_space<smem>>
    %c0_i32_166 = arith.constant 0 : i32
    %250 = tpu.memref_slice %arg2[%249, %c0_i32_166] : memref<50000x300xf32, #tpu.memory_space<any>> -> memref<1x300xf32, #tpu.memory_space<any>>
    %c83_i32 = arith.constant 83 : i32
    %c0_i32_167 = arith.constant 0 : i32
    %251 = tpu.memref_slice %arg17[%c83_i32, %c0_i32_167] : memref<88x300xf32, #tpu.memory_space<vmem>> -> memref<1x300xf32, #tpu.memory_space<vmem>>
    tpu.enqueue_dma source(%250 : memref<1x300xf32, #tpu.memory_space<any>>) target(%251 : memref<1x300xf32, #tpu.memory_space<vmem>>) target_semaphore(%arg18 : memref<!tpu.dma_semaphore, #tpu.memory_space<semaphore_mem>>)
    %c84 = arith.constant 84 : index
    %252 = memref.load %arg1[%c84] : memref<88xi32, #tpu.memory_space<smem>>
    %c0_i32_168 = arith.constant 0 : i32
    %253 = tpu.memref_slice %arg2[%252, %c0_i32_168] : memref<50000x300xf32, #tpu.memory_space<any>> -> memref<1x300xf32, #tpu.memory_space<any>>
    %c84_i32 = arith.constant 84 : i32
    %c0_i32_169 = arith.constant 0 : i32
    %254 = tpu.memref_slice %arg17[%c84_i32, %c0_i32_169] : memref<88x300xf32, #tpu.memory_space<vmem>> -> memref<1x300xf32, #tpu.memory_space<vmem>>
    tpu.enqueue_dma source(%253 : memref<1x300xf32, #tpu.memory_space<any>>) target(%254 : memref<1x300xf32, #tpu.memory_space<vmem>>) target_semaphore(%arg18 : memref<!tpu.dma_semaphore, #tpu.memory_space<semaphore_mem>>)
    %c85 = arith.constant 85 : index
    %255 = memref.load %arg1[%c85] : memref<88xi32, #tpu.memory_space<smem>>
    %c0_i32_170 = arith.constant 0 : i32
    %256 = tpu.memref_slice %arg2[%255, %c0_i32_170] : memref<50000x300xf32, #tpu.memory_space<any>> -> memref<1x300xf32, #tpu.memory_space<any>>
    %c85_i32 = arith.constant 85 : i32
    %c0_i32_171 = arith.constant 0 : i32
    %257 = tpu.memref_slice %arg17[%c85_i32, %c0_i32_171] : memref<88x300xf32, #tpu.memory_space<vmem>> -> memref<1x300xf32, #tpu.memory_space<vmem>>
    tpu.enqueue_dma source(%256 : memref<1x300xf32, #tpu.memory_space<any>>) target(%257 : memref<1x300xf32, #tpu.memory_space<vmem>>) target_semaphore(%arg18 : memref<!tpu.dma_semaphore, #tpu.memory_space<semaphore_mem>>)
    %c86 = arith.constant 86 : index
    %258 = memref.load %arg1[%c86] : memref<88xi32, #tpu.memory_space<smem>>
    %c0_i32_172 = arith.constant 0 : i32
    %259 = tpu.memref_slice %arg2[%258, %c0_i32_172] : memref<50000x300xf32, #tpu.memory_space<any>> -> memref<1x300xf32, #tpu.memory_space<any>>
    %c86_i32 = arith.constant 86 : i32
    %c0_i32_173 = arith.constant 0 : i32
    %260 = tpu.memref_slice %arg17[%c86_i32, %c0_i32_173] : memref<88x300xf32, #tpu.memory_space<vmem>> -> memref<1x300xf32, #tpu.memory_space<vmem>>
    tpu.enqueue_dma source(%259 : memref<1x300xf32, #tpu.memory_space<any>>) target(%260 : memref<1x300xf32, #tpu.memory_space<vmem>>) target_semaphore(%arg18 : memref<!tpu.dma_semaphore, #tpu.memory_space<semaphore_mem>>)
    %c87 = arith.constant 87 : index
    %261 = memref.load %arg1[%c87] : memref<88xi32, #tpu.memory_space<smem>>
    %c0_i32_174 = arith.constant 0 : i32
    %262 = tpu.memref_slice %arg2[%261, %c0_i32_174] : memref<50000x300xf32, #tpu.memory_space<any>> -> memref<1x300xf32, #tpu.memory_space<any>>
    %c87_i32 = arith.constant 87 : i32
    %c0_i32_175 = arith.constant 0 : i32
    %263 = tpu.memref_slice %arg17[%c87_i32, %c0_i32_175] : memref<88x300xf32, #tpu.memory_space<vmem>> -> memref<1x300xf32, #tpu.memory_space<vmem>>
    tpu.enqueue_dma source(%262 : memref<1x300xf32, #tpu.memory_space<any>>) target(%263 : memref<1x300xf32, #tpu.memory_space<vmem>>) target_semaphore(%arg18 : memref<!tpu.dma_semaphore, #tpu.memory_space<semaphore_mem>>)
    %c0_i32_176 = arith.constant 0 : i32
    %c0_i32_177 = arith.constant 0 : i32
    %264 = tpu.memref_slice %arg2[%c0_i32_176, %c0_i32_177] : memref<50000x300xf32, #tpu.memory_space<any>> -> memref<88x300xf32, #tpu.memory_space<any>>
    tpu.wait_dma2 semaphore(%arg18 : memref<!tpu.dma_semaphore, #tpu.memory_space<semaphore_mem>>) src(%264 : memref<88x300xf32, #tpu.memory_space<any>>) dst(%arg17 : memref<88x300xf32, #tpu.memory_space<vmem>>)
    %c0_178 = arith.constant 0 : index
    %c0_179 = arith.constant 0 : index
    %265 = vector.load %arg17[%c0_178, %c0_179] : memref<88x300xf32, #tpu.memory_space<vmem>>, vector<88x300xf32>
    %c0_180 = arith.constant 0 : index
    %c0_181 = arith.constant 0 : index
    %266 = vector.load %arg3[%c0_180, %c0_181] : memref<300x1xf32, #tpu.memory_space<vmem>>, vector<300x1xf32>
    %cst = arith.constant dense<0.000000e+00> : vector<88x1xf32>
    %267 = tpu.matmul %265, %266, %cst {dimension_numbers = #tpu.dot_dimension_numbers<[1], [0], [0], [1], [0, 0, 1, 1], [], []>} : vector<88x300xf32>, vector<300x1xf32>, vector<88x1xf32> -> vector<88x1xf32>
    %268 = vector.shape_cast %267 : vector<88x1xf32> to vector<1x88x1xf32>
    %cst_182 = arith.constant dense<0xFF800000> : vector<1xf32>
    %269 = vector.multi_reduction <maximumf>, %268, %cst_182 [1, 2] : vector<1x88x1xf32> to vector<1xf32>
    %270 = vector.shape_cast %269 : vector<1xf32> to vector<1x1x1xf32>
    %271 = vector.extract %270[0, 0, 0] : f32 from vector<1x1x1xf32>
    %272 = vector.broadcast %271 : f32 to vector<88x1xf32>
    %273 = arith.subf %267, %272 : vector<88x1xf32>
    %274 = math.exp %273 : vector<88x1xf32>
    %c0_183 = arith.constant 0 : index
    %c0_184 = arith.constant 0 : index
    %275 = vector.load %arg5[%c0_183, %c0_184] : memref<8x88xf32, #tpu.memory_space<vmem>>, vector<8x88xf32>
    %cst_185 = arith.constant dense<0.000000e+00> : vector<8x1xf32>
    %276 = tpu.matmul %275, %274, %cst_185 {dimension_numbers = #tpu.dot_dimension_numbers<[1], [0], [0], [1], [0, 0, 1, 1], [], []>} : vector<8x88xf32>, vector<88x1xf32>, vector<8x1xf32> -> vector<8x1xf32>
    %c0_186 = arith.constant 0 : index
    %c0_187 = arith.constant 0 : index
    %277 = vector.load %arg4[%c0_186, %c0_187] : memref<88x8xf32, #tpu.memory_space<vmem>>, vector<88x8xf32>
    %cst_188 = arith.constant dense<0.000000e+00> : vector<88x1xf32>
    %278 = tpu.matmul %277, %276, %cst_188 {dimension_numbers = #tpu.dot_dimension_numbers<[1], [0], [0], [1], [0, 0, 1, 1], [], []>} : vector<88x8xf32>, vector<8x1xf32>, vector<88x1xf32> -> vector<88x1xf32>
    %279 = tpu.reciprocal %278 {approx = true} : vector<88x1xf32> -> vector<88x1xf32>
    %280 = arith.mulf %274, %279 : vector<88x1xf32>
    %281 = vector.broadcast %280 : vector<88x1xf32> to vector<88x300xf32>
    %282 = arith.mulf %265, %281 : vector<88x300xf32>
    %c0_189 = arith.constant 0 : index
    %c0_190 = arith.constant 0 : index
    %283 = vector.load %arg5[%c0_189, %c0_190] : memref<8x88xf32, #tpu.memory_space<vmem>>, vector<8x88xf32>
    %cst_191 = arith.constant dense<0.000000e+00> : vector<8x300xf32>
    %284 = tpu.matmul %283, %282, %cst_191 {dimension_numbers = #tpu.dot_dimension_numbers<[1], [0], [0], [1], [0, 0, 1, 1], [], []>} : vector<8x88xf32>, vector<88x300xf32>, vector<8x300xf32> -> vector<8x300xf32>
    %c0_192 = arith.constant 0 : index
    %c0_193 = arith.constant 0 : index
    %285 = vector.load %arg6[%c0_192, %c0_193] : memref<300x100xf32, #tpu.memory_space<vmem>>, vector<300x100xf32>
    %cst_194 = arith.constant dense<0.000000e+00> : vector<8x100xf32>
    %286 = tpu.matmul %284, %285, %cst_194 {dimension_numbers = #tpu.dot_dimension_numbers<[1], [0], [0], [1], [0, 0, 1, 1], [], []>} : vector<8x300xf32>, vector<300x100xf32>, vector<8x100xf32> -> vector<8x100xf32>
    %c0_195 = arith.constant 0 : index
    %c0_196 = arith.constant 0 : index
    %287 = vector.load %arg7[%c0_195, %c0_196] : memref<1x100xf32, #tpu.memory_space<vmem>>, vector<1x100xf32>
    %288 = vector.broadcast %287 : vector<1x100xf32> to vector<8x100xf32>
    %289 = arith.addf %286, %288 : vector<8x100xf32>
    %cst_197 = arith.constant 0.000000e+00 : f32
    %290 = vector.broadcast %cst_197 : f32 to vector<8x100xf32>
    %291 = arith.maximumf %289, %290 : vector<8x100xf32>
    %cst_198 = arith.constant dense<0.000000e+00> : vector<100xf32>
    %292 = vector.multi_reduction <add>, %291, %cst_198 [0] : vector<8x100xf32> to vector<100xf32>
    %293 = vector.shape_cast %292 : vector<100xf32> to vector<1x100xf32>
    %cst_199 = arith.constant 8.000000e+00 : f32
    %294 = vector.broadcast %cst_199 : f32 to vector<1x100xf32>
    %295 = arith.divf %293, %294 : vector<1x100xf32>
    %296 = vector.broadcast %295 : vector<1x100xf32> to vector<8x100xf32>
    %297 = arith.subf %291, %296 : vector<8x100xf32>
    %298 = arith.mulf %297, %297 : vector<8x100xf32>
    %cst_200 = arith.constant dense<0.000000e+00> : vector<100xf32>
    %299 = vector.multi_reduction <add>, %298, %cst_200 [0] : vector<8x100xf32> to vector<100xf32>
    %300 = vector.shape_cast %299 : vector<100xf32> to vector<1x100xf32>
    %cst_201 = arith.constant 8.000000e+00 : f32
    %301 = vector.broadcast %cst_201 : f32 to vector<1x100xf32>
    %302 = arith.divf %300, %301 : vector<1x100xf32>
    %303 = vector.broadcast %295 : vector<1x100xf32> to vector<8x100xf32>
    %304 = arith.subf %291, %303 : vector<8x100xf32>
    %cst_202 = arith.constant 9.99999974E-6 : f32
    %305 = vector.broadcast %cst_202 : f32 to vector<1x100xf32>
    %306 = arith.addf %302, %305 : vector<1x100xf32>
    %307 = math.rsqrt %306 : vector<1x100xf32>
    %308 = vector.broadcast %307 : vector<1x100xf32> to vector<8x100xf32>
    %309 = arith.mulf %304, %308 : vector<8x100xf32>
    %c0_203 = arith.constant 0 : index
    %c0_204 = arith.constant 0 : index
    %310 = vector.load %arg8[%c0_203, %c0_204] : memref<1x100xf32, #tpu.memory_space<vmem>>, vector<1x100xf32>
    %311 = vector.broadcast %310 : vector<1x100xf32> to vector<8x100xf32>
    %312 = arith.mulf %309, %311 : vector<8x100xf32>
    %c0_205 = arith.constant 0 : index
    %c0_206 = arith.constant 0 : index
    %313 = vector.load %arg9[%c0_205, %c0_206] : memref<1x100xf32, #tpu.memory_space<vmem>>, vector<1x100xf32>
    %314 = vector.broadcast %313 : vector<1x100xf32> to vector<8x100xf32>
    %315 = arith.addf %312, %314 : vector<8x100xf32>
    %c0_207 = arith.constant 0 : index
    %c0_208 = arith.constant 0 : index
    %316 = vector.load %arg10[%c0_207, %c0_208] : memref<100x25xf32, #tpu.memory_space<vmem>>, vector<100x25xf32>
    %cst_209 = arith.constant dense<0.000000e+00> : vector<8x25xf32>
    %317 = tpu.matmul %315, %316, %cst_209 {dimension_numbers = #tpu.dot_dimension_numbers<[1], [0], [0], [1], [0, 0, 1, 1], [], []>} : vector<8x100xf32>, vector<100x25xf32>, vector<8x25xf32> -> vector<8x25xf32>
    %c0_210 = arith.constant 0 : index
    %c0_211 = arith.constant 0 : index
    %318 = vector.load %arg11[%c0_210, %c0_211] : memref<1x25xf32, #tpu.memory_space<vmem>>, vector<1x25xf32>
    %319 = vector.broadcast %318 : vector<1x25xf32> to vector<8x25xf32>
    %320 = arith.addf %317, %319 : vector<8x25xf32>
    %cst_212 = arith.constant 0.000000e+00 : f32
    %321 = vector.broadcast %cst_212 : f32 to vector<8x25xf32>
    %322 = arith.maximumf %320, %321 : vector<8x25xf32>
    %cst_213 = arith.constant dense<0.000000e+00> : vector<25xf32>
    %323 = vector.multi_reduction <add>, %322, %cst_213 [0] : vector<8x25xf32> to vector<25xf32>
    %324 = vector.shape_cast %323 : vector<25xf32> to vector<1x25xf32>
    %cst_214 = arith.constant 8.000000e+00 : f32
    %325 = vector.broadcast %cst_214 : f32 to vector<1x25xf32>
    %326 = arith.divf %324, %325 : vector<1x25xf32>
    %327 = vector.broadcast %326 : vector<1x25xf32> to vector<8x25xf32>
    %328 = arith.subf %322, %327 : vector<8x25xf32>
    %329 = arith.mulf %328, %328 : vector<8x25xf32>
    %cst_215 = arith.constant dense<0.000000e+00> : vector<25xf32>
    %330 = vector.multi_reduction <add>, %329, %cst_215 [0] : vector<8x25xf32> to vector<25xf32>
    %331 = vector.shape_cast %330 : vector<25xf32> to vector<1x25xf32>
    %cst_216 = arith.constant 8.000000e+00 : f32
    %332 = vector.broadcast %cst_216 : f32 to vector<1x25xf32>
    %333 = arith.divf %331, %332 : vector<1x25xf32>
    %334 = vector.broadcast %326 : vector<1x25xf32> to vector<8x25xf32>
    %335 = arith.subf %322, %334 : vector<8x25xf32>
    %cst_217 = arith.constant 9.99999974E-6 : f32
    %336 = vector.broadcast %cst_217 : f32 to vector<1x25xf32>
    %337 = arith.addf %333, %336 : vector<1x25xf32>
    %338 = math.rsqrt %337 : vector<1x25xf32>
    %339 = vector.broadcast %338 : vector<1x25xf32> to vector<8x25xf32>
    %340 = arith.mulf %335, %339 : vector<8x25xf32>
    %c0_218 = arith.constant 0 : index
    %c0_219 = arith.constant 0 : index
    %341 = vector.load %arg12[%c0_218, %c0_219] : memref<1x25xf32, #tpu.memory_space<vmem>>, vector<1x25xf32>
    %342 = vector.broadcast %341 : vector<1x25xf32> to vector<8x25xf32>
    %343 = arith.mulf %340, %342 : vector<8x25xf32>
    %c0_220 = arith.constant 0 : index
    %c0_221 = arith.constant 0 : index
    %344 = vector.load %arg13[%c0_220, %c0_221] : memref<1x25xf32, #tpu.memory_space<vmem>>, vector<1x25xf32>
    %345 = vector.broadcast %344 : vector<1x25xf32> to vector<8x25xf32>
    %346 = arith.addf %343, %345 : vector<8x25xf32>
    %c0_222 = arith.constant 0 : index
    %c0_223 = arith.constant 0 : index
    %347 = vector.load %arg14[%c0_222, %c0_223] : memref<25x1xf32, #tpu.memory_space<vmem>>, vector<25x1xf32>
    %cst_224 = arith.constant dense<0.000000e+00> : vector<8x1xf32>
    %348 = tpu.matmul %346, %347, %cst_224 {dimension_numbers = #tpu.dot_dimension_numbers<[1], [0], [0], [1], [0, 0, 1, 1], [], []>} : vector<8x25xf32>, vector<25x1xf32>, vector<8x1xf32> -> vector<8x1xf32>
    %c0_225 = arith.constant 0 : index
    %c0_226 = arith.constant 0 : index
    %349 = vector.load %arg15[%c0_225, %c0_226] : memref<1x1xf32, #tpu.memory_space<vmem>>, vector<1x1xf32>
    %350 = vector.broadcast %349 : vector<1x1xf32> to vector<8x1xf32>
    %351 = arith.addf %348, %350 : vector<8x1xf32>
    %352 = arith.negf %351 : vector<8x1xf32>
    %353 = math.exp %352 : vector<8x1xf32>
    %cst_227 = arith.constant 1.000000e+00 : f32
    %354 = vector.broadcast %cst_227 : f32 to vector<8x1xf32>
    %355 = arith.addf %354, %353 : vector<8x1xf32>
    %356 = arith.divf %354, %355 : vector<8x1xf32>
    %c0_228 = arith.constant 0 : index
    %c0_229 = arith.constant 0 : index
    %357 = vector.load %arg16[%c0_228, %c0_229] : memref<8x1xf32, #tpu.memory_space<vmem>>, vector<8x1xf32>
    tpu.vector_store %arg16[%c0_228, %c0_229], %356 {strides = array<i32>} : memref<8x1xf32, #tpu.memory_space<vmem>>, vector<8x1xf32>,
    return
  }
  func.func @transform_1(%arg0: i32, %arg1: memref<88xi32, #tpu.memory_space<smem>>) -> (i32, i32) {
    %c0_i32 = arith.constant 0 : i32
    %c0_i32_0 = arith.constant 0 : i32
    %c0_i32_1 = arith.constant 0 : i32
    return %c0_i32, %c0_i32_0 : i32, i32
  }
  func.func @transform_2(%arg0: i32, %arg1: memref<88xi32, #tpu.memory_space<smem>>) -> (i32, i32) {
    %c0_i32 = arith.constant 0 : i32
    %c0_i32_0 = arith.constant 0 : i32
    %c0_i32_1 = arith.constant 0 : i32
    return %c0_i32, %c0_i32_0 : i32, i32
  }
  func.func @transform_3(%arg0: i32, %arg1: memref<88xi32, #tpu.memory_space<smem>>) -> (i32, i32) {
    %c0_i32 = arith.constant 0 : i32
    %c0_i32_0 = arith.constant 0 : i32
    %c0_i32_1 = arith.constant 0 : i32
    return %c0_i32, %c0_i32_0 : i32, i32
  }
  func.func @transform_4(%arg0: i32, %arg1: memref<88xi32, #tpu.memory_space<smem>>) -> (i32, i32) {
    %c0_i32 = arith.constant 0 : i32
    %c0_i32_0 = arith.constant 0 : i32
    %c0_i32_1 = arith.constant 0 : i32
    return %c0_i32, %c0_i32_0 : i32, i32
  }
  func.func @transform_5(%arg0: i32, %arg1: memref<88xi32, #tpu.memory_space<smem>>) -> (i32, i32) {
    %c0_i32 = arith.constant 0 : i32
    %c0_i32_0 = arith.constant 0 : i32
    %c0_i32_1 = arith.constant 0 : i32
    return %c0_i32, %c0_i32_0 : i32, i32
  }
  func.func @transform_6(%arg0: i32, %arg1: memref<88xi32, #tpu.memory_space<smem>>) -> (i32, i32) {
    %c0_i32 = arith.constant 0 : i32
    %c0_i32_0 = arith.constant 0 : i32
    %c0_i32_1 = arith.constant 0 : i32
    return %c0_i32, %c0_i32_0 : i32, i32
  }
  func.func @transform_7(%arg0: i32, %arg1: memref<88xi32, #tpu.memory_space<smem>>) -> (i32, i32) {
    %c0_i32 = arith.constant 0 : i32
    %c0_i32_0 = arith.constant 0 : i32
    %c0_i32_1 = arith.constant 0 : i32
    return %c0_i32, %c0_i32_0 : i32, i32
  }
  func.func @transform_8(%arg0: i32, %arg1: memref<88xi32, #tpu.memory_space<smem>>) -> (i32, i32) {
    %c0_i32 = arith.constant 0 : i32
    %c0_i32_0 = arith.constant 0 : i32
    %c0_i32_1 = arith.constant 0 : i32
    return %c0_i32, %c0_i32_0 : i32, i32
  }
  func.func @transform_9(%arg0: i32, %arg1: memref<88xi32, #tpu.memory_space<smem>>) -> (i32, i32) {
    %c0_i32 = arith.constant 0 : i32
    %c0_i32_0 = arith.constant 0 : i32
    %c0_i32_1 = arith.constant 0 : i32
    return %c0_i32, %c0_i32_0 : i32, i32
  }
  func.func @transform_10(%arg0: i32, %arg1: memref<88xi32, #tpu.memory_space<smem>>) -> (i32, i32) {
    %c0_i32 = arith.constant 0 : i32
    %c0_i32_0 = arith.constant 0 : i32
    %c0_i32_1 = arith.constant 0 : i32
    return %c0_i32, %c0_i32_0 : i32, i32
  }
  func.func @transform_11(%arg0: i32, %arg1: memref<88xi32, #tpu.memory_space<smem>>) -> (i32, i32) {
    %c0_i32 = arith.constant 0 : i32
    %c0_i32_0 = arith.constant 0 : i32
    %c0_i32_1 = arith.constant 0 : i32
    return %c0_i32, %c0_i32_0 : i32, i32
  }
  func.func @transform_12(%arg0: i32, %arg1: memref<88xi32, #tpu.memory_space<smem>>) -> (i32, i32) {
    %c0_i32 = arith.constant 0 : i32
    %c0_i32_0 = arith.constant 0 : i32
    %c0_i32_1 = arith.constant 0 : i32
    return %c0_i32, %c0_i32_0 : i32, i32
  }
  func.func @transform_13(%arg0: i32, %arg1: memref<88xi32, #tpu.memory_space<smem>>) -> (i32, i32) {
    %c0_i32 = arith.constant 0 : i32
    %c0_i32_0 = arith.constant 0 : i32
    %c0_i32_1 = arith.constant 0 : i32
    return %c0_i32, %c0_i32_0 : i32, i32
  }
  func.func @transform_14(%arg0: i32, %arg1: memref<88xi32, #tpu.memory_space<smem>>) -> (i32, i32) {
    %c0_i32 = arith.constant 0 : i32
    %c0_i32_0 = arith.constant 0 : i32
    %c0_i32_1 = arith.constant 0 : i32
    return %c0_i32, %c0_i32_0 : i32, i32
  }
}

</mosaic_0001>

<bundles_post_ra>
// kernel: tpu_custom_call.1
= control target key start
LH: loop header
LB: loop body
LE: loop exit
PB: predicated region body
PF: predicated region fallthrough
CT: control target
= control target key end

     0   :  { %s9642_s0 = inlined_call_operand.vmem [shape: s32[88], index: 0, kind: input, shape index: {}]   ;;  %s9643_s1 = inlined_call_operand.vmem [shape: f32[50000,300], index: 1, kind: input, shape index: {}]   ;;  %s9644_s2 = inlined_call_operand.vmem [shape: f32[300,1], index: 2, kind: input, shape index: {}]   ;;  %s9645_s3 = inlined_call_operand.vmem [shape: f32[88,8], index: 3, kind: input, shape index: {}]   ;;  %s9646_s4 = inlined_call_operand.vmem [shape: f32[8,88], index: 4, kind: input, shape index: {}]   ;;  %s9647_s5 = inlined_call_operand.vmem [shape: f32[300,100], index: 5, kind: input, shape index: {}]   ;;  %s9648_s6 = inlined_call_operand.vmem [shape: f32[1,100], index: 6, kind: input, shape index: {}]   ;;  %s9649_s7 = inlined_call_operand.vmem [shape: f32[1,100], index: 7, kind: input, shape index: {}]   ;;  %s9650_s8 = inlined_call_operand.vmem [shape: f32[1,100], index: 8, kind: input, shape index: {}]   ;;  %s9651_s9 = inlined_call_operand.vmem [shape: f32[100,25], index: 9, kind: input, shape index: {}]   ;;  %s9652_s10 = inlined_call_operand.vmem [shape: f32[1,25], index: 10, kind: input, shape index: {}]   ;;  %s9653_s11 = inlined_call_operand.vmem [shape: f32[1,25], index: 11, kind: input, shape index: {}]   ;;  %s9654_s12 = inlined_call_operand.vmem [shape: f32[1,25], index: 12, kind: input, shape index: {}]   ;;  %s9655_s13 = inlined_call_operand.vmem [shape: f32[25,1], index: 13, kind: input, shape index: {}]   ;;  %s9656_s15 = inlined_call_operand.vmem [shape: f32[8,1], index: 15, kind: output, shape index: {}]   ;;  %s9657_s14 = inlined_call_operand.<no memory space> [shape: f32[1,1], index: 14, kind: input, shape index: {}]  }
   0x1   :  { %s20_s20 = sshll.u32 %s9642_s0, 4  ;;  %v24_v0 = vstv %s9657_s14  ;;  %s21_s20 = int_to_ptr.vmem [resolvable:$true] %s20_s20 }
   0x2   :  { %25 = vst [vmem:[#allocation6] sm:$0x1] %v24_v0  ;;  %s8585_s23 = scalar_lea.vmem %s21_s20, 16  ;;  %p8590_p1 = scmp.lt.s32.totalorder %s21_s20, %s21_s20 }
   0x3   :  { %p8586_p0 = scmp.ne.s32.totalorder %s21_s20, %s8585_s23  ;;  %p8591_p2 = scmp.lt.s32.totalorder %s8585_s23, %s8585_s23 }
   0x5   :  { %p8592_p3 = por %p8591_p2, %p8590_p1 }
   0x7   :  { %p8593_p4 = pnand %p8592_p3, %p8586_p0 }
   0x9   :  { %8596 = shalt.err (!%p8593_p4)  }
   0xa   :  { %s8601_s24 = smov [#allocation5]  }
   0xb   :  { %23 = dma.vmem_to_smem %s21_s20, 16, %s8601_s24, [#allocation4] }
   0xc   :  { %8597 = dma.done.wait [#allocation4], 16 }
   0xd   :  { %8598 = vsyncadd [#allocation4], 4294967280 }
   0xe   :  { %27 = sfence }
   0xf   :  { %s54_s25 = sld [smem:[#allocation5]] }
  0x15   :  { %s55_s0 = sshrl.u32 %s54_s25, 3  ;;  %s56_s26 = sand.u32 7, %s54_s25  }
  0x16   :  { %s57_s27 = smul.u32 24, %s55_s0 }
  0x18   :  { %s58_s28 = sadd.s32 %s57_s27, %s56_s26 }
  0x19   :  { %s59_s30 = scalar_lea.vmem %s9643_s1, %s58_s28 }
  0x1a   :  { %v78_v1 = vld [vmem:[%s59_s30] sm:$0x1]  ;;  %v80_v2 = vld [vmem:[%s59_s30 + $0x8] sm:$0x1]  ;;  %v82_v3 = vld [vmem:[%s59_s30 + $0x10] sm:$0x1] }
  0x1b   :  { %79 = vst [vmem:[#allocation2] sm:$0x1] %v78_v1  ;;  %81 = vst [vmem:[#allocation2 + $0x8] sm:$0x1] %v80_v2 }
  0x1c   :  { %83 = vst [vmem:[#allocation2 + $0x10] sm:$0x1] %v82_v3 }
  0x1d   :  { %113 = vsyncadd [#allocation3], 48  ;;  %s8032_s16 = sld [smem:[#allocation5 + $0x1]] }
  0x23   :  { %s115_s17 = sshrl.u32 %s8032_s16, 3  ;;  %s116_s18 = sand.u32 7, %s8032_s16  }
  0x24   :  { %s117_s19 = smul.u32 24, %s115_s17 }
  0x26   :  { %s118_s20 = sadd.s32 %s117_s19, %s116_s18 }
  0x27   :  { %s119_s23 = scalar_lea.vmem %s9643_s1, %s118_s20 }
  0x28   :  { %v139_v4 = vld [vmem:[%s119_s23] sm:$0x1]  ;;  %v141_v5 = vld [vmem:[%s119_s23 + $0x8] sm:$0x1]  ;;  %v143_v6 = vld [vmem:[%s119_s23 + $0x10] sm:$0x1] }
  0x29   :  { %140 = vst [vmem:[#allocation2 + $0x1] sm:$0x1] %v139_v4  ;;  %142 = vst [vmem:[#allocation2 + $0x9] sm:$0x1] %v141_v5 }
  0x2a   :  { %144 = vst [vmem:[#allocation2 + $0x11] sm:$0x1] %v143_v6 }
  0x2b   :  { %174 = vsyncadd [#allocation3], 48  ;;  %s8033_s24 = sld [smem:[#allocation5 + $0x2]] }
  0x31   :  { %s176_s25 = sshrl.u32 %s8033_s24, 3  ;;  %s177_s0 = sand.u32 7, %s8033_s24  }
  0x32   :  { %s178_s26 = smul.u32 24, %s176_s25 }
  0x34   :  { %s179_s27 = sadd.s32 %s178_s26, %s177_s0 }
  0x35   :  { %s180_s29 = scalar_lea.vmem %s9643_s1, %s179_s27 }
  0x36   :  { %v200_v7 = vld [vmem:[%s180_s29] sm:$0x1]  ;;  %v202_v8 = vld [vmem:[%s180_s29 + $0x8] sm:$0x1]  ;;  %v204_v9 = vld [vmem:[%s180_s29 + $0x10] sm:$0x1] }
  0x37   :  { %201 = vst [vmem:[#allocation2 + $0x2] sm:$0x1] %v200_v7  ;;  %203 = vst [vmem:[#allocation2 + $0xa] sm:$0x1] %v202_v8 }
  0x38   :  { %205 = vst [vmem:[#allocation2 + $0x12] sm:$0x1] %v204_v9 }
  0x39   :  { %235 = vsyncadd [#allocation3], 48  ;;  %s8034_s30 = sld [smem:[#allocation5 + $0x3]] }
  0x3f   :  { %s237_s16 = sshrl.u32 %s8034_s30, 3  ;;  %s238_s17 = sand.u32 7, %s8034_s30  }
  0x40   :  { %s239_s18 = smul.u32 24, %s237_s16 }
  0x42   :  { %s240_s19 = sadd.s32 %s239_s18, %s238_s17 }
  0x43   :  { %s241_s22 = scalar_lea.vmem %s9643_s1, %s240_s19 }
  0x44   :  { %v261_v10 = vld [vmem:[%s241_s22] sm:$0x1]  ;;  %v263_v11 = vld [vmem:[%s241_s22 + $0x8] sm:$0x1]  ;;  %v265_v12 = vld [vmem:[%s241_s22 + $0x10] sm:$0x1] }
  0x45   :  { %262 = vst [vmem:[#allocation2 + $0x3] sm:$0x1] %v261_v10  ;;  %264 = vst [vmem:[#allocation2 + $0xb] sm:$0x1] %v263_v11 }
  0x46   :  { %266 = vst [vmem:[#allocation2 + $0x13] sm:$0x1] %v265_v12 }
  0x47   :  { %296 = vsyncadd [#allocation3], 48  ;;  %s8035_s23 = sld [smem:[#allocation5 + $0x4]] }
  0x4d   :  { %s298_s24 = sshrl.u32 %s8035_s23, 3  ;;  %s299_s25 = sand.u32 7, %s8035_s23  }
  0x4e   :  { %s300_s0 = smul.u32 24, %s298_s24 }
  0x50   :  { %s301_s26 = sadd.s32 %s300_s0, %s299_s25 }
  0x51   :  { %s302_s14 = scalar_lea.vmem %s9643_s1, %s301_s26 }
  0x52   :  { %v322_v13 = vld [vmem:[%s302_s14] sm:$0x1]  ;;  %v324_v14 = vld [vmem:[%s302_s14 + $0x8] sm:$0x1]  ;;  %v326_v15 = vld [vmem:[%s302_s14 + $0x10] sm:$0x1] }
  0x53   :  { %323 = vst [vmem:[#allocation2 + $0x4] sm:$0x1] %v322_v13  ;;  %325 = vst [vmem:[#allocation2 + $0xc] sm:$0x1] %v324_v14 }
  0x54   :  { %327 = vst [vmem:[#allocation2 + $0x14] sm:$0x1] %v326_v15 }
  0x55   :  { %357 = vsyncadd [#allocation3], 48  ;;  %s8036_s29 = sld [smem:[#allocation5 + $0x5]] }
  0x5b   :  { %s359_s30 = sshrl.u32 %s8036_s29, 3  ;;  %s360_s16 = sand.u32 7, %s8036_s29  }
  0x5c   :  { %s361_s17 = smul.u32 24, %s359_s30 }
  0x5e   :  { %s362_s18 = sadd.s32 %s361_s17, %s360_s16 }
  0x5f   :  { %s363_s21 = scalar_lea.vmem %s9643_s1, %s362_s18 }
  0x60   :  { %v383_v16 = vld [vmem:[%s363_s21] sm:$0x1]  ;;  %v385_v17 = vld [vmem:[%s363_s21 + $0x8] sm:$0x1]  ;;  %v387_v18 = vld [vmem:[%s363_s21 + $0x10] sm:$0x1] }
  0x61   :  { %384 = vst [vmem:[#allocation2 + $0x5] sm:$0x1] %v383_v16  ;;  %386 = vst [vmem:[#allocation2 + $0xd] sm:$0x1] %v385_v17 }
  0x62   :  { %388 = vst [vmem:[#allocation2 + $0x15] sm:$0x1] %v387_v18 }
  0x63   :  { %418 = vsyncadd [#allocation3], 48  ;;  %s8037_s22 = sld [smem:[#allocation5 + $0x6]] }
  0x69   :  { %s420_s23 = sshrl.u32 %s8037_s22, 3  ;;  %s421_s24 = sand.u32 7, %s8037_s22  }
  0x6a   :  { %s422_s25 = smul.u32 24, %s420_s23 }
  0x6c   :  { %s423_s0 = sadd.s32 %s422_s25, %s421_s24 }
  0x6d   :  { %s424_s28 = scalar_lea.vmem %s9643_s1, %s423_s0 }
  0x6e   :  { %v444_v19 = vld [vmem:[%s424_s28] sm:$0x1]  ;;  %v446_v20 = vld [vmem:[%s424_s28 + $0x8] sm:$0x1]  ;;  %v448_v21 = vld [vmem:[%s424_s28 + $0x10] sm:$0x1] }
  0x6f   :  { %445 = vst [vmem:[#allocation2 + $0x6] sm:$0x1] %v444_v19  ;;  %447 = vst [vmem:[#allocation2 + $0xe] sm:$0x1] %v446_v20 }
  0x70   :  { %449 = vst [vmem:[#allocation2 + $0x16] sm:$0x1] %v448_v21 }
  0x71   :  { %479 = vsyncadd [#allocation3], 48  ;;  %s8038_s14 = sld [smem:[#allocation5 + $0x7]] }
  0x77   :  { %s481_s29 = sshrl.u32 %s8038_s14, 3  ;;  %s482_s30 = sand.u32 7, %s8038_s14  }
  0x78   :  { %s483_s16 = smul.u32 24, %s481_s29 }
  0x7a   :  { %s484_s17 = sadd.s32 %s483_s16, %s482_s30 }
  0x7b   :  { %s485_s20 = scalar_lea.vmem %s9643_s1, %s484_s17 }
  0x7c   :  { %v505_v22 = vld [vmem:[%s485_s20] sm:$0x1]  ;;  %v507_v23 = vld [vmem:[%s485_s20 + $0x8] sm:$0x1]  ;;  %v509_v24 = vld [vmem:[%s485_s20 + $0x10] sm:$0x1] }
  0x7d   :  { %506 = vst [vmem:[#allocation2 + $0x7] sm:$0x1] %v505_v22  ;;  %508 = vst [vmem:[#allocation2 + $0xf] sm:$0x1] %v507_v23 }
  0x7e   :  { %510 = vst [vmem:[#allocation2 + $0x17] sm:$0x1] %v509_v24 }
  0x7f   :  { %540 = vsyncadd [#allocation3], 48  ;;  %s8039_s21 = sld [smem:[#allocation5 + $0x8]] }
  0x85   :  { %s542_s22 = sshrl.u32 %s8039_s21, 3  ;;  %s543_s23 = sand.u32 7, %s8039_s21  }
  0x86   :  { %s544_s24 = smul.u32 24, %s542_s22 }
  0x88   :  { %s545_s25 = sadd.s32 %s544_s24, %s543_s23 }
  0x89   :  { %s546_s27 = scalar_lea.vmem %s9643_s1, %s545_s25 }
  0x8a   :  { %v566_v25 = vld [vmem:[%s546_s27] sm:$0x1]  ;;  %v568_v26 = vld [vmem:[%s546_s27 + $0x8] sm:$0x1]  ;;  %v570_v27 = vld [vmem:[%s546_s27 + $0x10] sm:$0x1] }
  0x8b   :  { %567 = vst [vmem:[#allocation2 + $0x18] sm:$0x1] %v566_v25  ;;  %569 = vst [vmem:[#allocation2 + $0x20] sm:$0x1] %v568_v26 }
  0x8c   :  { %571 = vst [vmem:[#allocation2 + $0x28] sm:$0x1] %v570_v27 }
  0x8d   :  { %601 = vsyncadd [#allocation3], 48  ;;  %s8040_s28 = sld [smem:[#allocation5 + $0x9]] }
  0x93   :  { %s603_s14 = sshrl.u32 %s8040_s28, 3  ;;  %s604_s29 = sand.u32 7, %s8040_s28  }
  0x94   :  { %s605_s30 = smul.u32 24, %s603_s14 }
  0x96   :  { %s606_s16 = sadd.s32 %s605_s30, %s604_s29 }
  0x97   :  { %s607_s19 = scalar_lea.vmem %s9643_s1, %s606_s16 }
  0x98   :  { %v627_v28 = vld [vmem:[%s607_s19] sm:$0x1]  ;;  %v629_v29 = vld [vmem:[%s607_s19 + $0x8] sm:$0x1]  ;;  %v631_v30 = vld [vmem:[%s607_s19 + $0x10] sm:$0x1] }
  0x99   :  { %628 = vst [vmem:[#allocation2 + $0x19] sm:$0x1] %v627_v28  ;;  %630 = vst [vmem:[#allocation2 + $0x21] sm:$0x1] %v629_v29 }
  0x9a   :  { %632 = vst [vmem:[#allocation2 + $0x29] sm:$0x1] %v631_v30 }
  0x9b   :  { %662 = vsyncadd [#allocation3], 48  ;;  %s8041_s20 = sld [smem:[#allocation5 + $0xa]] }
  0xa1   :  { %s664_s21 = sshrl.u32 %s8041_s20, 3  ;;  %s665_s22 = sand.u32 7, %s8041_s20  }
  0xa2   :  { %s666_s23 = smul.u32 24, %s664_s21 }
  0xa4   :  { %s667_s24 = sadd.s32 %s666_s23, %s665_s22 }
  0xa5   :  { %s668_s26 = scalar_lea.vmem %s9643_s1, %s667_s24 }
  0xa6   :  { %v688_v31 = vld [vmem:[%s668_s26] sm:$0x1]  ;;  %v690_v32 = vld [vmem:[%s668_s26 + $0x8] sm:$0x1]  ;;  %v692_v33 = vld [vmem:[%s668_s26 + $0x10] sm:$0x1] }
  0xa7   :  { %689 = vst [vmem:[#allocation2 + $0x1a] sm:$0x1] %v688_v31  ;;  %691 = vst [vmem:[#allocation2 + $0x22] sm:$0x1] %v690_v32 }
  0xa8   :  { %693 = vst [vmem:[#allocation2 + $0x2a] sm:$0x1] %v692_v33 }
  0xa9   :  { %723 = vsyncadd [#allocation3], 48  ;;  %s8042_s27 = sld [smem:[#allocation5 + $0xb]] }
  0xaf   :  { %s725_s28 = sshrl.u32 %s8042_s27, 3  ;;  %s726_s14 = sand.u32 7, %s8042_s27  }
  0xb0   :  { %s727_s29 = smul.u32 24, %s725_s28 }
  0xb2   :  { %s728_s30 = sadd.s32 %s727_s29, %s726_s14 }
  0xb3   :  { %s729_s18 = scalar_lea.vmem %s9643_s1, %s728_s30 }
  0xb4   :  { %v749_v34 = vld [vmem:[%s729_s18] sm:$0x1]  ;;  %v751_v35 = vld [vmem:[%s729_s18 + $0x8] sm:$0x1]  ;;  %v753_v36 = vld [vmem:[%s729_s18 + $0x10] sm:$0x1] }
  0xb5   :  { %750 = vst [vmem:[#allocation2 + $0x1b] sm:$0x1] %v749_v34  ;;  %752 = vst [vmem:[#allocation2 + $0x23] sm:$0x1] %v751_v35 }
  0xb6   :  { %754 = vst [vmem:[#allocation2 + $0x2b] sm:$0x1] %v753_v36 }
  0xb7   :  { %784 = vsyncadd [#allocation3], 48  ;;  %s8043_s19 = sld [smem:[#allocation5 + $0xc]] }
  0xbd   :  { %s786_s20 = sshrl.u32 %s8043_s19, 3  ;;  %s787_s21 = sand.u32 7, %s8043_s19  }
  0xbe   :  { %s788_s22 = smul.u32 24, %s786_s20 }
  0xc0   :  { %s789_s23 = sadd.s32 %s788_s22, %s787_s21 }
  0xc1   :  { %s790_s0 = scalar_lea.vmem %s9643_s1, %s789_s23 }
  0xc2   :  { %v810_v37 = vld [vmem:[%s790_s0] sm:$0x1]  ;;  %v812_v38 = vld [vmem:[%s790_s0 + $0x8] sm:$0x1]  ;;  %v814_v39 = vld [vmem:[%s790_s0 + $0x10] sm:$0x1] }
  0xc3   :  { %811 = vst [vmem:[#allocation2 + $0x1c] sm:$0x1] %v810_v37  ;;  %813 = vst [vmem:[#allocation2 + $0x24] sm:$0x1] %v812_v38 }
  0xc4   :  { %815 = vst [vmem:[#allocation2 + $0x2c] sm:$0x1] %v814_v39 }
  0xc5   :  { %845 = vsyncadd [#allocation3], 48  ;;  %s8044_s26 = sld [smem:[#allocation5 + $0xd]] }
  0xcb   :  { %s847_s27 = sshrl.u32 %s8044_s26, 3  ;;  %s848_s28 = sand.u32 7, %s8044_s26  }
  0xcc   :  { %s849_s14 = smul.u32 24, %s847_s27 }
  0xce   :  { %s850_s29 = sadd.s32 %s849_s14, %s848_s28 }
  0xcf   :  { %s851_s17 = scalar_lea.vmem %s9643_s1, %s850_s29 }
  0xd0   :  { %v871_v40 = vld [vmem:[%s851_s17] sm:$0x1]  ;;  %v873_v41 = vld [vmem:[%s851_s17 + $0x8] sm:$0x1]  ;;  %v875_v42 = vld [vmem:[%s851_s17 + $0x10] sm:$0x1] }
  0xd1   :  { %872 = vst [vmem:[#allocation2 + $0x1d] sm:$0x1] %v871_v40  ;;  %874 = vst [vmem:[#allocation2 + $0x25] sm:$0x1] %v873_v41 }
  0xd2   :  { %876 = vst [vmem:[#allocation2 + $0x2d] sm:$0x1] %v875_v42 }
  0xd3   :  { %906 = vsyncadd [#allocation3], 48  ;;  %s8045_s18 = sld [smem:[#allocation5 + $0xe]] }
  0xd9   :  { %s908_s19 = sshrl.u32 %s8045_s18, 3  ;;  %s909_s20 = sand.u32 7, %s8045_s18  }
  0xda   :  { %s910_s21 = smul.u32 24, %s908_s19 }
  0xdc   :  { %s911_s22 = sadd.s32 %s910_s21, %s909_s20 }
  0xdd   :  { %s912_s25 = scalar_lea.vmem %s9643_s1, %s911_s22 }
  0xde   :  { %v932_v43 = vld [vmem:[%s912_s25] sm:$0x1]  ;;  %v934_v44 = vld [vmem:[%s912_s25 + $0x8] sm:$0x1]  ;;  %v936_v45 = vld [vmem:[%s912_s25 + $0x10] sm:$0x1] }
  0xdf   :  { %933 = vst [vmem:[#allocation2 + $0x1e] sm:$0x1] %v932_v43  ;;  %935 = vst [vmem:[#allocation2 + $0x26] sm:$0x1] %v934_v44 }
  0xe0   :  { %937 = vst [vmem:[#allocation2 + $0x2e] sm:$0x1] %v936_v45 }
  0xe1   :  { %967 = vsyncadd [#allocation3], 48  ;;  %s8046_s0 = sld [smem:[#allocation5 + $0xf]] }
  0xe7   :  { %s969_s26 = sshrl.u32 %s8046_s0, 3  ;;  %s970_s27 = sand.u32 7, %s8046_s0  }
  0xe8   :  { %s971_s28 = smul.u32 24, %s969_s26 }
  0xea   :  { %s972_s14 = sadd.s32 %s971_s28, %s970_s27 }
  0xeb   :  { %s973_s16 = scalar_lea.vmem %s9643_s1, %s972_s14 }
  0xec   :  { %v993_v46 = vld [vmem:[%s973_s16] sm:$0x1]  ;;  %v995_v47 = vld [vmem:[%s973_s16 + $0x8] sm:$0x1]  ;;  %v997_v48 = vld [vmem:[%s973_s16 + $0x10] sm:$0x1] }
  0xed   :  { %994 = vst [vmem:[#allocation2 + $0x1f] sm:$0x1] %v993_v46  ;;  %996 = vst [vmem:[#allocation2 + $0x27] sm:$0x1] %v995_v47 }
  0xee   :  { %998 = vst [vmem:[#allocation2 + $0x2f] sm:$0x1] %v997_v48 }
  0xef   :  { %1028 = vsyncadd [#allocation3], 48  ;;  %s8047_s17 = sld [smem:[#allocation5 + $0x10]] }
  0xf5   :  { %s1030_s18 = sshrl.u32 %s8047_s17, 3  ;;  %s1031_s19 = sand.u32 7, %s8047_s17  }
  0xf6   :  { %s1032_s20 = smul.u32 24, %s1030_s18 }
  0xf8   :  { %s1033_s21 = sadd.s32 %s1032_s20, %s1031_s19 }
  0xf9   :  { %s1034_s24 = scalar_lea.vmem %s9643_s1, %s1033_s21 }
  0xfa   :  { %v1054_v49 = vld [vmem:[%s1034_s24] sm:$0x1]  ;;  %v1056_v50 = vld [vmem:[%s1034_s24 + $0x8] sm:$0x1]  ;;  %v1058_v51 = vld [vmem:[%s1034_s24 + $0x10] sm:$0x1] }
  0xfb   :  { %1055 = vst [vmem:[#allocation2 + $0x30] sm:$0x1] %v1054_v49  ;;  %1057 = vst [vmem:[#allocation2 + $0x38] sm:$0x1] %v1056_v50 }
  0xfc   :  { %1059 = vst [vmem:[#allocation2 + $0x40] sm:$0x1] %v1058_v51 }
  0xfd   :  { %1089 = vsyncadd [#allocation3], 48  ;;  %s8048_s25 = sld [smem:[#allocation5 + $0x11]] }
 0x103   :  { %s1091_s0 = sshrl.u32 %s8048_s25, 3  ;;  %s1092_s26 = sand.u32 7, %s8048_s25  }
 0x104   :  { %s1093_s27 = smul.u32 24, %s1091_s0 }
 0x106   :  { %s1094_s28 = sadd.s32 %s1093_s27, %s1092_s26 }
 0x107   :  { %s1095_s30 = scalar_lea.vmem %s9643_s1, %s1094_s28 }
 0x108   :  { %v1115_v52 = vld [vmem:[%s1095_s30] sm:$0x1]  ;;  %v1117_v53 = vld [vmem:[%s1095_s30 + $0x8] sm:$0x1]  ;;  %v1119_v54 = vld [vmem:[%s1095_s30 + $0x10] sm:$0x1] }
 0x109   :  { %1116 = vst [vmem:[#allocation2 + $0x31] sm:$0x1] %v1115_v52  ;;  %1118 = vst [vmem:[#allocation2 + $0x39] sm:$0x1] %v1117_v53 }
 0x10a   :  { %1120 = vst [vmem:[#allocation2 + $0x41] sm:$0x1] %v1119_v54 }
 0x10b   :  { %1150 = vsyncadd [#allocation3], 48  ;;  %s8049_s16 = sld [smem:[#allocation5 + $0x12]] }
 0x111   :  { %s1152_s17 = sshrl.u32 %s8049_s16, 3  ;;  %s1153_s18 = sand.u32 7, %s8049_s16  }
 0x112   :  { %s1154_s19 = smul.u32 24, %s1152_s17 }
 0x114   :  { %s1155_s20 = sadd.s32 %s1154_s19, %s1153_s18 }
 0x115   :  { %s1156_s23 = scalar_lea.vmem %s9643_s1, %s1155_s20 }
 0x116   :  { %v1176_v55 = vld [vmem:[%s1156_s23] sm:$0x1]  ;;  %v1178_v56 = vld [vmem:[%s1156_s23 + $0x8] sm:$0x1]  ;;  %v1180_v57 = vld [vmem:[%s1156_s23 + $0x10] sm:$0x1] }
 0x117   :  { %1177 = vst [vmem:[#allocation2 + $0x32] sm:$0x1] %v1176_v55  ;;  %1179 = vst [vmem:[#allocation2 + $0x3a] sm:$0x1] %v1178_v56 }
 0x118   :  { %1181 = vst [vmem:[#allocation2 + $0x42] sm:$0x1] %v1180_v57 }
 0x119   :  { %1211 = vsyncadd [#allocation3], 48  ;;  %s8050_s24 = sld [smem:[#allocation5 + $0x13]] }
 0x11f   :  { %s1213_s25 = sshrl.u32 %s8050_s24, 3  ;;  %s1214_s0 = sand.u32 7, %s8050_s24  }
 0x120   :  { %s1215_s26 = smul.u32 24, %s1213_s25 }
 0x122   :  { %s1216_s27 = sadd.s32 %s1215_s26, %s1214_s0 }
 0x123   :  { %s1217_s29 = scalar_lea.vmem %s9643_s1, %s1216_s27 }
 0x124   :  { %v1237_v58 = vld [vmem:[%s1217_s29] sm:$0x1]  ;;  %v1239_v59 = vld [vmem:[%s1217_s29 + $0x8] sm:$0x1]  ;;  %v1241_v60 = vld [vmem:[%s1217_s29 + $0x10] sm:$0x1] }
 0x125   :  { %1238 = vst [vmem:[#allocation2 + $0x33] sm:$0x1] %v1237_v58  ;;  %1240 = vst [vmem:[#allocation2 + $0x3b] sm:$0x1] %v1239_v59 }
 0x126   :  { %1242 = vst [vmem:[#allocation2 + $0x43] sm:$0x1] %v1241_v60 }
 0x127   :  { %1272 = vsyncadd [#allocation3], 48  ;;  %s8051_s30 = sld [smem:[#allocation5 + $0x14]] }
 0x12d   :  { %s1274_s16 = sshrl.u32 %s8051_s30, 3  ;;  %s1275_s17 = sand.u32 7, %s8051_s30  }
 0x12e   :  { %s1276_s18 = smul.u32 24, %s1274_s16 }
 0x130   :  { %s1277_s19 = sadd.s32 %s1276_s18, %s1275_s17 }
 0x131   :  { %s1278_s22 = scalar_lea.vmem %s9643_s1, %s1277_s19 }
 0x132   :  { %v1298_v61 = vld [vmem:[%s1278_s22] sm:$0x1]  ;;  %v1300_v62 = vld [vmem:[%s1278_s22 + $0x8] sm:$0x1]  ;;  %v1302_v63 = vld [vmem:[%s1278_s22 + $0x10] sm:$0x1] }
 0x133   :  { %1299 = vst [vmem:[#allocation2 + $0x34] sm:$0x1] %v1298_v61  ;;  %1301 = vst [vmem:[#allocation2 + $0x3c] sm:$0x1] %v1300_v62 }
 0x134   :  { %1303 = vst [vmem:[#allocation2 + $0x44] sm:$0x1] %v1302_v63 }
 0x135   :  { %1333 = vsyncadd [#allocation3], 48  ;;  %s8052_s23 = sld [smem:[#allocation5 + $0x15]] }
 0x13b   :  { %s1335_s24 = sshrl.u32 %s8052_s23, 3  ;;  %s1336_s25 = sand.u32 7, %s8052_s23  }
 0x13c   :  { %s1337_s0 = smul.u32 24, %s1335_s24 }
 0x13e   :  { %s1338_s26 = sadd.s32 %s1337_s0, %s1336_s25 }
 0x13f   :  { %s1339_s14 = scalar_lea.vmem %s9643_s1, %s1338_s26 }
 0x140   :  { %v1359_v0 = vld [vmem:[%s1339_s14] sm:$0x1]  ;;  %v1361_v1 = vld [vmem:[%s1339_s14 + $0x8] sm:$0x1]  ;;  %v1363_v2 = vld [vmem:[%s1339_s14 + $0x10] sm:$0x1] }
 0x141   :  { %1360 = vst [vmem:[#allocation2 + $0x35] sm:$0x1] %v1359_v0  ;;  %1362 = vst [vmem:[#allocation2 + $0x3d] sm:$0x1] %v1361_v1 }
 0x142   :  { %1364 = vst [vmem:[#allocation2 + $0x45] sm:$0x1] %v1363_v2 }
 0x143   :  { %1394 = vsyncadd [#allocation3], 48  ;;  %s8053_s29 = sld [smem:[#allocation5 + $0x16]] }
 0x149   :  { %s1396_s30 = sshrl.u32 %s8053_s29, 3  ;;  %s1397_s16 = sand.u32 7, %s8053_s29  }
 0x14a   :  { %s1398_s17 = smul.u32 24, %s1396_s30 }
 0x14c   :  { %s1399_s18 = sadd.s32 %s1398_s17, %s1397_s16 }
 0x14d   :  { %s1400_s21 = scalar_lea.vmem %s9643_s1, %s1399_s18 }
 0x14e   :  { %v1420_v3 = vld [vmem:[%s1400_s21] sm:$0x1]  ;;  %v1422_v4 = vld [vmem:[%s1400_s21 + $0x8] sm:$0x1]  ;;  %v1424_v5 = vld [vmem:[%s1400_s21 + $0x10] sm:$0x1] }
 0x14f   :  { %1421 = vst [vmem:[#allocation2 + $0x36] sm:$0x1] %v1420_v3  ;;  %1423 = vst [vmem:[#allocation2 + $0x3e] sm:$0x1] %v1422_v4 }
 0x150   :  { %1425 = vst [vmem:[#allocation2 + $0x46] sm:$0x1] %v1424_v5 }
 0x151   :  { %1455 = vsyncadd [#allocation3], 48  ;;  %s8054_s22 = sld [smem:[#allocation5 + $0x17]] }
 0x157   :  { %s1457_s23 = sshrl.u32 %s8054_s22, 3  ;;  %s1458_s24 = sand.u32 7, %s8054_s22  }
 0x158   :  { %s1459_s25 = smul.u32 24, %s1457_s23 }
 0x15a   :  { %s1460_s0 = sadd.s32 %s1459_s25, %s1458_s24 }
 0x15b   :  { %s1461_s28 = scalar_lea.vmem %s9643_s1, %s1460_s0 }
 0x15c   :  { %v1481_v6 = vld [vmem:[%s1461_s28] sm:$0x1]  ;;  %v1483_v7 = vld [vmem:[%s1461_s28 + $0x8] sm:$0x1]  ;;  %v1485_v8 = vld [vmem:[%s1461_s28 + $0x10] sm:$0x1] }
 0x15d   :  { %1482 = vst [vmem:[#allocation2 + $0x37] sm:$0x1] %v1481_v6  ;;  %1484 = vst [vmem:[#allocation2 + $0x3f] sm:$0x1] %v1483_v7 }
 0x15e   :  { %1486 = vst [vmem:[#allocation2 + $0x47] sm:$0x1] %v1485_v8 }
 0x15f   :  { %1516 = vsyncadd [#allocation3], 48  ;;  %s8055_s14 = sld [smem:[#allocation5 + $0x18]] }
 0x165   :  { %s1518_s29 = sshrl.u32 %s8055_s14, 3  ;;  %s1519_s30 = sand.u32 7, %s8055_s14  }
 0x166   :  { %s1520_s16 = smul.u32 24, %s1518_s29 }
 0x168   :  { %s1521_s17 = sadd.s32 %s1520_s16, %s1519_s30 }
 0x169   :  { %s1522_s20 = scalar_lea.vmem %s9643_s1, %s1521_s17 }
 0x16a   :  { %v1542_v9 = vld [vmem:[%s1522_s20] sm:$0x1]  ;;  %v1544_v10 = vld [vmem:[%s1522_s20 + $0x8] sm:$0x1]  ;;  %v1546_v11 = vld [vmem:[%s1522_s20 + $0x10] sm:$0x1] }
 0x16b   :  { %1543 = vst [vmem:[#allocation2 + $0x48] sm:$0x1] %v1542_v9  ;;  %1545 = vst [vmem:[#allocation2 + $0x50] sm:$0x1] %v1544_v10 }
 0x16c   :  { %1547 = vst [vmem:[#allocation2 + $0x58] sm:$0x1] %v1546_v11 }
 0x16d   :  { %1577 = vsyncadd [#allocation3], 48  ;;  %s8056_s21 = sld [smem:[#allocation5 + $0x19]] }
 0x173   :  { %s1579_s22 = sshrl.u32 %s8056_s21, 3  ;;  %s1580_s23 = sand.u32 7, %s8056_s21  }
 0x174   :  { %s1581_s24 = smul.u32 24, %s1579_s22 }
 0x176   :  { %s1582_s25 = sadd.s32 %s1581_s24, %s1580_s23 }
 0x177   :  { %s1583_s27 = scalar_lea.vmem %s9643_s1, %s1582_s25 }
 0x178   :  { %v1603_v12 = vld [vmem:[%s1583_s27] sm:$0x1]  ;;  %v1605_v13 = vld [vmem:[%s1583_s27 + $0x8] sm:$0x1]  ;;  %v1607_v14 = vld [vmem:[%s1583_s27 + $0x10] sm:$0x1] }
 0x179   :  { %1604 = vst [vmem:[#allocation2 + $0x49] sm:$0x1] %v1603_v12  ;;  %1606 = vst [vmem:[#allocation2 + $0x51] sm:$0x1] %v1605_v13 }
 0x17a   :  { %1608 = vst [vmem:[#allocation2 + $0x59] sm:$0x1] %v1607_v14 }
 0x17b   :  { %1638 = vsyncadd [#allocation3], 48  ;;  %s8057_s28 = sld [smem:[#allocation5 + $0x1a]] }
 0x181   :  { %s1640_s14 = sshrl.u32 %s8057_s28, 3  ;;  %s1641_s29 = sand.u32 7, %s8057_s28  }
 0x182   :  { %s1642_s30 = smul.u32 24, %s1640_s14 }
 0x184   :  { %s1643_s16 = sadd.s32 %s1642_s30, %s1641_s29 }
 0x185   :  { %s1644_s19 = scalar_lea.vmem %s9643_s1, %s1643_s16 }
 0x186   :  { %v1664_v15 = vld [vmem:[%s1644_s19] sm:$0x1]  ;;  %v1666_v16 = vld [vmem:[%s1644_s19 + $0x8] sm:$0x1]  ;;  %v1668_v17 = vld [vmem:[%s1644_s19 + $0x10] sm:$0x1] }
 0x187   :  { %1665 = vst [vmem:[#allocation2 + $0x4a] sm:$0x1] %v1664_v15  ;;  %1667 = vst [vmem:[#allocation2 + $0x52] sm:$0x1] %v1666_v16 }
 0x188   :  { %1669 = vst [vmem:[#allocation2 + $0x5a] sm:$0x1] %v1668_v17 }
 0x189   :  { %1699 = vsyncadd [#allocation3], 48  ;;  %s8058_s20 = sld [smem:[#allocation5 + $0x1b]] }
 0x18f   :  { %s1701_s21 = sshrl.u32 %s8058_s20, 3  ;;  %s1702_s22 = sand.u32 7, %s8058_s20  }
 0x190   :  { %s1703_s23 = smul.u32 24, %s1701_s21 }
 0x192   :  { %s1704_s24 = sadd.s32 %s1703_s23, %s1702_s22 }
 0x193   :  { %s1705_s26 = scalar_lea.vmem %s9643_s1, %s1704_s24 }
 0x194   :  { %v1725_v18 = vld [vmem:[%s1705_s26] sm:$0x1]  ;;  %v1727_v19 = vld [vmem:[%s1705_s26 + $0x8] sm:$0x1]  ;;  %v1729_v20 = vld [vmem:[%s1705_s26 + $0x10] sm:$0x1] }
 0x195   :  { %1726 = vst [vmem:[#allocation2 + $0x4b] sm:$0x1] %v1725_v18  ;;  %1728 = vst [vmem:[#allocation2 + $0x53] sm:$0x1] %v1727_v19 }
 0x196   :  { %1730 = vst [vmem:[#allocation2 + $0x5b] sm:$0x1] %v1729_v20 }
 0x197   :  { %1760 = vsyncadd [#allocation3], 48  ;;  %s8059_s27 = sld [smem:[#allocation5 + $0x1c]] }
 0x19d   :  { %s1762_s28 = sshrl.u32 %s8059_s27, 3  ;;  %s1763_s14 = sand.u32 7, %s8059_s27  }
 0x19e   :  { %s1764_s29 = smul.u32 24, %s1762_s28 }
 0x1a0   :  { %s1765_s30 = sadd.s32 %s1764_s29, %s1763_s14 }
 0x1a1   :  { %s1766_s18 = scalar_lea.vmem %s9643_s1, %s1765_s30 }
 0x1a2   :  { %v1786_v21 = vld [vmem:[%s1766_s18] sm:$0x1]  ;;  %v1788_v22 = vld [vmem:[%s1766_s18 + $0x8] sm:$0x1]  ;;  %v1790_v23 = vld [vmem:[%s1766_s18 + $0x10] sm:$0x1] }
 0x1a3   :  { %1787 = vst [vmem:[#allocation2 + $0x4c] sm:$0x1] %v1786_v21  ;;  %1789 = vst [vmem:[#allocation2 + $0x54] sm:$0x1] %v1788_v22 }
 0x1a4   :  { %1791 = vst [vmem:[#allocation2 + $0x5c] sm:$0x1] %v1790_v23 }
 0x1a5   :  { %1821 = vsyncadd [#allocation3], 48  ;;  %s8060_s19 = sld [smem:[#allocation5 + $0x1d]] }
 0x1ab   :  { %s1823_s20 = sshrl.u32 %s8060_s19, 3  ;;  %s1824_s21 = sand.u32 7, %s8060_s19  }
 0x1ac   :  { %s1825_s22 = smul.u32 24, %s1823_s20 }
 0x1ae   :  { %s1826_s23 = sadd.s32 %s1825_s22, %s1824_s21 }
 0x1af   :  { %s1827_s0 = scalar_lea.vmem %s9643_s1, %s1826_s23 }
 0x1b0   :  { %v1847_v24 = vld [vmem:[%s1827_s0] sm:$0x1]  ;;  %v1849_v25 = vld [vmem:[%s1827_s0 + $0x8] sm:$0x1]  ;;  %v1851_v26 = vld [vmem:[%s1827_s0 + $0x10] sm:$0x1] }
 0x1b1   :  { %1848 = vst [vmem:[#allocation2 + $0x4d] sm:$0x1] %v1847_v24  ;;  %1850 = vst [vmem:[#allocation2 + $0x55] sm:$0x1] %v1849_v25 }
 0x1b2   :  { %1852 = vst [vmem:[#allocation2 + $0x5d] sm:$0x1] %v1851_v26 }
 0x1b3   :  { %1882 = vsyncadd [#allocation3], 48  ;;  %s8061_s26 = sld [smem:[#allocation5 + $0x1e]] }
 0x1b9   :  { %s1884_s27 = sshrl.u32 %s8061_s26, 3  ;;  %s1885_s28 = sand.u32 7, %s8061_s26  }
 0x1ba   :  { %s1886_s14 = smul.u32 24, %s1884_s27 }
 0x1bc   :  { %s1887_s29 = sadd.s32 %s1886_s14, %s1885_s28 }
 0x1bd   :  { %s1888_s17 = scalar_lea.vmem %s9643_s1, %s1887_s29 }
 0x1be   :  { %v1908_v27 = vld [vmem:[%s1888_s17] sm:$0x1]  ;;  %v1910_v28 = vld [vmem:[%s1888_s17 + $0x8] sm:$0x1]  ;;  %v1912_v29 = vld [vmem:[%s1888_s17 + $0x10] sm:$0x1] }
 0x1bf   :  { %1909 = vst [vmem:[#allocation2 + $0x4e] sm:$0x1] %v1908_v27  ;;  %1911 = vst [vmem:[#allocation2 + $0x56] sm:$0x1] %v1910_v28 }
 0x1c0   :  { %1913 = vst [vmem:[#allocation2 + $0x5e] sm:$0x1] %v1912_v29 }
 0x1c1   :  { %1943 = vsyncadd [#allocation3], 48  ;;  %s8062_s18 = sld [smem:[#allocation5 + $0x1f]] }
 0x1c7   :  { %s1945_s19 = sshrl.u32 %s8062_s18, 3  ;;  %s1946_s20 = sand.u32 7, %s8062_s18  }
 0x1c8   :  { %s1947_s21 = smul.u32 24, %s1945_s19 }
 0x1ca   :  { %s1948_s22 = sadd.s32 %s1947_s21, %s1946_s20 }
 0x1cb   :  { %s1949_s25 = scalar_lea.vmem %s9643_s1, %s1948_s22 }
 0x1cc   :  { %v1969_v30 = vld [vmem:[%s1949_s25] sm:$0x1]  ;;  %v1971_v31 = vld [vmem:[%s1949_s25 + $0x8] sm:$0x1]  ;;  %v1973_v32 = vld [vmem:[%s1949_s25 + $0x10] sm:$0x1] }
 0x1cd   :  { %1970 = vst [vmem:[#allocation2 + $0x4f] sm:$0x1] %v1969_v30  ;;  %1972 = vst [vmem:[#allocation2 + $0x57] sm:$0x1] %v1971_v31 }
 0x1ce   :  { %1974 = vst [vmem:[#allocation2 + $0x5f] sm:$0x1] %v1973_v32 }
 0x1cf   :  { %2004 = vsyncadd [#allocation3], 48  ;;  %s8063_s0 = sld [smem:[#allocation5 + $0x20]] }
 0x1d5   :  { %s2006_s26 = sshrl.u32 %s8063_s0, 3  ;;  %s2007_s27 = sand.u32 7, %s8063_s0  }
 0x1d6   :  { %s2008_s28 = smul.u32 24, %s2006_s26 }
 0x1d8   :  { %s2009_s14 = sadd.s32 %s2008_s28, %s2007_s27 }
 0x1d9   :  { %s2010_s16 = scalar_lea.vmem %s9643_s1, %s2009_s14 }
 0x1da   :  { %v2030_v33 = vld [vmem:[%s2010_s16] sm:$0x1]  ;;  %v2032_v34 = vld [vmem:[%s2010_s16 + $0x8] sm:$0x1]  ;;  %v2034_v35 = vld [vmem:[%s2010_s16 + $0x10] sm:$0x1] }
 0x1db   :  { %2031 = vst [vmem:[#allocation2 + $0x60] sm:$0x1] %v2030_v33  ;;  %2033 = vst [vmem:[#allocation2 + $0x68] sm:$0x1] %v2032_v34 }
 0x1dc   :  { %2035 = vst [vmem:[#allocation2 + $0x70] sm:$0x1] %v2034_v35 }
 0x1dd   :  { %2065 = vsyncadd [#allocation3], 48  ;;  %s8064_s17 = sld [smem:[#allocation5 + $0x21]] }
 0x1e3   :  { %s2067_s18 = sshrl.u32 %s8064_s17, 3  ;;  %s2068_s19 = sand.u32 7, %s8064_s17  }
 0x1e4   :  { %s2069_s20 = smul.u32 24, %s2067_s18 }
 0x1e6   :  { %s2070_s21 = sadd.s32 %s2069_s20, %s2068_s19 }
 0x1e7   :  { %s2071_s24 = scalar_lea.vmem %s9643_s1, %s2070_s21 }
 0x1e8   :  { %v2091_v36 = vld [vmem:[%s2071_s24] sm:$0x1]  ;;  %v2093_v37 = vld [vmem:[%s2071_s24 + $0x8] sm:$0x1]  ;;  %v2095_v38 = vld [vmem:[%s2071_s24 + $0x10] sm:$0x1] }
 0x1e9   :  { %2092 = vst [vmem:[#allocation2 + $0x61] sm:$0x1] %v2091_v36  ;;  %2094 = vst [vmem:[#allocation2 + $0x69] sm:$0x1] %v2093_v37 }
 0x1ea   :  { %2096 = vst [vmem:[#allocation2 + $0x71] sm:$0x1] %v2095_v38 }
 0x1eb   :  { %2126 = vsyncadd [#allocation3], 48  ;;  %s8065_s25 = sld [smem:[#allocation5 + $0x22]] }
 0x1f1   :  { %s2128_s0 = sshrl.u32 %s8065_s25, 3  ;;  %s2129_s26 = sand.u32 7, %s8065_s25  }
 0x1f2   :  { %s2130_s27 = smul.u32 24, %s2128_s0 }
 0x1f4   :  { %s2131_s28 = sadd.s32 %s2130_s27, %s2129_s26 }
 0x1f5   :  { %s2132_s30 = scalar_lea.vmem %s9643_s1, %s2131_s28 }
 0x1f6   :  { %v2152_v39 = vld [vmem:[%s2132_s30] sm:$0x1]  ;;  %v2154_v40 = vld [vmem:[%s2132_s30 + $0x8] sm:$0x1]  ;;  %v2156_v41 = vld [vmem:[%s2132_s30 + $0x10] sm:$0x1] }
 0x1f7   :  { %2153 = vst [vmem:[#allocation2 + $0x62] sm:$0x1] %v2152_v39  ;;  %2155 = vst [vmem:[#allocation2 + $0x6a] sm:$0x1] %v2154_v40 }
 0x1f8   :  { %2157 = vst [vmem:[#allocation2 + $0x72] sm:$0x1] %v2156_v41 }
 0x1f9   :  { %2187 = vsyncadd [#allocation3], 48  ;;  %s8066_s16 = sld [smem:[#allocation5 + $0x23]] }
 0x1ff   :  { %s2189_s17 = sshrl.u32 %s8066_s16, 3  ;;  %s2190_s18 = sand.u32 7, %s8066_s16  }
 0x200   :  { %s2191_s19 = smul.u32 24, %s2189_s17 }
 0x202   :  { %s2192_s20 = sadd.s32 %s2191_s19, %s2190_s18 }
 0x203   :  { %s2193_s23 = scalar_lea.vmem %s9643_s1, %s2192_s20 }
 0x204   :  { %v2213_v42 = vld [vmem:[%s2193_s23] sm:$0x1]  ;;  %v2215_v43 = vld [vmem:[%s2193_s23 + $0x8] sm:$0x1]  ;;  %v2217_v44 = vld [vmem:[%s2193_s23 + $0x10] sm:$0x1] }
 0x205   :  { %2214 = vst [vmem:[#allocation2 + $0x63] sm:$0x1] %v2213_v42  ;;  %2216 = vst [vmem:[#allocation2 + $0x6b] sm:$0x1] %v2215_v43 }
 0x206   :  { %2218 = vst [vmem:[#allocation2 + $0x73] sm:$0x1] %v2217_v44 }
 0x207   :  { %2248 = vsyncadd [#allocation3], 48  ;;  %s8067_s24 = sld [smem:[#allocation5 + $0x24]] }
 0x20d   :  { %s2250_s25 = sshrl.u32 %s8067_s24, 3  ;;  %s2251_s0 = sand.u32 7, %s8067_s24  }
 0x20e   :  { %s2252_s26 = smul.u32 24, %s2250_s25 }
 0x210   :  { %s2253_s27 = sadd.s32 %s2252_s26, %s2251_s0 }
 0x211   :  { %s2254_s29 = scalar_lea.vmem %s9643_s1, %s2253_s27 }
 0x212   :  { %v2274_v45 = vld [vmem:[%s2254_s29] sm:$0x1]  ;;  %v2276_v46 = vld [vmem:[%s2254_s29 + $0x8] sm:$0x1]  ;;  %v2278_v47 = vld [vmem:[%s2254_s29 + $0x10] sm:$0x1] }
 0x213   :  { %2275 = vst [vmem:[#allocation2 + $0x64] sm:$0x1] %v2274_v45  ;;  %2277 = vst [vmem:[#allocation2 + $0x6c] sm:$0x1] %v2276_v46 }
 0x214   :  { %2279 = vst [vmem:[#allocation2 + $0x74] sm:$0x1] %v2278_v47 }
 0x215   :  { %2309 = vsyncadd [#allocation3], 48  ;;  %s8068_s30 = sld [smem:[#allocation5 + $0x25]] }
 0x21b   :  { %s2311_s16 = sshrl.u32 %s8068_s30, 3  ;;  %s2312_s17 = sand.u32 7, %s8068_s30  }
 0x21c   :  { %s2313_s18 = smul.u32 24, %s2311_s16 }
 0x21e   :  { %s2314_s19 = sadd.s32 %s2313_s18, %s2312_s17 }
 0x21f   :  { %s2315_s22 = scalar_lea.vmem %s9643_s1, %s2314_s19 }
 0x220   :  { %v2335_v48 = vld [vmem:[%s2315_s22] sm:$0x1]  ;;  %v2337_v49 = vld [vmem:[%s2315_s22 + $0x8] sm:$0x1]  ;;  %v2339_v50 = vld [vmem:[%s2315_s22 + $0x10] sm:$0x1] }
 0x221   :  { %2336 = vst [vmem:[#allocation2 + $0x65] sm:$0x1] %v2335_v48  ;;  %2338 = vst [vmem:[#allocation2 + $0x6d] sm:$0x1] %v2337_v49 }
 0x222   :  { %2340 = vst [vmem:[#allocation2 + $0x75] sm:$0x1] %v2339_v50 }
 0x223   :  { %2370 = vsyncadd [#allocation3], 48  ;;  %s8069_s23 = sld [smem:[#allocation5 + $0x26]] }
 0x229   :  { %s2372_s24 = sshrl.u32 %s8069_s23, 3  ;;  %s2373_s25 = sand.u32 7, %s8069_s23  }
 0x22a   :  { %s2374_s0 = smul.u32 24, %s2372_s24 }
 0x22c   :  { %s2375_s26 = sadd.s32 %s2374_s0, %s2373_s25 }
 0x22d   :  { %s2376_s14 = scalar_lea.vmem %s9643_s1, %s2375_s26 }
 0x22e   :  { %v2396_v51 = vld [vmem:[%s2376_s14] sm:$0x1]  ;;  %v2398_v52 = vld [vmem:[%s2376_s14 + $0x8] sm:$0x1]  ;;  %v2400_v53 = vld [vmem:[%s2376_s14 + $0x10] sm:$0x1] }
 0x22f   :  { %2397 = vst [vmem:[#allocation2 + $0x66] sm:$0x1] %v2396_v51  ;;  %2399 = vst [vmem:[#allocation2 + $0x6e] sm:$0x1] %v2398_v52 }
 0x230   :  { %2401 = vst [vmem:[#allocation2 + $0x76] sm:$0x1] %v2400_v53 }
 0x231   :  { %2431 = vsyncadd [#allocation3], 48  ;;  %s8070_s29 = sld [smem:[#allocation5 + $0x27]] }
 0x237   :  { %s2433_s30 = sshrl.u32 %s8070_s29, 3  ;;  %s2434_s16 = sand.u32 7, %s8070_s29  }
 0x238   :  { %s2435_s17 = smul.u32 24, %s2433_s30 }
 0x23a   :  { %s2436_s18 = sadd.s32 %s2435_s17, %s2434_s16 }
 0x23b   :  { %s2437_s21 = scalar_lea.vmem %s9643_s1, %s2436_s18 }
 0x23c   :  { %v2457_v54 = vld [vmem:[%s2437_s21] sm:$0x1]  ;;  %v2459_v55 = vld [vmem:[%s2437_s21 + $0x8] sm:$0x1]  ;;  %v2461_v56 = vld [vmem:[%s2437_s21 + $0x10] sm:$0x1] }
 0x23d   :  { %2458 = vst [vmem:[#allocation2 + $0x67] sm:$0x1] %v2457_v54  ;;  %2460 = vst [vmem:[#allocation2 + $0x6f] sm:$0x1] %v2459_v55 }
 0x23e   :  { %2462 = vst [vmem:[#allocation2 + $0x77] sm:$0x1] %v2461_v56 }
 0x23f   :  { %2492 = vsyncadd [#allocation3], 48  ;;  %s8071_s22 = sld [smem:[#allocation5 + $0x28]] }
 0x245   :  { %s2494_s23 = sshrl.u32 %s8071_s22, 3  ;;  %s2495_s24 = sand.u32 7, %s8071_s22  }
 0x246   :  { %s2496_s25 = smul.u32 24, %s2494_s23 }
 0x248   :  { %s2497_s0 = sadd.s32 %s2496_s25, %s2495_s24 }
 0x249   :  { %s2498_s28 = scalar_lea.vmem %s9643_s1, %s2497_s0 }
 0x24a   :  { %v2518_v57 = vld [vmem:[%s2498_s28] sm:$0x1]  ;;  %v2520_v58 = vld [vmem:[%s2498_s28 + $0x8] sm:$0x1]  ;;  %v2522_v59 = vld [vmem:[%s2498_s28 + $0x10] sm:$0x1] }
 0x24b   :  { %2519 = vst [vmem:[#allocation2 + $0x78] sm:$0x1] %v2518_v57  ;;  %2521 = vst [vmem:[#allocation2 + $0x80] sm:$0x1] %v2520_v58 }
 0x24c   :  { %2523 = vst [vmem:[#allocation2 + $0x88] sm:$0x1] %v2522_v59 }
 0x24d   :  { %2553 = vsyncadd [#allocation3], 48  ;;  %s8072_s14 = sld [smem:[#allocation5 + $0x29]] }
 0x253   :  { %s2555_s29 = sshrl.u32 %s8072_s14, 3  ;;  %s2556_s30 = sand.u32 7, %s8072_s14  }
 0x254   :  { %s2557_s16 = smul.u32 24, %s2555_s29 }
 0x256   :  { %s2558_s17 = sadd.s32 %s2557_s16, %s2556_s30 }
 0x257   :  { %s2559_s20 = scalar_lea.vmem %s9643_s1, %s2558_s17 }
 0x258   :  { %v2579_v60 = vld [vmem:[%s2559_s20] sm:$0x1]  ;;  %v2581_v61 = vld [vmem:[%s2559_s20 + $0x8] sm:$0x1]  ;;  %v2583_v62 = vld [vmem:[%s2559_s20 + $0x10] sm:$0x1] }
 0x259   :  { %2580 = vst [vmem:[#allocation2 + $0x79] sm:$0x1] %v2579_v60  ;;  %2582 = vst [vmem:[#allocation2 + $0x81] sm:$0x1] %v2581_v61 }
 0x25a   :  { %2584 = vst [vmem:[#allocation2 + $0x89] sm:$0x1] %v2583_v62 }
 0x25b   :  { %2614 = vsyncadd [#allocation3], 48  ;;  %s8073_s21 = sld [smem:[#allocation5 + $0x2a]] }
 0x261   :  { %s2616_s22 = sshrl.u32 %s8073_s21, 3  ;;  %s2617_s23 = sand.u32 7, %s8073_s21  }
 0x262   :  { %s2618_s24 = smul.u32 24, %s2616_s22 }
 0x264   :  { %s2619_s25 = sadd.s32 %s2618_s24, %s2617_s23 }
 0x265   :  { %s2620_s27 = scalar_lea.vmem %s9643_s1, %s2619_s25 }
 0x266   :  { %v2640_v63 = vld [vmem:[%s2620_s27] sm:$0x1]  ;;  %v2642_v0 = vld [vmem:[%s2620_s27 + $0x8] sm:$0x1]  ;;  %v2644_v1 = vld [vmem:[%s2620_s27 + $0x10] sm:$0x1] }
 0x267   :  { %2641 = vst [vmem:[#allocation2 + $0x7a] sm:$0x1] %v2640_v63  ;;  %2643 = vst [vmem:[#allocation2 + $0x82] sm:$0x1] %v2642_v0 }
 0x268   :  { %2645 = vst [vmem:[#allocation2 + $0x8a] sm:$0x1] %v2644_v1 }
 0x269   :  { %2675 = vsyncadd [#allocation3], 48  ;;  %s8074_s28 = sld [smem:[#allocation5 + $0x2b]] }
 0x26f   :  { %s2677_s14 = sshrl.u32 %s8074_s28, 3  ;;  %s2678_s29 = sand.u32 7, %s8074_s28  }
 0x270   :  { %s2679_s30 = smul.u32 24, %s2677_s14 }
 0x272   :  { %s2680_s16 = sadd.s32 %s2679_s30, %s2678_s29 }
 0x273   :  { %s2681_s19 = scalar_lea.vmem %s9643_s1, %s2680_s16 }
 0x274   :  { %v2701_v2 = vld [vmem:[%s2681_s19] sm:$0x1]  ;;  %v2703_v3 = vld [vmem:[%s2681_s19 + $0x8] sm:$0x1]  ;;  %v2705_v4 = vld [vmem:[%s2681_s19 + $0x10] sm:$0x1] }
 0x275   :  { %2702 = vst [vmem:[#allocation2 + $0x7b] sm:$0x1] %v2701_v2  ;;  %2704 = vst [vmem:[#allocation2 + $0x83] sm:$0x1] %v2703_v3 }
 0x276   :  { %2706 = vst [vmem:[#allocation2 + $0x8b] sm:$0x1] %v2705_v4 }
 0x277   :  { %2736 = vsyncadd [#allocation3], 48  ;;  %s8075_s20 = sld [smem:[#allocation5 + $0x2c]] }
 0x27d   :  { %s2738_s21 = sshrl.u32 %s8075_s20, 3  ;;  %s2739_s22 = sand.u32 7, %s8075_s20  }
 0x27e   :  { %s2740_s23 = smul.u32 24, %s2738_s21 }
 0x280   :  { %s2741_s24 = sadd.s32 %s2740_s23, %s2739_s22 }
 0x281   :  { %s2742_s26 = scalar_lea.vmem %s9643_s1, %s2741_s24 }
 0x282   :  { %v2762_v5 = vld [vmem:[%s2742_s26] sm:$0x1]  ;;  %v2764_v6 = vld [vmem:[%s2742_s26 + $0x8] sm:$0x1]  ;;  %v2766_v7 = vld [vmem:[%s2742_s26 + $0x10] sm:$0x1] }
 0x283   :  { %2763 = vst [vmem:[#allocation2 + $0x7c] sm:$0x1] %v2762_v5  ;;  %2765 = vst [vmem:[#allocation2 + $0x84] sm:$0x1] %v2764_v6 }
 0x284   :  { %2767 = vst [vmem:[#allocation2 + $0x8c] sm:$0x1] %v2766_v7 }
 0x285   :  { %2797 = vsyncadd [#allocation3], 48  ;;  %s8076_s27 = sld [smem:[#allocation5 + $0x2d]] }
 0x28b   :  { %s2799_s28 = sshrl.u32 %s8076_s27, 3  ;;  %s2800_s14 = sand.u32 7, %s8076_s27  }
 0x28c   :  { %s2801_s29 = smul.u32 24, %s2799_s28 }
 0x28e   :  { %s2802_s30 = sadd.s32 %s2801_s29, %s2800_s14 }
 0x28f   :  { %s2803_s18 = scalar_lea.vmem %s9643_s1, %s2802_s30 }
 0x290   :  { %v2823_v8 = vld [vmem:[%s2803_s18] sm:$0x1]  ;;  %v2825_v9 = vld [vmem:[%s2803_s18 + $0x8] sm:$0x1]  ;;  %v2827_v10 = vld [vmem:[%s2803_s18 + $0x10] sm:$0x1] }
 0x291   :  { %2824 = vst [vmem:[#allocation2 + $0x7d] sm:$0x1] %v2823_v8  ;;  %2826 = vst [vmem:[#allocation2 + $0x85] sm:$0x1] %v2825_v9 }
 0x292   :  { %2828 = vst [vmem:[#allocation2 + $0x8d] sm:$0x1] %v2827_v10 }
 0x293   :  { %2858 = vsyncadd [#allocation3], 48  ;;  %s8077_s19 = sld [smem:[#allocation5 + $0x2e]] }
 0x299   :  { %s2860_s20 = sshrl.u32 %s8077_s19, 3  ;;  %s2861_s21 = sand.u32 7, %s8077_s19  }
 0x29a   :  { %s2862_s22 = smul.u32 24, %s2860_s20 }
 0x29c   :  { %s2863_s23 = sadd.s32 %s2862_s22, %s2861_s21 }
 0x29d   :  { %s2864_s0 = scalar_lea.vmem %s9643_s1, %s2863_s23 }
 0x29e   :  { %v2884_v11 = vld [vmem:[%s2864_s0] sm:$0x1]  ;;  %v2886_v12 = vld [vmem:[%s2864_s0 + $0x8] sm:$0x1]  ;;  %v2888_v13 = vld [vmem:[%s2864_s0 + $0x10] sm:$0x1] }
 0x29f   :  { %2885 = vst [vmem:[#allocation2 + $0x7e] sm:$0x1] %v2884_v11  ;;  %2887 = vst [vmem:[#allocation2 + $0x86] sm:$0x1] %v2886_v12 }
 0x2a0   :  { %2889 = vst [vmem:[#allocation2 + $0x8e] sm:$0x1] %v2888_v13 }
 0x2a1   :  { %2919 = vsyncadd [#allocation3], 48  ;;  %s8078_s26 = sld [smem:[#allocation5 + $0x2f]] }
 0x2a7   :  { %s2921_s27 = sshrl.u32 %s8078_s26, 3  ;;  %s2922_s28 = sand.u32 7, %s8078_s26  }
 0x2a8   :  { %s2923_s14 = smul.u32 24, %s2921_s27 }
 0x2aa   :  { %s2924_s29 = sadd.s32 %s2923_s14, %s2922_s28 }
 0x2ab   :  { %s2925_s17 = scalar_lea.vmem %s9643_s1, %s2924_s29 }
 0x2ac   :  { %v2945_v14 = vld [vmem:[%s2925_s17] sm:$0x1]  ;;  %v2947_v15 = vld [vmem:[%s2925_s17 + $0x8] sm:$0x1]  ;;  %v2949_v16 = vld [vmem:[%s2925_s17 + $0x10] sm:$0x1] }
 0x2ad   :  { %2946 = vst [vmem:[#allocation2 + $0x7f] sm:$0x1] %v2945_v14  ;;  %2948 = vst [vmem:[#allocation2 + $0x87] sm:$0x1] %v2947_v15 }
 0x2ae   :  { %2950 = vst [vmem:[#allocation2 + $0x8f] sm:$0x1] %v2949_v16 }
 0x2af   :  { %2980 = vsyncadd [#allocation3], 48  ;;  %s8079_s18 = sld [smem:[#allocation5 + $0x30]] }
 0x2b5   :  { %s2982_s19 = sshrl.u32 %s8079_s18, 3  ;;  %s2983_s20 = sand.u32 7, %s8079_s18  }
 0x2b6   :  { %s2984_s21 = smul.u32 24, %s2982_s19 }
 0x2b8   :  { %s2985_s22 = sadd.s32 %s2984_s21, %s2983_s20 }
 0x2b9   :  { %s2986_s25 = scalar_lea.vmem %s9643_s1, %s2985_s22 }
 0x2ba   :  { %v3006_v17 = vld [vmem:[%s2986_s25] sm:$0x1]  ;;  %v3008_v18 = vld [vmem:[%s2986_s25 + $0x8] sm:$0x1]  ;;  %v3010_v19 = vld [vmem:[%s2986_s25 + $0x10] sm:$0x1] }
 0x2bb   :  { %3007 = vst [vmem:[#allocation2 + $0x90] sm:$0x1] %v3006_v17  ;;  %3009 = vst [vmem:[#allocation2 + $0x98] sm:$0x1] %v3008_v18 }
 0x2bc   :  { %3011 = vst [vmem:[#allocation2 + $0xa0] sm:$0x1] %v3010_v19 }
 0x2bd   :  { %3041 = vsyncadd [#allocation3], 48  ;;  %s8080_s0 = sld [smem:[#allocation5 + $0x31]] }
 0x2c3   :  { %s3043_s26 = sshrl.u32 %s8080_s0, 3  ;;  %s3044_s27 = sand.u32 7, %s8080_s0  }
 0x2c4   :  { %s3045_s28 = smul.u32 24, %s3043_s26 }
 0x2c6   :  { %s3046_s14 = sadd.s32 %s3045_s28, %s3044_s27 }
 0x2c7   :  { %s3047_s16 = scalar_lea.vmem %s9643_s1, %s3046_s14 }
 0x2c8   :  { %v3067_v20 = vld [vmem:[%s3047_s16] sm:$0x1]  ;;  %v3069_v21 = vld [vmem:[%s3047_s16 + $0x8] sm:$0x1]  ;;  %v3071_v22 = vld [vmem:[%s3047_s16 + $0x10] sm:$0x1] }
 0x2c9   :  { %3068 = vst [vmem:[#allocation2 + $0x91] sm:$0x1] %v3067_v20  ;;  %3070 = vst [vmem:[#allocation2 + $0x99] sm:$0x1] %v3069_v21 }
 0x2ca   :  { %3072 = vst [vmem:[#allocation2 + $0xa1] sm:$0x1] %v3071_v22 }
 0x2cb   :  { %3102 = vsyncadd [#allocation3], 48  ;;  %s8081_s17 = sld [smem:[#allocation5 + $0x32]] }
 0x2d1   :  { %s3104_s18 = sshrl.u32 %s8081_s17, 3  ;;  %s3105_s19 = sand.u32 7, %s8081_s17  }
 0x2d2   :  { %s3106_s20 = smul.u32 24, %s3104_s18 }
 0x2d4   :  { %s3107_s21 = sadd.s32 %s3106_s20, %s3105_s19 }
 0x2d5   :  { %s3108_s24 = scalar_lea.vmem %s9643_s1, %s3107_s21 }
 0x2d6   :  { %v3128_v23 = vld [vmem:[%s3108_s24] sm:$0x1]  ;;  %v3130_v24 = vld [vmem:[%s3108_s24 + $0x8] sm:$0x1]  ;;  %v3132_v25 = vld [vmem:[%s3108_s24 + $0x10] sm:$0x1] }
 0x2d7   :  { %3129 = vst [vmem:[#allocation2 + $0x92] sm:$0x1] %v3128_v23  ;;  %3131 = vst [vmem:[#allocation2 + $0x9a] sm:$0x1] %v3130_v24 }
 0x2d8   :  { %3133 = vst [vmem:[#allocation2 + $0xa2] sm:$0x1] %v3132_v25 }
 0x2d9   :  { %3163 = vsyncadd [#allocation3], 48  ;;  %s8082_s25 = sld [smem:[#allocation5 + $0x33]] }
 0x2df   :  { %s3165_s0 = sshrl.u32 %s8082_s25, 3  ;;  %s3166_s26 = sand.u32 7, %s8082_s25  }
 0x2e0   :  { %s3167_s27 = smul.u32 24, %s3165_s0 }
 0x2e2   :  { %s3168_s28 = sadd.s32 %s3167_s27, %s3166_s26 }
 0x2e3   :  { %s3169_s30 = scalar_lea.vmem %s9643_s1, %s3168_s28 }
 0x2e4   :  { %v3189_v26 = vld [vmem:[%s3169_s30] sm:$0x1]  ;;  %v3191_v27 = vld [vmem:[%s3169_s30 + $0x8] sm:$0x1]  ;;  %v3193_v28 = vld [vmem:[%s3169_s30 + $0x10] sm:$0x1] }
 0x2e5   :  { %3190 = vst [vmem:[#allocation2 + $0x93] sm:$0x1] %v3189_v26  ;;  %3192 = vst [vmem:[#allocation2 + $0x9b] sm:$0x1] %v3191_v27 }
 0x2e6   :  { %3194 = vst [vmem:[#allocation2 + $0xa3] sm:$0x1] %v3193_v28 }
 0x2e7   :  { %3224 = vsyncadd [#allocation3], 48  ;;  %s8083_s16 = sld [smem:[#allocation5 + $0x34]] }
 0x2ed   :  { %s3226_s17 = sshrl.u32 %s8083_s16, 3  ;;  %s3227_s18 = sand.u32 7, %s8083_s16  }
 0x2ee   :  { %s3228_s19 = smul.u32 24, %s3226_s17 }
 0x2f0   :  { %s3229_s20 = sadd.s32 %s3228_s19, %s3227_s18 }
 0x2f1   :  { %s3230_s23 = scalar_lea.vmem %s9643_s1, %s3229_s20 }
 0x2f2   :  { %v3250_v29 = vld [vmem:[%s3230_s23] sm:$0x1]  ;;  %v3252_v30 = vld [vmem:[%s3230_s23 + $0x8] sm:$0x1]  ;;  %v3254_v31 = vld [vmem:[%s3230_s23 + $0x10] sm:$0x1] }
 0x2f3   :  { %3251 = vst [vmem:[#allocation2 + $0x94] sm:$0x1] %v3250_v29  ;;  %3253 = vst [vmem:[#allocation2 + $0x9c] sm:$0x1] %v3252_v30 }
 0x2f4   :  { %3255 = vst [vmem:[#allocation2 + $0xa4] sm:$0x1] %v3254_v31 }
 0x2f5   :  { %3285 = vsyncadd [#allocation3], 48  ;;  %s8084_s24 = sld [smem:[#allocation5 + $0x35]] }
 0x2fb   :  { %s3287_s25 = sshrl.u32 %s8084_s24, 3  ;;  %s3288_s0 = sand.u32 7, %s8084_s24  }
 0x2fc   :  { %s3289_s26 = smul.u32 24, %s3287_s25 }
 0x2fe   :  { %s3290_s27 = sadd.s32 %s3289_s26, %s3288_s0 }
 0x2ff   :  { %s3291_s29 = scalar_lea.vmem %s9643_s1, %s3290_s27 }
 0x300   :  { %v3311_v32 = vld [vmem:[%s3291_s29] sm:$0x1]  ;;  %v3313_v33 = vld [vmem:[%s3291_s29 + $0x8] sm:$0x1]  ;;  %v3315_v34 = vld [vmem:[%s3291_s29 + $0x10] sm:$0x1] }
 0x301   :  { %3312 = vst [vmem:[#allocation2 + $0x95] sm:$0x1] %v3311_v32  ;;  %3314 = vst [vmem:[#allocation2 + $0x9d] sm:$0x1] %v3313_v33 }
 0x302   :  { %3316 = vst [vmem:[#allocation2 + $0xa5] sm:$0x1] %v3315_v34 }
 0x303   :  { %3346 = vsyncadd [#allocation3], 48  ;;  %s8085_s30 = sld [smem:[#allocation5 + $0x36]] }
 0x309   :  { %s3348_s16 = sshrl.u32 %s8085_s30, 3  ;;  %s3349_s17 = sand.u32 7, %s8085_s30  }
 0x30a   :  { %s3350_s18 = smul.u32 24, %s3348_s16 }
 0x30c   :  { %s3351_s19 = sadd.s32 %s3350_s18, %s3349_s17 }
 0x30d   :  { %s3352_s22 = scalar_lea.vmem %s9643_s1, %s3351_s19 }
 0x30e   :  { %v3372_v35 = vld [vmem:[%s3352_s22] sm:$0x1]  ;;  %v3374_v36 = vld [vmem:[%s3352_s22 + $0x8] sm:$0x1]  ;;  %v3376_v37 = vld [vmem:[%s3352_s22 + $0x10] sm:$0x1] }
 0x30f   :  { %3373 = vst [vmem:[#allocation2 + $0x96] sm:$0x1] %v3372_v35  ;;  %3375 = vst [vmem:[#allocation2 + $0x9e] sm:$0x1] %v3374_v36 }
 0x310   :  { %3377 = vst [vmem:[#allocation2 + $0xa6] sm:$0x1] %v3376_v37 }
 0x311   :  { %3407 = vsyncadd [#allocation3], 48  ;;  %s8086_s23 = sld [smem:[#allocation5 + $0x37]] }
 0x317   :  { %s3409_s24 = sshrl.u32 %s8086_s23, 3  ;;  %s3410_s25 = sand.u32 7, %s8086_s23  }
 0x318   :  { %s3411_s0 = smul.u32 24, %s3409_s24 }
 0x31a   :  { %s3412_s26 = sadd.s32 %s3411_s0, %s3410_s25 }
 0x31b   :  { %s3413_s14 = scalar_lea.vmem %s9643_s1, %s3412_s26 }
 0x31c   :  { %v3433_v38 = vld [vmem:[%s3413_s14] sm:$0x1]  ;;  %v3435_v39 = vld [vmem:[%s3413_s14 + $0x8] sm:$0x1]  ;;  %v3437_v40 = vld [vmem:[%s3413_s14 + $0x10] sm:$0x1] }
 0x31d   :  { %3434 = vst [vmem:[#allocation2 + $0x97] sm:$0x1] %v3433_v38  ;;  %3436 = vst [vmem:[#allocation2 + $0x9f] sm:$0x1] %v3435_v39 }
 0x31e   :  { %3438 = vst [vmem:[#allocation2 + $0xa7] sm:$0x1] %v3437_v40 }
 0x31f   :  { %3468 = vsyncadd [#allocation3], 48  ;;  %s8087_s29 = sld [smem:[#allocation5 + $0x38]] }
 0x325   :  { %s3470_s30 = sshrl.u32 %s8087_s29, 3  ;;  %s3471_s16 = sand.u32 7, %s8087_s29  }
 0x326   :  { %s3472_s17 = smul.u32 24, %s3470_s30 }
 0x328   :  { %s3473_s18 = sadd.s32 %s3472_s17, %s3471_s16 }
 0x329   :  { %s3474_s21 = scalar_lea.vmem %s9643_s1, %s3473_s18 }
 0x32a   :  { %v3494_v41 = vld [vmem:[%s3474_s21] sm:$0x1]  ;;  %v3496_v42 = vld [vmem:[%s3474_s21 + $0x8] sm:$0x1]  ;;  %v3498_v43 = vld [vmem:[%s3474_s21 + $0x10] sm:$0x1] }
 0x32b   :  { %3495 = vst [vmem:[#allocation2 + $0xa8] sm:$0x1] %v3494_v41  ;;  %3497 = vst [vmem:[#allocation2 + $0xb0] sm:$0x1] %v3496_v42 }
 0x32c   :  { %3499 = vst [vmem:[#allocation2 + $0xb8] sm:$0x1] %v3498_v43 }
 0x32d   :  { %3529 = vsyncadd [#allocation3], 48  ;;  %s8088_s22 = sld [smem:[#allocation5 + $0x39]] }
 0x333   :  { %s3531_s23 = sshrl.u32 %s8088_s22, 3  ;;  %s3532_s24 = sand.u32 7, %s8088_s22  }
 0x334   :  { %s3533_s25 = smul.u32 24, %s3531_s23 }
 0x336   :  { %s3534_s0 = sadd.s32 %s3533_s25, %s3532_s24 }
 0x337   :  { %s3535_s28 = scalar_lea.vmem %s9643_s1, %s3534_s0 }
 0x338   :  { %v3555_v44 = vld [vmem:[%s3535_s28] sm:$0x1]  ;;  %v3557_v45 = vld [vmem:[%s3535_s28 + $0x8] sm:$0x1]  ;;  %v3559_v46 = vld [vmem:[%s3535_s28 + $0x10] sm:$0x1] }
 0x339   :  { %3556 = vst [vmem:[#allocation2 + $0xa9] sm:$0x1] %v3555_v44  ;;  %3558 = vst [vmem:[#allocation2 + $0xb1] sm:$0x1] %v3557_v45 }
 0x33a   :  { %3560 = vst [vmem:[#allocation2 + $0xb9] sm:$0x1] %v3559_v46 }
 0x33b   :  { %3590 = vsyncadd [#allocation3], 48  ;;  %s8089_s14 = sld [smem:[#allocation5 + $0x3a]] }
 0x341   :  { %s3592_s29 = sshrl.u32 %s8089_s14, 3  ;;  %s3593_s30 = sand.u32 7, %s8089_s14  }
 0x342   :  { %s3594_s16 = smul.u32 24, %s3592_s29 }
 0x344   :  { %s3595_s17 = sadd.s32 %s3594_s16, %s3593_s30 }
 0x345   :  { %s3596_s20 = scalar_lea.vmem %s9643_s1, %s3595_s17 }
 0x346   :  { %v3616_v47 = vld [vmem:[%s3596_s20] sm:$0x1]  ;;  %v3618_v48 = vld [vmem:[%s3596_s20 + $0x8] sm:$0x1]  ;;  %v3620_v49 = vld [vmem:[%s3596_s20 + $0x10] sm:$0x1] }
 0x347   :  { %3617 = vst [vmem:[#allocation2 + $0xaa] sm:$0x1] %v3616_v47  ;;  %3619 = vst [vmem:[#allocation2 + $0xb2] sm:$0x1] %v3618_v48 }
 0x348   :  { %3621 = vst [vmem:[#allocation2 + $0xba] sm:$0x1] %v3620_v49 }
 0x349   :  { %3651 = vsyncadd [#allocation3], 48  ;;  %s8090_s21 = sld [smem:[#allocation5 + $0x3b]] }
 0x34f   :  { %s3653_s22 = sshrl.u32 %s8090_s21, 3  ;;  %s3654_s23 = sand.u32 7, %s8090_s21  }
 0x350   :  { %s3655_s24 = smul.u32 24, %s3653_s22 }
 0x352   :  { %s3656_s25 = sadd.s32 %s3655_s24, %s3654_s23 }
 0x353   :  { %s3657_s27 = scalar_lea.vmem %s9643_s1, %s3656_s25 }
 0x354   :  { %v3677_v50 = vld [vmem:[%s3657_s27] sm:$0x1]  ;;  %v3679_v51 = vld [vmem:[%s3657_s27 + $0x8] sm:$0x1]  ;;  %v3681_v52 = vld [vmem:[%s3657_s27 + $0x10] sm:$0x1] }
 0x355   :  { %3678 = vst [vmem:[#allocation2 + $0xab] sm:$0x1] %v3677_v50  ;;  %3680 = vst [vmem:[#allocation2 + $0xb3] sm:$0x1] %v3679_v51 }
 0x356   :  { %3682 = vst [vmem:[#allocation2 + $0xbb] sm:$0x1] %v3681_v52 }
 0x357   :  { %3712 = vsyncadd [#allocation3], 48  ;;  %s8091_s28 = sld [smem:[#allocation5 + $0x3c]] }
 0x35d   :  { %s3714_s14 = sshrl.u32 %s8091_s28, 3  ;;  %s3715_s29 = sand.u32 7, %s8091_s28  }
 0x35e   :  { %s3716_s30 = smul.u32 24, %s3714_s14 }
 0x360   :  { %s3717_s16 = sadd.s32 %s3716_s30, %s3715_s29 }
 0x361   :  { %s3718_s19 = scalar_lea.vmem %s9643_s1, %s3717_s16 }
 0x362   :  { %v3738_v53 = vld [vmem:[%s3718_s19] sm:$0x1]  ;;  %v3740_v54 = vld [vmem:[%s3718_s19 + $0x8] sm:$0x1]  ;;  %v3742_v55 = vld [vmem:[%s3718_s19 + $0x10] sm:$0x1] }
 0x363   :  { %3739 = vst [vmem:[#allocation2 + $0xac] sm:$0x1] %v3738_v53  ;;  %3741 = vst [vmem:[#allocation2 + $0xb4] sm:$0x1] %v3740_v54 }
 0x364   :  { %3743 = vst [vmem:[#allocation2 + $0xbc] sm:$0x1] %v3742_v55 }
 0x365   :  { %3773 = vsyncadd [#allocation3], 48  ;;  %s8092_s20 = sld [smem:[#allocation5 + $0x3d]] }
 0x36b   :  { %s3775_s21 = sshrl.u32 %s8092_s20, 3  ;;  %s3776_s22 = sand.u32 7, %s8092_s20  }
 0x36c   :  { %s3777_s23 = smul.u32 24, %s3775_s21 }
 0x36e   :  { %s3778_s24 = sadd.s32 %s3777_s23, %s3776_s22 }
 0x36f   :  { %s3779_s26 = scalar_lea.vmem %s9643_s1, %s3778_s24 }
 0x370   :  { %v3799_v56 = vld [vmem:[%s3779_s26] sm:$0x1]  ;;  %v3801_v57 = vld [vmem:[%s3779_s26 + $0x8] sm:$0x1]  ;;  %v3803_v58 = vld [vmem:[%s3779_s26 + $0x10] sm:$0x1] }
 0x371   :  { %3800 = vst [vmem:[#allocation2 + $0xad] sm:$0x1] %v3799_v56  ;;  %3802 = vst [vmem:[#allocation2 + $0xb5] sm:$0x1] %v3801_v57 }
 0x372   :  { %3804 = vst [vmem:[#allocation2 + $0xbd] sm:$0x1] %v3803_v58 }
 0x373   :  { %3834 = vsyncadd [#allocation3], 48  ;;  %s8093_s27 = sld [smem:[#allocation5 + $0x3e]] }
 0x379   :  { %s3836_s28 = sshrl.u32 %s8093_s27, 3  ;;  %s3837_s14 = sand.u32 7, %s8093_s27  }
 0x37a   :  { %s3838_s29 = smul.u32 24, %s3836_s28 }
 0x37c   :  { %s3839_s30 = sadd.s32 %s3838_s29, %s3837_s14 }
 0x37d   :  { %s3840_s18 = scalar_lea.vmem %s9643_s1, %s3839_s30 }
 0x37e   :  { %v3860_v59 = vld [vmem:[%s3840_s18] sm:$0x1]  ;;  %v3862_v60 = vld [vmem:[%s3840_s18 + $0x8] sm:$0x1]  ;;  %v3864_v61 = vld [vmem:[%s3840_s18 + $0x10] sm:$0x1] }
 0x37f   :  { %3861 = vst [vmem:[#allocation2 + $0xae] sm:$0x1] %v3860_v59  ;;  %3863 = vst [vmem:[#allocation2 + $0xb6] sm:$0x1] %v3862_v60 }
 0x380   :  { %3865 = vst [vmem:[#allocation2 + $0xbe] sm:$0x1] %v3864_v61 }
 0x381   :  { %3895 = vsyncadd [#allocation3], 48  ;;  %s8094_s19 = sld [smem:[#allocation5 + $0x3f]] }
 0x387   :  { %s3897_s20 = sshrl.u32 %s8094_s19, 3  ;;  %s3898_s21 = sand.u32 7, %s8094_s19  }
 0x388   :  { %s3899_s22 = smul.u32 24, %s3897_s20 }
 0x38a   :  { %s3900_s23 = sadd.s32 %s3899_s22, %s3898_s21 }
 0x38b   :  { %s3901_s0 = scalar_lea.vmem %s9643_s1, %s3900_s23 }
 0x38c   :  { %v3921_v62 = vld [vmem:[%s3901_s0] sm:$0x1]  ;;  %v3923_v63 = vld [vmem:[%s3901_s0 + $0x8] sm:$0x1]  ;;  %v3925_v0 = vld [vmem:[%s3901_s0 + $0x10] sm:$0x1] }
 0x38d   :  { %3922 = vst [vmem:[#allocation2 + $0xaf] sm:$0x1] %v3921_v62  ;;  %3924 = vst [vmem:[#allocation2 + $0xb7] sm:$0x1] %v3923_v63 }
 0x38e   :  { %3926 = vst [vmem:[#allocation2 + $0xbf] sm:$0x1] %v3925_v0 }
 0x38f   :  { %3956 = vsyncadd [#allocation3], 48  ;;  %s8095_s26 = sld [smem:[#allocation5 + $0x40]] }
 0x395   :  { %s3958_s27 = sshrl.u32 %s8095_s26, 3  ;;  %s3959_s28 = sand.u32 7, %s8095_s26  }
 0x396   :  { %s3960_s14 = smul.u32 24, %s3958_s27 }
 0x398   :  { %s3961_s29 = sadd.s32 %s3960_s14, %s3959_s28 }
 0x399   :  { %s3962_s17 = scalar_lea.vmem %s9643_s1, %s3961_s29 }
 0x39a   :  { %v3982_v1 = vld [vmem:[%s3962_s17] sm:$0x1]  ;;  %v3984_v2 = vld [vmem:[%s3962_s17 + $0x8] sm:$0x1]  ;;  %v3986_v3 = vld [vmem:[%s3962_s17 + $0x10] sm:$0x1] }
 0x39b   :  { %3983 = vst [vmem:[#allocation2 + $0xc0] sm:$0x1] %v3982_v1  ;;  %3985 = vst [vmem:[#allocation2 + $0xc8] sm:$0x1] %v3984_v2 }
 0x39c   :  { %3987 = vst [vmem:[#allocation2 + $0xd0] sm:$0x1] %v3986_v3 }
 0x39d   :  { %4017 = vsyncadd [#allocation3], 48  ;;  %s8096_s18 = sld [smem:[#allocation5 + $0x41]] }
 0x3a3   :  { %s4019_s19 = sshrl.u32 %s8096_s18, 3  ;;  %s4020_s20 = sand.u32 7, %s8096_s18  }
 0x3a4   :  { %s4021_s21 = smul.u32 24, %s4019_s19 }
 0x3a6   :  { %s4022_s22 = sadd.s32 %s4021_s21, %s4020_s20 }
 0x3a7   :  { %s4023_s25 = scalar_lea.vmem %s9643_s1, %s4022_s22 }
 0x3a8   :  { %v4043_v4 = vld [vmem:[%s4023_s25] sm:$0x1]  ;;  %v4045_v5 = vld [vmem:[%s4023_s25 + $0x8] sm:$0x1]  ;;  %v4047_v6 = vld [vmem:[%s4023_s25 + $0x10] sm:$0x1] }
 0x3a9   :  { %4044 = vst [vmem:[#allocation2 + $0xc1] sm:$0x1] %v4043_v4  ;;  %4046 = vst [vmem:[#allocation2 + $0xc9] sm:$0x1] %v4045_v5 }
 0x3aa   :  { %4048 = vst [vmem:[#allocation2 + $0xd1] sm:$0x1] %v4047_v6 }
 0x3ab   :  { %4078 = vsyncadd [#allocation3], 48  ;;  %s8097_s0 = sld [smem:[#allocation5 + $0x42]] }
 0x3b1   :  { %s4080_s26 = sshrl.u32 %s8097_s0, 3  ;;  %s4081_s27 = sand.u32 7, %s8097_s0  }
 0x3b2   :  { %s4082_s28 = smul.u32 24, %s4080_s26 }
 0x3b4   :  { %s4083_s14 = sadd.s32 %s4082_s28, %s4081_s27 }
 0x3b5   :  { %s4084_s16 = scalar_lea.vmem %s9643_s1, %s4083_s14 }
 0x3b6   :  { %v4104_v7 = vld [vmem:[%s4084_s16] sm:$0x1]  ;;  %v4106_v8 = vld [vmem:[%s4084_s16 + $0x8] sm:$0x1]  ;;  %v4108_v9 = vld [vmem:[%s4084_s16 + $0x10] sm:$0x1] }
 0x3b7   :  { %4105 = vst [vmem:[#allocation2 + $0xc2] sm:$0x1] %v4104_v7  ;;  %4107 = vst [vmem:[#allocation2 + $0xca] sm:$0x1] %v4106_v8 }
 0x3b8   :  { %4109 = vst [vmem:[#allocation2 + $0xd2] sm:$0x1] %v4108_v9 }
 0x3b9   :  { %4139 = vsyncadd [#allocation3], 48  ;;  %s8098_s17 = sld [smem:[#allocation5 + $0x43]] }
 0x3bf   :  { %s4141_s18 = sshrl.u32 %s8098_s17, 3  ;;  %s4142_s19 = sand.u32 7, %s8098_s17  }
 0x3c0   :  { %s4143_s20 = smul.u32 24, %s4141_s18 }
 0x3c2   :  { %s4144_s21 = sadd.s32 %s4143_s20, %s4142_s19 }
 0x3c3   :  { %s4145_s24 = scalar_lea.vmem %s9643_s1, %s4144_s21 }
 0x3c4   :  { %v4165_v10 = vld [vmem:[%s4145_s24] sm:$0x1]  ;;  %v4167_v11 = vld [vmem:[%s4145_s24 + $0x8] sm:$0x1]  ;;  %v4169_v12 = vld [vmem:[%s4145_s24 + $0x10] sm:$0x1] }
 0x3c5   :  { %4166 = vst [vmem:[#allocation2 + $0xc3] sm:$0x1] %v4165_v10  ;;  %4168 = vst [vmem:[#allocation2 + $0xcb] sm:$0x1] %v4167_v11 }
 0x3c6   :  { %4170 = vst [vmem:[#allocation2 + $0xd3] sm:$0x1] %v4169_v12 }
 0x3c7   :  { %4200 = vsyncadd [#allocation3], 48  ;;  %s8099_s25 = sld [smem:[#allocation5 + $0x44]] }
 0x3cd   :  { %s4202_s0 = sshrl.u32 %s8099_s25, 3  ;;  %s4203_s26 = sand.u32 7, %s8099_s25  }
 0x3ce   :  { %s4204_s27 = smul.u32 24, %s4202_s0 }
 0x3d0   :  { %s4205_s28 = sadd.s32 %s4204_s27, %s4203_s26 }
 0x3d1   :  { %s4206_s30 = scalar_lea.vmem %s9643_s1, %s4205_s28 }
 0x3d2   :  { %v4226_v13 = vld [vmem:[%s4206_s30] sm:$0x1]  ;;  %v4228_v14 = vld [vmem:[%s4206_s30 + $0x8] sm:$0x1]  ;;  %v4230_v15 = vld [vmem:[%s4206_s30 + $0x10] sm:$0x1] }
 0x3d3   :  { %4227 = vst [vmem:[#allocation2 + $0xc4] sm:$0x1] %v4226_v13  ;;  %4229 = vst [vmem:[#allocation2 + $0xcc] sm:$0x1] %v4228_v14 }
 0x3d4   :  { %4231 = vst [vmem:[#allocation2 + $0xd4] sm:$0x1] %v4230_v15 }
 0x3d5   :  { %4261 = vsyncadd [#allocation3], 48  ;;  %s8100_s16 = sld [smem:[#allocation5 + $0x45]] }
 0x3db   :  { %s4263_s17 = sshrl.u32 %s8100_s16, 3  ;;  %s4264_s18 = sand.u32 7, %s8100_s16  }
 0x3dc   :  { %s4265_s19 = smul.u32 24, %s4263_s17 }
 0x3de   :  { %s4266_s20 = sadd.s32 %s4265_s19, %s4264_s18 }
 0x3df   :  { %s4267_s23 = scalar_lea.vmem %s9643_s1, %s4266_s20 }
 0x3e0   :  { %v4287_v16 = vld [vmem:[%s4267_s23] sm:$0x1]  ;;  %v4289_v17 = vld [vmem:[%s4267_s23 + $0x8] sm:$0x1]  ;;  %v4291_v18 = vld [vmem:[%s4267_s23 + $0x10] sm:$0x1] }
 0x3e1   :  { %4288 = vst [vmem:[#allocation2 + $0xc5] sm:$0x1] %v4287_v16  ;;  %4290 = vst [vmem:[#allocation2 + $0xcd] sm:$0x1] %v4289_v17 }
 0x3e2   :  { %4292 = vst [vmem:[#allocation2 + $0xd5] sm:$0x1] %v4291_v18 }
 0x3e3   :  { %4322 = vsyncadd [#allocation3], 48  ;;  %s8101_s24 = sld [smem:[#allocation5 + $0x46]] }
 0x3e9   :  { %s4324_s25 = sshrl.u32 %s8101_s24, 3  ;;  %s4325_s0 = sand.u32 7, %s8101_s24  }
 0x3ea   :  { %s4326_s26 = smul.u32 24, %s4324_s25 }
 0x3ec   :  { %s4327_s27 = sadd.s32 %s4326_s26, %s4325_s0 }
 0x3ed   :  { %s4328_s29 = scalar_lea.vmem %s9643_s1, %s4327_s27 }
 0x3ee   :  { %v4348_v19 = vld [vmem:[%s4328_s29] sm:$0x1]  ;;  %v4350_v20 = vld [vmem:[%s4328_s29 + $0x8] sm:$0x1]  ;;  %v4352_v21 = vld [vmem:[%s4328_s29 + $0x10] sm:$0x1] }
 0x3ef   :  { %4349 = vst [vmem:[#allocation2 + $0xc6] sm:$0x1] %v4348_v19  ;;  %4351 = vst [vmem:[#allocation2 + $0xce] sm:$0x1] %v4350_v20 }
 0x3f0   :  { %4353 = vst [vmem:[#allocation2 + $0xd6] sm:$0x1] %v4352_v21 }
 0x3f1   :  { %4383 = vsyncadd [#allocation3], 48  ;;  %s8102_s30 = sld [smem:[#allocation5 + $0x47]] }
 0x3f7   :  { %s4385_s16 = sshrl.u32 %s8102_s30, 3  ;;  %s4386_s17 = sand.u32 7, %s8102_s30  }
 0x3f8   :  { %s4387_s18 = smul.u32 24, %s4385_s16 }
 0x3fa   :  { %s4388_s19 = sadd.s32 %s4387_s18, %s4386_s17 }
 0x3fb   :  { %s4389_s22 = scalar_lea.vmem %s9643_s1, %s4388_s19 }
 0x3fc   :  { %v4409_v22 = vld [vmem:[%s4389_s22] sm:$0x1]  ;;  %v4411_v23 = vld [vmem:[%s4389_s22 + $0x8] sm:$0x1]  ;;  %v4413_v24 = vld [vmem:[%s4389_s22 + $0x10] sm:$0x1] }
 0x3fd   :  { %4410 = vst [vmem:[#allocation2 + $0xc7] sm:$0x1] %v4409_v22  ;;  %4412 = vst [vmem:[#allocation2 + $0xcf] sm:$0x1] %v4411_v23 }
 0x3fe   :  { %4414 = vst [vmem:[#allocation2 + $0xd7] sm:$0x1] %v4413_v24 }
 0x3ff   :  { %4444 = vsyncadd [#allocation3], 48  ;;  %s8103_s23 = sld [smem:[#allocation5 + $0x48]] }
 0x405   :  { %s4446_s24 = sshrl.u32 %s8103_s23, 3  ;;  %s4447_s25 = sand.u32 7, %s8103_s23  }
 0x406   :  { %s4448_s0 = smul.u32 24, %s4446_s24 }
 0x408   :  { %s4449_s26 = sadd.s32 %s4448_s0, %s4447_s25 }
 0x409   :  { %s4450_s14 = scalar_lea.vmem %s9643_s1, %s4449_s26 }
 0x40a   :  { %v4470_v25 = vld [vmem:[%s4450_s14] sm:$0x1]  ;;  %v4472_v26 = vld [vmem:[%s4450_s14 + $0x8] sm:$0x1]  ;;  %v4474_v27 = vld [vmem:[%s4450_s14 + $0x10] sm:$0x1] }
 0x40b   :  { %4471 = vst [vmem:[#allocation2 + $0xd8] sm:$0x1] %v4470_v25  ;;  %4473 = vst [vmem:[#allocation2 + $0xe0] sm:$0x1] %v4472_v26 }
 0x40c   :  { %4475 = vst [vmem:[#allocation2 + $0xe8] sm:$0x1] %v4474_v27 }
 0x40d   :  { %4505 = vsyncadd [#allocation3], 48  ;;  %s8104_s29 = sld [smem:[#allocation5 + $0x49]] }
 0x413   :  { %s4507_s30 = sshrl.u32 %s8104_s29, 3  ;;  %s4508_s16 = sand.u32 7, %s8104_s29  }
 0x414   :  { %s4509_s17 = smul.u32 24, %s4507_s30 }
 0x416   :  { %s4510_s18 = sadd.s32 %s4509_s17, %s4508_s16 }
 0x417   :  { %s4511_s21 = scalar_lea.vmem %s9643_s1, %s4510_s18 }
 0x418   :  { %v4531_v28 = vld [vmem:[%s4511_s21] sm:$0x1]  ;;  %v4533_v29 = vld [vmem:[%s4511_s21 + $0x8] sm:$0x1]  ;;  %v4535_v30 = vld [vmem:[%s4511_s21 + $0x10] sm:$0x1] }
 0x419   :  { %4532 = vst [vmem:[#allocation2 + $0xd9] sm:$0x1] %v4531_v28  ;;  %4534 = vst [vmem:[#allocation2 + $0xe1] sm:$0x1] %v4533_v29 }
 0x41a   :  { %4536 = vst [vmem:[#allocation2 + $0xe9] sm:$0x1] %v4535_v30 }
 0x41b   :  { %4566 = vsyncadd [#allocation3], 48  ;;  %s8105_s22 = sld [smem:[#allocation5 + $0x4a]] }
 0x421   :  { %s4568_s23 = sshrl.u32 %s8105_s22, 3  ;;  %s4569_s24 = sand.u32 7, %s8105_s22  }
 0x422   :  { %s4570_s25 = smul.u32 24, %s4568_s23 }
 0x424   :  { %s4571_s0 = sadd.s32 %s4570_s25, %s4569_s24 }
 0x425   :  { %s4572_s28 = scalar_lea.vmem %s9643_s1, %s4571_s0 }
 0x426   :  { %v4592_v31 = vld [vmem:[%s4572_s28] sm:$0x1]  ;;  %v4594_v32 = vld [vmem:[%s4572_s28 + $0x8] sm:$0x1]  ;;  %v4596_v33 = vld [vmem:[%s4572_s28 + $0x10] sm:$0x1] }
 0x427   :  { %4593 = vst [vmem:[#allocation2 + $0xda] sm:$0x1] %v4592_v31  ;;  %4595 = vst [vmem:[#allocation2 + $0xe2] sm:$0x1] %v4594_v32 }
 0x428   :  { %4597 = vst [vmem:[#allocation2 + $0xea] sm:$0x1] %v4596_v33 }
 0x429   :  { %4627 = vsyncadd [#allocation3], 48  ;;  %s8106_s14 = sld [smem:[#allocation5 + $0x4b]] }
 0x42f   :  { %s4629_s29 = sshrl.u32 %s8106_s14, 3  ;;  %s4630_s30 = sand.u32 7, %s8106_s14  }
 0x430   :  { %s4631_s16 = smul.u32 24, %s4629_s29 }
 0x432   :  { %s4632_s17 = sadd.s32 %s4631_s16, %s4630_s30 }
 0x433   :  { %s4633_s20 = scalar_lea.vmem %s9643_s1, %s4632_s17 }
 0x434   :  { %v4653_v34 = vld [vmem:[%s4633_s20] sm:$0x1]  ;;  %v4655_v35 = vld [vmem:[%s4633_s20 + $0x8] sm:$0x1]  ;;  %v4657_v36 = vld [vmem:[%s4633_s20 + $0x10] sm:$0x1] }
 0x435   :  { %4654 = vst [vmem:[#allocation2 + $0xdb] sm:$0x1] %v4653_v34  ;;  %4656 = vst [vmem:[#allocation2 + $0xe3] sm:$0x1] %v4655_v35 }
 0x436   :  { %4658 = vst [vmem:[#allocation2 + $0xeb] sm:$0x1] %v4657_v36 }
 0x437   :  { %4688 = vsyncadd [#allocation3], 48  ;;  %s8107_s21 = sld [smem:[#allocation5 + $0x4c]] }
 0x43d   :  { %s4690_s22 = sshrl.u32 %s8107_s21, 3  ;;  %s4691_s23 = sand.u32 7, %s8107_s21  }
 0x43e   :  { %s4692_s24 = smul.u32 24, %s4690_s22 }
 0x440   :  { %s4693_s25 = sadd.s32 %s4692_s24, %s4691_s23 }
 0x441   :  { %s4694_s27 = scalar_lea.vmem %s9643_s1, %s4693_s25 }
 0x442   :  { %v4714_v37 = vld [vmem:[%s4694_s27] sm:$0x1]  ;;  %v4716_v38 = vld [vmem:[%s4694_s27 + $0x8] sm:$0x1]  ;;  %v4718_v39 = vld [vmem:[%s4694_s27 + $0x10] sm:$0x1] }
 0x443   :  { %4715 = vst [vmem:[#allocation2 + $0xdc] sm:$0x1] %v4714_v37  ;;  %4717 = vst [vmem:[#allocation2 + $0xe4] sm:$0x1] %v4716_v38 }
 0x444   :  { %4719 = vst [vmem:[#allocation2 + $0xec] sm:$0x1] %v4718_v39 }
 0x445   :  { %4749 = vsyncadd [#allocation3], 48  ;;  %s8108_s28 = sld [smem:[#allocation5 + $0x4d]] }
 0x44b   :  { %s4751_s14 = sshrl.u32 %s8108_s28, 3  ;;  %s4752_s29 = sand.u32 7, %s8108_s28  }
 0x44c   :  { %s4753_s30 = smul.u32 24, %s4751_s14 }
 0x44e   :  { %s4754_s16 = sadd.s32 %s4753_s30, %s4752_s29 }
 0x44f   :  { %s4755_s19 = scalar_lea.vmem %s9643_s1, %s4754_s16 }
 0x450   :  { %v4775_v40 = vld [vmem:[%s4755_s19] sm:$0x1]  ;;  %v4777_v41 = vld [vmem:[%s4755_s19 + $0x8] sm:$0x1]  ;;  %v4779_v42 = vld [vmem:[%s4755_s19 + $0x10] sm:$0x1] }
 0x451   :  { %4776 = vst [vmem:[#allocation2 + $0xdd] sm:$0x1] %v4775_v40  ;;  %4778 = vst [vmem:[#allocation2 + $0xe5] sm:$0x1] %v4777_v41 }
 0x452   :  { %4780 = vst [vmem:[#allocation2 + $0xed] sm:$0x1] %v4779_v42 }
 0x453   :  { %4810 = vsyncadd [#allocation3], 48  ;;  %s8109_s20 = sld [smem:[#allocation5 + $0x4e]] }
 0x459   :  { %s4812_s21 = sshrl.u32 %s8109_s20, 3  ;;  %s4813_s22 = sand.u32 7, %s8109_s20  }
 0x45a   :  { %s4814_s23 = smul.u32 24, %s4812_s21 }
 0x45c   :  { %s4815_s24 = sadd.s32 %s4814_s23, %s4813_s22 }
 0x45d   :  { %s4816_s26 = scalar_lea.vmem %s9643_s1, %s4815_s24 }
 0x45e   :  { %v4836_v43 = vld [vmem:[%s4816_s26] sm:$0x1]  ;;  %v4838_v44 = vld [vmem:[%s4816_s26 + $0x8] sm:$0x1]  ;;  %v4840_v45 = vld [vmem:[%s4816_s26 + $0x10] sm:$0x1] }
 0x45f   :  { %4837 = vst [vmem:[#allocation2 + $0xde] sm:$0x1] %v4836_v43  ;;  %4839 = vst [vmem:[#allocation2 + $0xe6] sm:$0x1] %v4838_v44 }
 0x460   :  { %4841 = vst [vmem:[#allocation2 + $0xee] sm:$0x1] %v4840_v45 }
 0x461   :  { %4871 = vsyncadd [#allocation3], 48  ;;  %s8110_s27 = sld [smem:[#allocation5 + $0x4f]] }
 0x467   :  { %s4873_s28 = sshrl.u32 %s8110_s27, 3  ;;  %s4874_s14 = sand.u32 7, %s8110_s27  }
 0x468   :  { %s4875_s29 = smul.u32 24, %s4873_s28 }
 0x46a   :  { %s4876_s30 = sadd.s32 %s4875_s29, %s4874_s14 }
 0x46b   :  { %s4877_s18 = scalar_lea.vmem %s9643_s1, %s4876_s30 }
 0x46c   :  { %v4897_v46 = vld [vmem:[%s4877_s18] sm:$0x1]  ;;  %v4899_v47 = vld [vmem:[%s4877_s18 + $0x8] sm:$0x1]  ;;  %v4901_v48 = vld [vmem:[%s4877_s18 + $0x10] sm:$0x1] }
 0x46d   :  { %4898 = vst [vmem:[#allocation2 + $0xdf] sm:$0x1] %v4897_v46  ;;  %4900 = vst [vmem:[#allocation2 + $0xe7] sm:$0x1] %v4899_v47 }
 0x46e   :  { %4902 = vst [vmem:[#allocation2 + $0xef] sm:$0x1] %v4901_v48 }
 0x46f   :  { %4932 = vsyncadd [#allocation3], 48  ;;  %s8111_s19 = sld [smem:[#allocation5 + $0x50]] }
 0x475   :  { %s4934_s20 = sshrl.u32 %s8111_s19, 3  ;;  %s4935_s21 = sand.u32 7, %s8111_s19  }
 0x476   :  { %s4936_s22 = smul.u32 24, %s4934_s20 }
 0x478   :  { %s4937_s23 = sadd.s32 %s4936_s22, %s4935_s21 }
 0x479   :  { %s4938_s0 = scalar_lea.vmem %s9643_s1, %s4937_s23 }
 0x47a   :  { %v4958_v49 = vld [vmem:[%s4938_s0] sm:$0x1]  ;;  %v4960_v50 = vld [vmem:[%s4938_s0 + $0x8] sm:$0x1]  ;;  %v4962_v51 = vld [vmem:[%s4938_s0 + $0x10] sm:$0x1] }
 0x47b   :  { %4959 = vst [vmem:[#allocation2 + $0xf0] sm:$0x1] %v4958_v49  ;;  %4961 = vst [vmem:[#allocation2 + $0xf8] sm:$0x1] %v4960_v50 }
 0x47c   :  { %4963 = vst [vmem:[#allocation2 + $0x100] sm:$0x1] %v4962_v51 }
 0x47d   :  { %4993 = vsyncadd [#allocation3], 48  ;;  %s8112_s26 = sld [smem:[#allocation5 + $0x51]] }
 0x483   :  { %s4995_s27 = sshrl.u32 %s8112_s26, 3  ;;  %s4996_s28 = sand.u32 7, %s8112_s26  }
 0x484   :  { %s4997_s14 = smul.u32 24, %s4995_s27 }
 0x486   :  { %s4998_s29 = sadd.s32 %s4997_s14, %s4996_s28 }
 0x487   :  { %s4999_s17 = scalar_lea.vmem %s9643_s1, %s4998_s29 }
 0x488   :  { %v5019_v52 = vld [vmem:[%s4999_s17] sm:$0x1]  ;;  %v5021_v53 = vld [vmem:[%s4999_s17 + $0x8] sm:$0x1]  ;;  %v5023_v54 = vld [vmem:[%s4999_s17 + $0x10] sm:$0x1] }
 0x489   :  { %5020 = vst [vmem:[#allocation2 + $0xf1] sm:$0x1] %v5019_v52  ;;  %5022 = vst [vmem:[#allocation2 + $0xf9] sm:$0x1] %v5021_v53 }
 0x48a   :  { %5024 = vst [vmem:[#allocation2 + $0x101] sm:$0x1] %v5023_v54 }
 0x48b   :  { %5054 = vsyncadd [#allocation3], 48  ;;  %s8113_s18 = sld [smem:[#allocation5 + $0x52]] }
 0x491   :  { %s5056_s19 = sshrl.u32 %s8113_s18, 3  ;;  %s5057_s20 = sand.u32 7, %s8113_s18  }
 0x492   :  { %s5058_s21 = smul.u32 24, %s5056_s19 }
 0x494   :  { %s5059_s22 = sadd.s32 %s5058_s21, %s5057_s20 }
 0x495   :  { %s5060_s25 = scalar_lea.vmem %s9643_s1, %s5059_s22 }
 0x496   :  { %v5080_v55 = vld [vmem:[%s5060_s25] sm:$0x1]  ;;  %v5082_v56 = vld [vmem:[%s5060_s25 + $0x8] sm:$0x1]  ;;  %v5084_v57 = vld [vmem:[%s5060_s25 + $0x10] sm:$0x1] }
 0x497   :  { %5081 = vst [vmem:[#allocation2 + $0xf2] sm:$0x1] %v5080_v55  ;;  %5083 = vst [vmem:[#allocation2 + $0xfa] sm:$0x1] %v5082_v56 }
 0x498   :  { %5085 = vst [vmem:[#allocation2 + $0x102] sm:$0x1] %v5084_v57 }
 0x499   :  { %5115 = vsyncadd [#allocation3], 48  ;;  %s8114_s0 = sld [smem:[#allocation5 + $0x53]] }
 0x49f   :  { %s5117_s26 = sshrl.u32 %s8114_s0, 3  ;;  %s5118_s27 = sand.u32 7, %s8114_s0  }
 0x4a0   :  { %s5119_s28 = smul.u32 24, %s5117_s26 }
 0x4a2   :  { %s5120_s14 = sadd.s32 %s5119_s28, %s5118_s27 }
 0x4a3   :  { %s5121_s16 = scalar_lea.vmem %s9643_s1, %s5120_s14 }
 0x4a4   :  { %v5141_v58 = vld [vmem:[%s5121_s16] sm:$0x1]  ;;  %v5143_v59 = vld [vmem:[%s5121_s16 + $0x8] sm:$0x1]  ;;  %v5145_v60 = vld [vmem:[%s5121_s16 + $0x10] sm:$0x1] }
 0x4a5   :  { %5142 = vst [vmem:[#allocation2 + $0xf3] sm:$0x1] %v5141_v58  ;;  %5144 = vst [vmem:[#allocation2 + $0xfb] sm:$0x1] %v5143_v59 }
 0x4a6   :  { %5146 = vst [vmem:[#allocation2 + $0x103] sm:$0x1] %v5145_v60 }
 0x4a7   :  { %5176 = vsyncadd [#allocation3], 48  ;;  %s8115_s17 = sld [smem:[#allocation5 + $0x54]] }
 0x4ad   :  { %s5178_s18 = sshrl.u32 %s8115_s17, 3  ;;  %s5179_s19 = sand.u32 7, %s8115_s17  }
 0x4ae   :  { %s5180_s20 = smul.u32 24, %s5178_s18 }
 0x4b0   :  { %s5181_s21 = sadd.s32 %s5180_s20, %s5179_s19 }
 0x4b1   :  { %s5182_s24 = scalar_lea.vmem %s9643_s1, %s5181_s21 }
 0x4b2   :  { %v5202_v61 = vld [vmem:[%s5182_s24] sm:$0x1]  ;;  %v5204_v62 = vld [vmem:[%s5182_s24 + $0x8] sm:$0x1]  ;;  %v5206_v63 = vld [vmem:[%s5182_s24 + $0x10] sm:$0x1] }
 0x4b3   :  { %5203 = vst [vmem:[#allocation2 + $0xf4] sm:$0x1] %v5202_v61  ;;  %5205 = vst [vmem:[#allocation2 + $0xfc] sm:$0x1] %v5204_v62 }
 0x4b4   :  { %5207 = vst [vmem:[#allocation2 + $0x104] sm:$0x1] %v5206_v63 }
 0x4b5   :  { %5237 = vsyncadd [#allocation3], 48  ;;  %s8116_s25 = sld [smem:[#allocation5 + $0x55]] }
 0x4bb   :  { %s5239_s0 = sshrl.u32 %s8116_s25, 3  ;;  %s5240_s26 = sand.u32 7, %s8116_s25  }
 0x4bc   :  { %s5241_s27 = smul.u32 24, %s5239_s0 }
 0x4be   :  { %s5242_s28 = sadd.s32 %s5241_s27, %s5240_s26 }
 0x4bf   :  { %s5243_s30 = scalar_lea.vmem %s9643_s1, %s5242_s28 }
 0x4c0   :  { %v5263_v0 = vld [vmem:[%s5243_s30] sm:$0x1]  ;;  %v5265_v1 = vld [vmem:[%s5243_s30 + $0x8] sm:$0x1]  ;;  %v5267_v2 = vld [vmem:[%s5243_s30 + $0x10] sm:$0x1] }
 0x4c1   :  { %5264 = vst [vmem:[#allocation2 + $0xf5] sm:$0x1] %v5263_v0  ;;  %5266 = vst [vmem:[#allocation2 + $0xfd] sm:$0x1] %v5265_v1 }
 0x4c2   :  { %5268 = vst [vmem:[#allocation2 + $0x105] sm:$0x1] %v5267_v2 }
 0x4c3   :  { %5298 = vsyncadd [#allocation3], 48  ;;  %s8117_s16 = sld [smem:[#allocation5 + $0x56]] }
 0x4c9   :  { %s5300_s17 = sshrl.u32 %s8117_s16, 3  ;;  %s5301_s18 = sand.u32 7, %s8117_s16  }
 0x4ca   :  { %s5302_s19 = smul.u32 24, %s5300_s17 }
 0x4cc   :  { %s5303_s20 = sadd.s32 %s5302_s19, %s5301_s18 }
 0x4cd   :  { %s5304_s23 = scalar_lea.vmem %s9643_s1, %s5303_s20 }
 0x4ce   :  { %v5324_v3 = vld [vmem:[%s5304_s23] sm:$0x1]  ;;  %v5326_v4 = vld [vmem:[%s5304_s23 + $0x8] sm:$0x1]  ;;  %v5328_v5 = vld [vmem:[%s5304_s23 + $0x10] sm:$0x1] }
 0x4cf   :  { %5325 = vst [vmem:[#allocation2 + $0xf6] sm:$0x1] %v5324_v3  ;;  %5327 = vst [vmem:[#allocation2 + $0xfe] sm:$0x1] %v5326_v4 }
 0x4d0   :  { %5329 = vst [vmem:[#allocation2 + $0x106] sm:$0x1] %v5328_v5 }
 0x4d1   :  { %5359 = vsyncadd [#allocation3], 48  ;;  %s8118_s24 = sld [smem:[#allocation5 + $0x57]] }
 0x4d7   :  { %s5361_s25 = sshrl.u32 %s8118_s24, 3  ;;  %s5362_s0 = sand.u32 7, %s8118_s24  }
 0x4d8   :  { %s5363_s26 = smul.u32 24, %s5361_s25 }
 0x4da   :  { %s5364_s27 = sadd.s32 %s5363_s26, %s5362_s0 }
 0x4db   :  { %s5365_s29 = scalar_lea.vmem %s9643_s1, %s5364_s27 }
 0x4dc   :  { %v5385_v6 = vld [vmem:[%s5365_s29] sm:$0x1]  ;;  %v5387_v7 = vld [vmem:[%s5365_s29 + $0x8] sm:$0x1]  ;;  %v5389_v8 = vld [vmem:[%s5365_s29 + $0x10] sm:$0x1] }
 0x4dd   :  { %5386 = vst [vmem:[#allocation2 + $0xf7] sm:$0x1] %v5385_v6  ;;  %5388 = vst [vmem:[#allocation2 + $0xff] sm:$0x1] %v5387_v7 }
 0x4de   :  { %5390 = vst [vmem:[#allocation2 + $0x107] sm:$0x1] %v5389_v8 }
 0x4df   :  { %5420 = vsyncadd [#allocation3], 48 }
 0x4e0   :  { %8599 = dma.done.wait [#allocation3], 4224 }
 0x4e1   :  { %8600 = vsyncadd [#allocation3], 4294963072  ;;  %v9658_v9 = vmov 0.0   ;;  %vm8603_vm0 = vmmov 0   ;;  %v5489_v10 = vld [vmem:[%s9644_s2 + $0xf8] sm:$0xff]  ;;  %v5488_v12 = vld [vmem:[%s9644_s2 + $0xf0] sm:$0xff] }
 0x4e2   :  { %8339 = vmatprep.subr.mxu1 %v9658_v9  ;;  %8351 = vmatprep.mubr.msk.f32.mxu1 %vm8603_vm0, %v9658_v9  ;;  %v5473_v11 = vld [vmem:[%s9644_s2 + $0x78] sm:$0xff]  ;;  %v5472_v13 = vld [vmem:[%s9644_s2 + $0x70] sm:$0xff]  ;;  %v5487_v14 = vld [vmem:[%s9644_s2 + $0xe8] sm:$0xff]  ;;  %vm5530_vm1 = vcmask 1043456   ;;  %vm5496_vm2 = vcmask 359424   ;;  %vm5774_vm3 = vcmask 7168  }
 0x4e3   :  { %8160 = vmatprep.subr.mxu0 %v5489_v10  ;;  %v5471_v15 = vld [vmem:[%s9644_s2 + $0x68] sm:$0xff]  ;;  %v5486_v16 = vld [vmem:[%s9644_s2 + $0xe0] sm:$0xff]  ;;  %v5485_v18 = vld [vmem:[%s9644_s2 + $0xd8] sm:$0xff]  ;;  %vm5840_vm4 = vcmask 719872   ;;  %vm5925_vm5 = vcmask 64512   ;;  %vm6522_vm6 = vcmask 818176  }
 0x4e4   :  { %8161 = vmatpush3.msra.mxu0 %v5473_v11  ;;  %v5470_v17 = vld [vmem:[%s9644_s2 + $0x60] sm:$0xff]  ;;  %v5469_v19 = vld [vmem:[%s9644_s2 + $0x58] sm:$0xff]  ;;  %v5484_v20 = vld [vmem:[%s9644_s2 + $0xd0] sm:$0xff]  ;;  %vm6710_vm7 = vcmask 1040384   ;;  %vm6658_vm8 = vcmask 203776  }
 0x4e5   :  { %8162 = vmatprep.subr.mxu0 %v5488_v12  ;;  %v5495_v21 = vld [vmem:[%s9644_s2 + $0x128] sm:$0xf]  ;;  %v5468_v22 = vld [vmem:[%s9644_s2 + $0x50] sm:$0xff]  ;;  %v5494_v23 = vld [vmem:[%s9644_s2 + $0x120] sm:$0xff] }
 0x4e6   :  { %8163 = vmatpush3.msra.mxu0 %v5472_v13  ;;  %8340 = vmatpush3.msk.msra.mxu1 %vm5530_vm1, %v5495_v21  ;;  %v5483_v24 = vld [vmem:[%s9644_s2 + $0xc8] sm:$0xff]  ;;  %v5493_v25 = vld [vmem:[%s9644_s2 + $0x118] sm:$0xff]  ;;  %v5482_v27 = vld [vmem:[%s9644_s2 + $0xc0] sm:$0xff] }
 0x4e7   :  { %8164 = vmatprep.subr.mxu0 %v5487_v14  ;;  %8341 = vmatprep.subr.mxu1 %v9658_v9  ;;  %v5467_v26 = vld [vmem:[%s9644_s2 + $0x48] sm:$0xff]  ;;  %v5492_v28 = vld [vmem:[%s9644_s2 + $0x110] sm:$0xff]  ;;  %v5466_v29 = vld [vmem:[%s9644_s2 + $0x40] sm:$0xff] }
 0x4e8   :  { %8165 = vmatpush3.msra.mxu0 %v5471_v15  ;;  %8342 = vmatpush3.msra.mxu1 %v5494_v23  ;;  %v5481_v30 = vld [vmem:[%s9644_s2 + $0xb8] sm:$0xff]  ;;  %v9025_v31 = vld [vmem:[#allocation2 + $0x8] sm:$0xff]  ;;  %v5480_v34 = vld [vmem:[%s9644_s2 + $0xb0] sm:$0xff] }
 0x4e9   :  { %8166 = vmatprep.subr.mxu0 %v5486_v16  ;;  %8343 = vmatprep.subr.mxu1 %v9658_v9  ;;  %9673 = vst [vmem:[#allocation97_spill] sm:$0xff] %v9025_v31  ;;  %v5465_v32 = vld [vmem:[%s9644_s2 + $0x38] sm:$0xff]  ;;  %v5491_v33 = vld [vmem:[%s9644_s2 + $0x108] sm:$0xff]  ;;  %v5464_v35 = vld [vmem:[%s9644_s2 + $0x30] sm:$0xff] }
 0x4ea   :  { %8167 = vmatpush3.msra.mxu0 %v5470_v17  ;;  %8344 = vmatpush3.msra.mxu1 %v5493_v25  ;;  %v5490_v36 = vld [vmem:[%s9644_s2 + $0x100] sm:$0xff]  ;;  %v5479_v37 = vld [vmem:[%s9644_s2 + $0xa8] sm:$0xff]  ;;  %v5427_v38 = vld [vmem:[#allocation2 + $0x10] sm:$0xff] }
 0x4eb   :  { %8168 = vmatprep.subr.mxu0 %v5485_v18  ;;  %8345 = vmatprep.subr.mxu1 %v9658_v9  ;;  %v5463_v39 = vld [vmem:[%s9644_s2 + $0x28] sm:$0xff]  ;;  %v5478_v40 = vld [vmem:[%s9644_s2 + $0xa0] sm:$0xff]  ;;  %v5477_v42 = vld [vmem:[%s9644_s2 + $0x98] sm:$0xff] }
 0x4ec   :  { %8169 = vmatpush3.msra.mxu0 %v5469_v19  ;;  %8346 = vmatpush3.msra.mxu1 %v5492_v28  ;;  %v5462_v41 = vld [vmem:[%s9644_s2 + $0x20] sm:$0xff]  ;;  %v9063_v43 = vld [vmem:[#allocation2 + $0x28] sm:$0xff]  ;;  %v5461_v44 = vld [vmem:[%s9644_s2 + $0x18] sm:$0xff] }
 0x4ed   :  { %8170 = vmatprep.subr.mxu0 %v5484_v20  ;;  %8347 = vmatprep.subr.mxu1 %v9658_v9  ;;  %9674 = vst [vmem:[#allocation98_spill] sm:$0xff] %v9063_v43  ;;  %v5476_v45 = vld [vmem:[%s9644_s2 + $0x90] sm:$0xff]  ;;  %v5475_v47 = vld [vmem:[%s9644_s2 + $0x88] sm:$0xff]  ;;  %v9082_v48 = vld [vmem:[#allocation2 + $0x40] sm:$0xff] }
 0x4ee   :  { %8171 = vmatpush3.msra.mxu0 %v5468_v22  ;;  %5598 = vmatprep.mubr.f32.mxu0 %v9025_v31  ;;  %v5460_v46 = vld [vmem:[%s9644_s2 + $0x10] sm:$0xff]  ;;  %9675 = vst [vmem:[#allocation99_spill] sm:$0xff] %v9082_v48  ;;  %v5459_v49 = vld [vmem:[%s9644_s2 + $0x8] sm:$0xff]  ;;  %v5474_v50 = vld [vmem:[%s9644_s2 + $0x80] sm:$0xff] }
 0x4ef   :  { %8172 = vmatprep.subr.mxu0 %v5483_v24  ;;  %8348 = vmatpush3.msra.mxu1 %v5491_v33  ;;  %v5458_v51 = vld [vmem:[%s9644_s2] sm:$0xff]  ;;  %v9099_v53 = vld [vmem:[#allocation2 + $0x58] sm:$0xff]  ;;  %v9111_v56 = vld [vmem:[#allocation2 + $0x70] sm:$0xff] }
 0x4f0   :  { %8173 = vmatpush3.msra.mxu0 %v5467_v26  ;;  %8349 = vmatprep.subr.mxu1 %v9658_v9  ;;  %v9095_v52 = vld [vmem:[#allocation2] sm:$0xff]  ;;  %9677 = vst [vmem:[#allocation101_spill] sm:$0xff] %v9099_v53  ;;  %v9107_v55 = vld [vmem:[#allocation2 + $0x18] sm:$0xff]  ;;  %9679 = vst [vmem:[#allocation103_spill] sm:$0xff] %v9111_v56 }
 0x4f1   :  { %8174 = vmatprep.subr.mxu0 %v5482_v27  ;;  %8350 = vmatpush3.msra.mxu1 %v5490_v36  ;;  %9676 = vst [vmem:[#allocation100_spill] sm:$0xff] %v9095_v52  ;;  %v9101_v54 = vld [vmem:[#allocation2 + $0x20] sm:$0xff]  ;;  %v9113_v57 = vld [vmem:[#allocation2 + $0x38] sm:$0xff]  ;;  %v9119_v58 = vld [vmem:[#allocation2 + $0x30] sm:$0xff] }
 0x4f2   :  { %8175 = vmatpush3.msra.mxu0 %v5466_v29  ;;  %8352 = vmatmul.mubr.msk.f32.vlgmr.msra.gmra.mxu1 %vm5496_vm2, %v5427_v38  ;;  %9678 = vst [vmem:[#allocation102_spill] sm:$0xff] %v9101_v54  ;;  %v9123_v59 = vld [vmem:[#allocation2 + $0x88] sm:$0xff]  ;;  %v9125_v60 = vld [vmem:[#allocation2 + $0x50] sm:$0xff]  ;;  %v9135_v62 = vld [vmem:[#allocation2 + $0xa0] sm:$0xff] }
 0x4f3   :  { %8176 = vmatprep.subr.mxu0 %v5481_v30  ;;  %8354 = vmatprep.mubr.msk.f32.mxu1 %vm8603_vm0, %v9658_v9  ;;  %9680 = vst [vmem:[#allocation104_spill] sm:$0xff] %v9123_v59  ;;  %v9131_v61 = vld [vmem:[#allocation2 + $0x48] sm:$0xff]  ;;  %9681 = vst [vmem:[#allocation105_spill] sm:$0xff] %v9135_v62  ;;  %v9143_v0 = vld [vmem:[#allocation2 + $0x60] sm:$0xff] }
 0x4f4   :  { %8177 = vmatpush3.msra.mxu0 %v5465_v32  ;;  %8384 = vmatprep.subr.mxu1 %v9658_v9  ;;  %v9137_v63 = vld [vmem:[#allocation2 + $0x68] sm:$0xff]  ;;  %v9147_v1 = vld [vmem:[#allocation2 + $0xb8] sm:$0xff]  ;;  %v9149_v2 = vld [vmem:[#allocation2 + $0x80] sm:$0xff] }
 0x4f5   :  { %8178 = vmatprep.subr.mxu0 %v5480_v34  ;;  %9682 = vst [vmem:[#allocation106_spill] sm:$0xff] %v9147_v1  ;;  %v9155_v3 = vld [vmem:[#allocation2 + $0x78] sm:$0xff]  ;;  %v9159_v4 = vld [vmem:[#allocation2 + $0xd0] sm:$0xff]  ;;  %v9171_v7 = vld [vmem:[#allocation2 + $0xe8] sm:$0xff] }
 0x4f6   :  { %8179 = vmatpush3.msra.mxu0 %v5464_v35  ;;  %8355 = vmatmul.mubr.msk.f32.gmra.mxu1 %vm5496_vm2, %v9063_v43  ;;  %9683 = vst [vmem:[#allocation107_spill] sm:$0xff] %v9159_v4  ;;  %v9161_v5 = vld [vmem:[#allocation2 + $0x98] sm:$0xff]  ;;  %v9167_v6 = vld [vmem:[#allocation2 + $0x90] sm:$0xff]  ;;  %9684 = vst [vmem:[#allocation108_spill] sm:$0xff] %v9171_v7 }
 0x4f7   :  { %8180 = vmatprep.subr.mxu0 %v5479_v37  ;;  %8357 = vmatprep.mubr.msk.f32.mxu1 %vm8603_vm0, %v9658_v9  ;;  %v9173_v8 = vld [vmem:[#allocation2 + $0xb0] sm:$0xff]  ;;  %v9179_v10 = vld [vmem:[#allocation2 + $0xa8] sm:$0xff]  ;;  %v9183_v11 = vld [vmem:[#allocation2 + $0x100] sm:$0xff] }
 0x4f8   :  { %8181 = vmatpush3.msra.mxu0 %v5463_v39  ;;  %9685 = vst [vmem:[#allocation109_spill] sm:$0xff] %v9183_v11  ;;  %v9185_v12 = vld [vmem:[#allocation2 + $0xc8] sm:$0xff]  ;;  %v9191_v13 = vld [vmem:[#allocation2 + $0xc0] sm:$0xff]  ;;  %v9199_v15 = vld [vmem:[#allocation2 + $0xd8] sm:$0xff] }
 0x4f9   :  { %8182 = vmatprep.subr.mxu0 %v5478_v40  ;;  %v9195_v14 = vld [vmem:[#allocation2 + $0xe0] sm:$0xff]  ;;  %v9201_v16 = vld [vmem:[#allocation2 + $0xf8] sm:$0xff]  ;;  %v9205_v17 = vld [vmem:[#allocation2 + $0xf0] sm:$0xff] }
 0x4fa   :  { %8183 = vmatpush3.msra.mxu0 %v5462_v41  ;;  %8358 = vmatmul.mubr.msk.f32.gmra.mxu1 %vm5496_vm2, %v9082_v48 }
 0x4fb   :  { %8184 = vmatprep.subr.mxu0 %v5477_v42  ;;  %8360 = vmatprep.mubr.msk.f32.mxu1 %vm8603_vm0, %v9658_v9 }
 0x4fc   :  { %8185 = vmatpush3.msra.mxu0 %v5461_v44 }
 0x4fd   :  { %8186 = vmatprep.subr.mxu0 %v5476_v45 }
 0x4fe   :  { %8187 = vmatpush3.msra.mxu0 %v5460_v46  ;;  %8361 = vmatmul.mubr.msk.f32.gmra.mxu1 %vm5496_vm2, %v9099_v53 }
 0x4ff   :  { %8188 = vmatprep.subr.mxu0 %v5475_v47  ;;  %8363 = vmatprep.mubr.msk.f32.mxu1 %vm8603_vm0, %v9658_v9 }
 0x500   :  { %8189 = vmatpush3.msra.mxu0 %v5459_v49 }
 0x501   :  { %8190 = vmatprep.subr.mxu0 %v5474_v50 }
 0x502   :  { %8191 = vmatpush3.msra.mxu0 %v5458_v51  ;;  %8364 = vmatmul.mubr.msk.f32.gmra.mxu1 %vm5496_vm2, %v9111_v56 }
 0x503   :  { %5599 = vmatmul.mubr.f32.vlgmr.msra.gmra.mxu0 %v9095_v52  ;;  %8366 = vmatprep.mubr.msk.f32.mxu1 %vm8603_vm0, %v9658_v9 }
 0x504   :  { %5603 = vmatprep.mubr.f32.mxu0 %v9101_v54 }
 0x506   :  { %8367 = vmatmul.mubr.msk.f32.gmra.mxu1 %vm5496_vm2, %v9123_v59 }
 0x507   :  { %5604 = vmatmul.mubr.f32.gmra.mxu0 %v9107_v55  ;;  %8369 = vmatprep.mubr.msk.f32.mxu1 %vm8603_vm0, %v9658_v9 }
 0x508   :  { %5608 = vmatprep.mubr.f32.mxu0 %v9113_v57 }
 0x50a   :  { %8370 = vmatmul.mubr.msk.f32.gmra.mxu1 %vm5496_vm2, %v9135_v62 }
 0x50b   :  { %5609 = vmatmul.mubr.f32.gmra.mxu0 %v9119_v58  ;;  %8372 = vmatprep.mubr.msk.f32.mxu1 %vm8603_vm0, %v9658_v9 }
 0x50c   :  { %5613 = vmatprep.mubr.f32.mxu0 %v9125_v60 }
 0x50e   :  { %8373 = vmatmul.mubr.msk.f32.gmra.mxu1 %vm5496_vm2, %v9147_v1 }
 0x50f   :  { %5614 = vmatmul.mubr.f32.gmra.mxu0 %v9131_v61  ;;  %8375 = vmatprep.mubr.msk.f32.mxu1 %vm8603_vm0, %v9658_v9 }
 0x510   :  { %5618 = vmatprep.mubr.f32.mxu0 %v9137_v63 }
 0x512   :  { %8376 = vmatmul.mubr.msk.f32.gmra.mxu1 %vm5496_vm2, %v9159_v4 }
 0x513   :  { %5619 = vmatmul.mubr.f32.gmra.mxu0 %v9143_v0  ;;  %8378 = vmatprep.mubr.msk.f32.mxu1 %vm8603_vm0, %v9658_v9 }
 0x514   :  { %5623 = vmatprep.mubr.f32.mxu0 %v9149_v2 }
 0x516   :  { %8379 = vmatmul.mubr.msk.f32.gmra.mxu1 %vm5496_vm2, %v9171_v7 }
 0x517   :  { %5624 = vmatmul.mubr.f32.gmra.mxu0 %v9155_v3  ;;  %8381 = vmatprep.mubr.msk.f32.mxu1 %vm8603_vm0, %v9658_v9 }
 0x518   :  { %5628 = vmatprep.mubr.f32.mxu0 %v9161_v5 }
 0x51a   :  { %8382 = vmatmul.mubr.msk.f32.gmra.mxu1 %vm5496_vm2, %v9183_v11 }
 0x51b   :  { %5629 = vmatmul.mubr.f32.gmra.mxu0 %v9167_v6  ;;  %8406 = vmatprep.mubr.msk.f32.mxu1 %vm8603_vm0, %v9658_v9 }
 0x51c   :  { %5633 = vmatprep.mubr.f32.mxu0 %v9173_v8 }
 0x51f   :  { %5634 = vmatmul.mubr.f32.gmra.mxu0 %v9179_v10 }
 0x520   :  { %5638 = vmatprep.mubr.f32.mxu0 %v9185_v12 }
 0x523   :  { %5639 = vmatmul.mubr.f32.gmra.mxu0 %v9191_v13 }
 0x524   :  { %5643 = vmatprep.mubr.f32.mxu0 %v9195_v14 }
 0x527   :  { %5644 = vmatmul.mubr.f32.gmra.mxu0 %v9199_v15 }
 0x528   :  { %5648 = vmatprep.mubr.f32.mxu0 %v9201_v16 }
 0x52b   :  { %5649 = vmatmul.mubr.f32.gmra.mxu0 %v9205_v17 }
 0x52c   :  { %6253 = vmatprep.mubr.f32.mxu0 %v9658_v9 }
 0x5b2   :  { %v5720_v18 = vpop.f32.mrf.mxu1 }
 0x5b4   :  { %v8353_v19 = vpop.f32.mrf.mxu1 }
 0x5b6   :  { %v5725_v20 = vpop.f32.mrf.mxu1 }
 0x5b8   :  { %v8356_v21 = vpop.f32.mrf.mxu1 }
 0x5ba   :  { %v5730_v22 = vpop.f32.mrf.mxu1 }
 0x5bc   :  { %v8359_v23 = vpop.f32.mrf.mxu1 }
 0x5be   :  { %v5735_v25 = vpop.f32.mrf.mxu1 }
 0x5c0   :  { %v8362_v27 = vpop.f32.mrf.mxu1 }
 0x5c2   :  { %v5740_v29 = vpop.f32.mrf.mxu1 }
 0x5c3   :  { %v8192_v24 = vpop.f32.mrf.mxu0 }
 0x5c4   :  { %v8365_v32 = vpop.f32.mrf.mxu1 }
 0x5c5   :  { %v8193_v26 = vpop.f32.mrf.mxu0 }
 0x5c6   :  { %v5745_v34 = vpop.f32.mrf.mxu1  ;;  %v8194_v62 = vadd.f32 %v8193_v26, %v8192_v24 }
 0x5c7   :  { %v8195_v28 = vpop.f32.mrf.mxu0 }
 0x5c8   :  { %v8368_v36 = vpop.f32.mrf.mxu1 }
 0x5c9   :  { %v8196_v30 = vpop.f32.mrf.mxu0 }
 0x5ca   :  { %v5750_v38 = vpop.f32.mrf.mxu1  ;;  %v8197_v53 = vadd.f32 %v8196_v30, %v8195_v28 }
 0x5cb   :  { %v8198_v33 = vpop.f32.mrf.mxu0 }
 0x5cc   :  { %v8371_v40 = vpop.f32.mrf.mxu1  ;;  %v9211_v11 = vadd.f32 %v8197_v53, %v5725_v20 }
 0x5cd   :  { %v8199_v35 = vpop.f32.mrf.mxu0 }
 0x5ce   :  { %v5755_v42 = vpop.f32.mrf.mxu1  ;;  %v5776_v53 = vsel %vm5774_vm3, %v9211_v11, -inf }
 0x5cf   :  { %v8201_v37 = vpop.f32.mrf.mxu0 }
 0x5d0   :  { %v8374_v45 = vpop.f32.mrf.mxu1 }
 0x5d1   :  { %v8202_v39 = vpop.f32.mrf.mxu0  ;;  %v8200_v45 = vadd.f32 %v8199_v35, %v8198_v33 }
 0x5d2   :  { %v5760_v47 = vpop.f32.mrf.mxu1 }
 0x5d3   :  { %v8204_v41 = vpop.f32.mrf.mxu0  ;;  %v9217_v28 = vadd.f32 %v8200_v45, %v5730_v22 }
 0x5d4   :  { %v8377_v50 = vpop.f32.mrf.mxu1 }
 0x5d5   :  { %v8205_v44 = vpop.f32.mrf.mxu0 }
 0x5d6   :  { %v5765_v19 = vpop.f32.mrf.mxu1  ;;  %v8206_v56 = vadd.f32 %v8205_v44, %v8204_v41 }
 0x5d7   :  { %v8207_v46 = vpop.f32.mrf.mxu0 }
 0x5d8   :  { %v8380_v23 = vpop.f32.mrf.mxu1  ;;  %v9213_v52 = vadd.f32 %v8206_v56, %v5740_v29 }
 0x5d9   :  { %v8208_v49 = vpop.f32.mrf.mxu0  ;;  %v8203_v23 = vadd.f32 %v8202_v39, %v8201_v37 }
 0x5da   :  { %v5770_v32 = vpop.f32.mrf.mxu1  ;;  %v8209_v48 = vadd.f32 %v8208_v49, %v8207_v46  ;;  %v9215_v46 = vadd.f32 %v8194_v62, %v5720_v18 }
 0x5db   :  { %v8210_v51 = vpop.f32.mrf.mxu0  ;;  %v5736_v20 = vadd.f32 %v8203_v23, %v5735_v25 }
 0x5dc   :  { %v8383_v36 = vpop.f32.mrf.mxu1  ;;  %v9209_v4 = vadd.f32 %v8209_v48, %v5745_v34  ;;  %v5775_v18 = vsel %vm5774_vm3, %v9215_v46, -inf }
 0x5dd   :  { %v8211_v21 = vpop.f32.mrf.mxu0  ;;  %v5778_v35 = vsel %vm5774_vm3, %v5736_v20, -inf }
 0x5de   :  { %v8212_v59 = vadd.f32 %v8211_v21, %v8210_v51  ;;  %v5781_v48 = vsel %vm5774_vm3, %v9209_v4, -inf }
 0x5df   :  { %v8213_v27 = vpop.f32.mrf.mxu0  ;;  %v5782_v22 = vmax.f32 %v5776_v53, %v5781_v48 }
 0x5e0   :  { %v5751_v36 = vadd.f32 %v8212_v59, %v5750_v38 }
 0x5e1   :  { %v8214_v9 = vpop.f32.mrf.mxu0 }
 0x5e2   :  { %v8215_v50 = vadd.f32 %v8214_v9, %v8213_v27  ;;  %v5783_v59 = vsel %vm5774_vm3, %v5751_v36, -inf }
 0x5e3   :  { %v8216_v43 = vpop.f32.mrf.mxu0 }
 0x5e4   :  { %v5756_v26 = vadd.f32 %v8215_v50, %v5755_v42 }
 0x5e5   :  { %v8217_v40 = vpop.f32.mrf.mxu0 }
 0x5e6   :  { %v8218_v7 = vadd.f32 %v8217_v40, %v8216_v43 }
 0x5e7   :  { %v8219_v1 = vpop.f32.mrf.mxu0 }
 0x5e8   :  { %v5761_v9 = vadd.f32 %v8218_v7, %v5760_v47  ;;  %v5785_v7 = vsel %vm5774_vm3, %v5756_v26, -inf }
 0x5e9   :  { %v8220_v31 = vpop.f32.mrf.mxu0  ;;  %v5786_v38 = vmax.f32 %v5778_v35, %v5785_v7 }
 0x5ea   :  { %v8221_v54 = vadd.f32 %v8220_v31, %v8219_v1  ;;  %v5779_v31 = vsel %vm5774_vm3, %v9213_v52, -inf  ;;  %v5787_v25 = vsel %vm5774_vm3, %v5761_v9, -inf }
 0x5eb   :  { %v8222_v24 = vpop.f32.mrf.mxu0  ;;  %v5780_v30 = vmax.f32 %v5775_v18, %v5779_v31 }
 0x5ec   :  { %v5766_v43 = vadd.f32 %v8221_v54, %v5765_v19  ;;  %v5777_v54 = vsel %vm5774_vm3, %v9217_v28, -inf }
 0x5ed   :  { %v8223_v56 = vpop.f32.mrf.mxu0  ;;  %v5784_v33 = vmax.f32 %v5777_v54, %v5783_v59  ;;  %v5788_v39 = vmax.f32 %v5780_v30, %v5787_v25  ;;  %v9686_v30 = vmov 0.0  }
 0x5ee   :  { %v5789_v62 = vsel %vm5774_vm3, %v5766_v43, -inf  ;;  %v8224_v1 = vadd.f32 %v8223_v56, %v8222_v24 }
 0x5ef   :  { %v5790_v34 = vmax.f32 %v5782_v22, %v5789_v62 }
 0x5f0   :  { %v5771_v29 = vadd.f32 %v8224_v1, %v5770_v32 }
 0x5f1   :  { %v5793_v42 = vmax.f32 %v5788_v39, %v5790_v34 }
 0x5f2   :  { %v5791_v37 = vsel %vm5774_vm3, %v5771_v29, -inf }
 0x5f3   :  { %v5792_v41 = vmax.f32 %v5784_v33, %v5791_v37 }
 0x5f5   :  { %v5794_v44 = vmax.f32 %v5792_v41, %v5786_v38  ;;  %v9282_v41 = vld [vmem:[%s9646_s4] sm:$0xff] }
 0x5f7   :  { %v5795_v47 = vmax.f32 %v5793_v42, %v5794_v44  ;;  %v5914_v44 = vld [vmem:[%s9645_s3] sm:$0xff] }
 0x5f9   :  { %5796 = vmax.xlane.f32.xlu0 %v5795_v47 }
 0x682   :  { %v5797_v49 = vpop.xlane.xlu0 %5796 }
 0x683   :  { %v5798_v51 = vrot.slane %v5797_v49, 4 }
 0x685   :  { %v5799_v19 = vmax.f32 %v5797_v49, %v5798_v51  ;;  %v5915_v51 = vld [vmem:[%s9645_s3 + $0x8] sm:$0xff] }
 0x687   :  { %v5800_v21 = vrot.slane %v5799_v19, 2 }
 0x689   :  { %v5801_v27 = vmax.f32 %v5799_v19, %v5800_v21  ;;  %v5916_v19 = vld [vmem:[%s9645_s3 + $0x10] sm:$0xff]  ;;  %v5917_v21 = vld [vmem:[%s9645_s3 + $0x18] sm:$0xff] }
 0x68b   :  { %v5802_v32 = vrot.slane %v5801_v27, 1 }
 0x68d   :  { %v5803_v40 = vmax.f32 %v5801_v27, %v5802_v32  ;;  %v5918_v27 = vld [vmem:[%s9645_s3 + $0x20] sm:$0xff]  ;;  %v5919_v32 = vld [vmem:[%s9645_s3 + $0x28] sm:$0xff] }
 0x68f   :  { %8524 = vpush %v5803_v40  ;;  %v5920_v40 = vld [vmem:[%s9645_s3 + $0x30] sm:$0xff] }
 0x6c0   :  { %s8525_s2 = spop %8524 }
 0x6c1   :  { %v5805_v45 = vstv %s8525_s2 }
 0x6c2   :  { %v5816_v50 = vsub.f32 %v5771_v29, %v5805_v45  ;;  %v5815_v23 = vsub.f32 %v5766_v43, %v5805_v45  ;;  %v5814_v24 = vsub.f32 %v5761_v9, %v5805_v45  ;;  %v5813_v53 = vsub.f32 %v5756_v26, %v5805_v45 }
 0x6c3   :  { %v5812_v31 = vsub.f32 %v5751_v36, %v5805_v45  ;;  %v5811_v62 = vsub.f32 %v9209_v4, %v5805_v45  ;;  %v5810_v18 = vsub.f32 %v9213_v52, %v5805_v45  ;;  %v5809_v54 = vsub.f32 %v5736_v20, %v5805_v45 }
 0x6c4   :  { %v5837_v48 = vmul.f32 1.442695, %v5816_v50  ;;  %v5835_v56 = vmul.f32 1.442695, %v5815_v23  ;;  %v5833_v59 = vmul.f32 1.442695, %v5814_v24  ;;  %v5808_v43 = vsub.f32 %v9217_v28, %v5805_v45 }
 0x6c5   :  { %v5831_v1 = vmul.f32 1.442695, %v5813_v53  ;;  %v5829_v22 = vmul.f32 1.442695, %v5812_v31  ;;  %v5827_v7 = vmul.f32 1.442695, %v5811_v62  ;;  %v5807_v26 = vsub.f32 %v9211_v11, %v5805_v45 }
 0x6c6   :  { %8532 = vpow2.f32 %v5837_v48  ;;  %v5825_v9 = vmul.f32 1.442695, %v5810_v18  ;;  %v5823_v36 = vmul.f32 1.442695, %v5809_v54  ;;  %v5806_v25 = vsub.f32 %v9215_v46, %v5805_v45  ;;  %v5921_v45 = vld [vmem:[%s9645_s3 + $0x38] sm:$0xff]  ;;  %v5922_v50 = vld [vmem:[%s9645_s3 + $0x40] sm:$0xff] }
 0x6c7   :  { %8534 = vpow2.f32 %v5835_v56  ;;  %v5821_v4 = vmul.f32 1.442695, %v5808_v43  ;;  %v5819_v52 = vmul.f32 1.442695, %v5807_v26  ;;  %v5923_v23 = vld [vmem:[%s9645_s3 + $0x48] sm:$0xff]  ;;  %v5924_v24 = vld [vmem:[%s9645_s3 + $0x50] sm:$0xff] }
 0x6c8   :  { %8536 = vpow2.f32 %v5833_v59  ;;  %v5817_v28 = vmul.f32 1.442695, %v5806_v25  ;;  %v8604_v48 = vmov 0  }
 0x6c9   :  { %8538 = vpow2.f32 %v5831_v1  ;;  %8531 = vset.pattern.permute.xlu1 %v8604_v48  ;;  %8530 = vset.pattern.permute.xlu0 %v8604_v48 }
 0x6ca   :  { %8540 = vpow2.f32 %v5829_v22 }
 0x6cb   :  { %8542 = vpow2.f32 %v5827_v7 }
 0x6cc   :  { %8544 = vpow2.f32 %v5825_v9 }
 0x6cd   :  { %8546 = vpow2.f32 %v5823_v36 }
 0x6ce   :  { %8548 = vpow2.f32 %v5821_v4 }
 0x6cf   :  { %8550 = vpow2.f32 %v5819_v52 }
 0x6d0   :  { %8552 = vpow2.f32 %v5817_v28 }
 0x6d3   :  { %v9240_v29 = vpop.eup %8532 }
 0x6d4   :  { %8385 = vmatpush3.msra.mxu1 %v9240_v29  ;;  %v9243_v20 = vpop.eup %8534 }
 0x6d5   :  { %8386 = vmatprep.subr.mxu1 %v9686_v30  ;;  %v9247_v11 = vpop.eup %8536 }
 0x6d6   :  { %8387 = vmatpush3.msra.mxu1 %v9243_v20  ;;  %v9251_v46 = vpop.eup %8538 }
 0x6d7   :  { %8388 = vmatprep.subr.mxu1 %v9686_v30  ;;  %v9255_v33 = vpop.eup %8540 }
 0x6d8   :  { %8389 = vmatpush3.msra.mxu1 %v9247_v11  ;;  %v9259_v34 = vpop.eup %8542 }
 0x6d9   :  { %8390 = vmatprep.subr.mxu1 %v9686_v30  ;;  %v9263_v35 = vpop.eup %8544 }
 0x6da   :  { %8391 = vmatpush3.msra.mxu1 %v9251_v46  ;;  %v9267_v37 = vpop.eup %8546 }
 0x6db   :  { %8392 = vmatprep.subr.mxu1 %v9686_v30  ;;  %v9271_v38 = vpop.eup %8548 }
 0x6dc   :  { %8393 = vmatpush3.msra.mxu1 %v9255_v33  ;;  %v9275_v39 = vpop.eup %8550 }
 0x6dd   :  { %8394 = vmatprep.subr.mxu1 %v9686_v30  ;;  %v9284_v42 = vpop.eup %8552 }
 0x6de   :  { %8395 = vmatpush3.msra.mxu1 %v9259_v34 }
 0x6df   :  { %8396 = vmatprep.subr.mxu1 %v9686_v30 }
 0x6e0   :  { %8397 = vmatpush3.msra.mxu1 %v9263_v35 }
 0x6e1   :  { %8398 = vmatprep.subr.mxu1 %v9686_v30 }
 0x6e2   :  { %8399 = vmatpush3.msra.mxu1 %v9267_v37 }
 0x6e3   :  { %8400 = vmatprep.subr.mxu1 %v9686_v30 }
 0x6e4   :  { %8401 = vmatpush3.msra.mxu1 %v9271_v38 }
 0x6e5   :  { %8402 = vmatprep.subr.mxu1 %v9686_v30 }
 0x6e6   :  { %8403 = vmatpush3.msra.mxu1 %v9275_v39 }
 0x6e7   :  { %8404 = vmatprep.subr.mxu1 %v9686_v30 }
 0x6e8   :  { %8405 = vmatpush3.msra.mxu1 %v9284_v42 }
 0x6e9   :  { %8407 = vmatmul.mubr.msk.f32.vlgmr.msra.gmra.mxu1 %vm5840_vm4, %v9282_v41  ;;  %8409 = vmatprep.subr.mxu1 %v9686_v30 }
 0x6ea   :  { %8411 = vmatprep.mubr.msk.f32.mxu1 %vm8603_vm0, %v9686_v30 }
 0x7a9   :  { %v5910_v47 = vpop.f32.mrf.mxu1 }
 0x7aa   :  { %8410 = vmatpush3.msra.mxu1 %v5910_v47 }
 0x7ab   :  { %8412 = vmatmul.mubr.msk.f32.vlgmr.msra.gmra.mxu1 %vm5925_vm5, %v5914_v44  ;;  %v8408_v49 = vpop.f32.mrf.mxu1 }
 0x7ac   :  { %8414 = vmatprep.mubr.msk.f32.mxu1 %vm8603_vm0, %v9686_v30 }
 0x7af   :  { %8415 = vmatmul.mubr.msk.f32.gmra.mxu1 %vm5925_vm5, %v5915_v51 }
 0x7b0   :  { %8417 = vmatprep.mubr.msk.f32.mxu1 %vm8603_vm0, %v9686_v30 }
 0x7b3   :  { %8418 = vmatmul.mubr.msk.f32.gmra.mxu1 %vm5925_vm5, %v5916_v19 }
 0x7b4   :  { %8420 = vmatprep.mubr.msk.f32.mxu1 %vm8603_vm0, %v9686_v30 }
 0x7b7   :  { %8421 = vmatmul.mubr.msk.f32.gmra.mxu1 %vm5925_vm5, %v5917_v21 }
 0x7b8   :  { %8423 = vmatprep.mubr.msk.f32.mxu1 %vm8603_vm0, %v9686_v30 }
 0x7bb   :  { %8424 = vmatmul.mubr.msk.f32.gmra.mxu1 %vm5925_vm5, %v5918_v27 }
 0x7bc   :  { %8426 = vmatprep.mubr.msk.f32.mxu1 %vm8603_vm0, %v9686_v30 }
 0x7bf   :  { %8427 = vmatmul.mubr.msk.f32.gmra.mxu1 %vm5925_vm5, %v5919_v32 }
 0x7c0   :  { %8429 = vmatprep.mubr.msk.f32.mxu1 %vm8603_vm0, %v9686_v30 }
 0x7c3   :  { %8430 = vmatmul.mubr.msk.f32.gmra.mxu1 %vm5925_vm5, %v5920_v40 }
 0x7c4   :  { %8432 = vmatprep.mubr.msk.f32.mxu1 %vm8603_vm0, %v9686_v30 }
 0x7c7   :  { %8433 = vmatmul.mubr.msk.f32.gmra.mxu1 %vm5925_vm5, %v5921_v45 }
 0x7c8   :  { %8435 = vmatprep.mubr.msk.f32.mxu1 %vm8603_vm0, %v9686_v30 }
 0x7cb   :  { %8436 = vmatmul.mubr.msk.f32.gmra.mxu1 %vm5925_vm5, %v5922_v50 }
 0x7cc   :  { %8438 = vmatprep.mubr.msk.f32.mxu1 %vm8603_vm0, %v9686_v30 }
 0x7cf   :  { %8439 = vmatmul.mubr.msk.f32.gmra.mxu1 %vm5925_vm5, %v5923_v23 }
 0x7d0   :  { %8441 = vmatprep.mubr.msk.f32.mxu1 %vm8603_vm0, %v9686_v30 }
 0x7d3   :  { %8442 = vmatmul.mubr.msk.f32.gmra.mxu1 %vm5925_vm5, %v5924_v24 }
 0x86b   :  { %v6025_v53 = vpop.f32.mrf.mxu1 }
 0x86d   :  { %v8413_v56 = vpop.f32.mrf.mxu1 }
 0x86f   :  { %v6030_v31 = vpop.f32.mrf.mxu1 }
 0x871   :  { %v8416_v59 = vpop.f32.mrf.mxu1 }
 0x873   :  { %v6035_v62 = vpop.f32.mrf.mxu1 }
 0x875   :  { %v8419_v1 = vpop.f32.mrf.mxu1 }
 0x877   :  { %v6040_v18 = vpop.f32.mrf.mxu1 }
 0x879   :  { %v8422_v22 = vpop.f32.mrf.mxu1 }
 0x87a   :  { %v6358_v22 = vld [vmem:[%s9647_s5 + $0xe0] sm:$0xff] }
 0x87b   :  { %v6045_v54 = vpop.f32.mrf.mxu1 }
 0x87d   :  { %v8425_v7 = vpop.f32.mrf.mxu1 }
 0x87e   :  { %v6357_v7 = vld [vmem:[%s9647_s5 + $0xd8] sm:$0xff] }
 0x87f   :  { %v6050_v43 = vpop.f32.mrf.mxu1 }
 0x881   :  { %v8428_v9 = vpop.f32.mrf.mxu1 }
 0x882   :  { %v6356_v9 = vld [vmem:[%s9647_s5 + $0xd0] sm:$0xff] }
 0x883   :  { %v6055_v26 = vpop.f32.mrf.mxu1 }
 0x885   :  { %v8431_v36 = vpop.f32.mrf.mxu1 }
 0x886   :  { %v6355_v36 = vld [vmem:[%s9647_s5 + $0xc8] sm:$0xff] }
 0x887   :  { %v6060_v25 = vpop.f32.mrf.mxu1 }
 0x889   :  { %v8434_v4 = vpop.f32.mrf.mxu1 }
 0x88a   :  { %v6354_v4 = vld [vmem:[%s9647_s5 + $0xc0] sm:$0xff] }
 0x88b   :  { %v6065_v52 = vpop.f32.mrf.mxu1 }
 0x88d   :  { %v8437_v28 = vpop.f32.mrf.mxu1 }
 0x88e   :  { %v6353_v28 = vld [vmem:[%s9647_s5 + $0xb8] sm:$0xff] }
 0x88f   :  { %v6070_v44 = vpop.f32.mrf.mxu1 }
 0x890   :  { %8554 = vrcp.f32 %v6070_v44  ;;  %v6337_v44 = vld [vmem:[%s9647_s5 + $0x38] sm:$0xff] }
 0x891   :  { %v8440_v47 = vpop.f32.mrf.mxu1  ;;  %8556 = vrcp.f32 %v6065_v52  ;;  %v6338_v52 = vld [vmem:[%s9647_s5 + $0x40] sm:$0xff] }
 0x892   :  { %v6352_v47 = vld [vmem:[%s9647_s5 + $0xb0] sm:$0xff] }
 0x893   :  { %v6075_v49 = vpop.f32.mrf.mxu1 }
 0x894   :  { %8558 = vrcp.f32 %v6075_v49  ;;  %v6336_v49 = vld [vmem:[%s9647_s5 + $0x30] sm:$0xff] }
 0x895   :  { %v8443_v51 = vpop.f32.mrf.mxu1  ;;  %8560 = vrcp.f32 %v6060_v25  ;;  %v6339_v25 = vld [vmem:[%s9647_s5 + $0x48] sm:$0xff] }
 0x896   :  { %8562 = vrcp.f32 %v6055_v26  ;;  %v6340_v26 = vld [vmem:[%s9647_s5 + $0x50] sm:$0xff]  ;;  %v6351_v51 = vld [vmem:[%s9647_s5 + $0xa8] sm:$0xff] }
 0x897   :  { %8564 = vrcp.f32 %v6050_v43  ;;  %v6341_v43 = vld [vmem:[%s9647_s5 + $0x58] sm:$0xff] }
 0x898   :  { %8566 = vrcp.f32 %v6045_v54  ;;  %v6342_v54 = vld [vmem:[%s9647_s5 + $0x60] sm:$0xff] }
 0x899   :  { %8568 = vrcp.f32 %v6040_v18 }
 0x89a   :  { %8570 = vrcp.f32 %v6035_v62 }
 0x89b   :  { %8572 = vrcp.f32 %v6030_v31 }
 0x89c   :  { %8574 = vrcp.f32 %v6025_v53  ;;  %v6343_v53 = vld [vmem:[%s9647_s5 + $0x68] sm:$0xff] }
 0x89d   :  { %v8555_v19 = vpop.eup %8554 }
 0x89e   :  { %v6099_v21 = vmul.f32 %v8555_v19, %v9243_v20  ;;  %v8557_v27 = vpop.eup %8556  ;;  %v6335_v19 = vld [vmem:[%s9647_s5 + $0x28] sm:$0xff] }
 0x89f   :  { %v6098_v40 = vmul.f32 %v8557_v27, %v9247_v11  ;;  %v6334_v27 = vld [vmem:[%s9647_s5 + $0x20] sm:$0xff] }
 0x8a0   :  { %6148 = vperm.xlu1 %8531, %v6099_v21   ;;  %v6350_v21 = vld [vmem:[%s9647_s5 + $0xa0] sm:$0xff] }
 0x8a1   :  { %v8559_v32 = vpop.eup %8558 }
 0x8a2   :  { %v6100_v45 = vmul.f32 %v8559_v32, %v9240_v29  ;;  %v8561_v50 = vpop.eup %8560  ;;  %v6349_v32 = vld [vmem:[%s9647_s5 + $0x98] sm:$0xff] }
 0x8a3   :  { %v6097_v23 = vmul.f32 %v8561_v50, %v9251_v46  ;;  %v8563_v24 = vpop.eup %8562  ;;  %v6332_v50 = vld [vmem:[%s9647_s5 + $0x10] sm:$0xff] }
 0x8a4   :  { %6143 = vperm.xlu1 %8531, %v6098_v40   ;;  %6153 = vperm.xlu0 %8530, %v6100_v45   ;;  %v6096_v48 = vmul.f32 %v8563_v24, %v9255_v33  ;;  %v8565_v20 = vpop.eup %8564  ;;  %v6333_v40 = vld [vmem:[%s9647_s5 + $0x18] sm:$0xff]  ;;  %v6348_v45 = vld [vmem:[%s9647_s5 + $0x90] sm:$0xff] }
 0x8a5   :  { %v6095_v56 = vmul.f32 %v8565_v20, %v9259_v34  ;;  %v8567_v59 = vpop.eup %8566 }
 0x8a6   :  { %v6094_v29 = vmul.f32 %v8567_v59, %v9263_v35  ;;  %v8569_v11 = vpop.eup %8568  ;;  %v6361_v35 = vld [vmem:[%s9647_s5 + $0xf8] sm:$0xff] }
 0x8a7   :  { %v6093_v1 = vmul.f32 %v8569_v11, %v9267_v37  ;;  %v8571_v46 = vpop.eup %8570  ;;  %v6345_v37 = vld [vmem:[%s9647_s5 + $0x78] sm:$0xff]  ;;  %8278 = vmatprep.subr.mxu1 %v6361_v35 }
 0x8a8   :  { %6138 = vperm.xlu1 %8531, %v6097_v23   ;;  %v6092_v62 = vmul.f32 %v8571_v46, %v9271_v38  ;;  %v8573_v18 = vpop.eup %8572  ;;  %v6360_v38 = vld [vmem:[%s9647_s5 + $0xf0] sm:$0xff]  ;;  %8279 = vmatpush3.msra.mxu1 %v6345_v37 }
 0x8a9   :  { %v6091_v33 = vmul.f32 %v8573_v18, %v9275_v39  ;;  %v8575_v31 = vpop.eup %8574  ;;  %v6344_v39 = vld [vmem:[%s9647_s5 + $0x70] sm:$0xff]  ;;  %8280 = vmatprep.subr.mxu1 %v6360_v38 }
 0x8aa   :  { %v6090_v34 = vmul.f32 %v8575_v31, %v9284_v42  ;;  %v6359_v42 = vld [vmem:[%s9647_s5 + $0xe8] sm:$0xff]  ;;  %8281 = vmatpush3.msra.mxu1 %v6344_v39 }
 0x8ab   :  { %8282 = vmatprep.subr.mxu1 %v6359_v42 }
 0x8ac   :  { %6133 = vperm.xlu1 %8531, %v6096_v48   ;;  %8283 = vmatpush3.msra.mxu1 %v6343_v53  ;;  %v9690_v53 = vld [vmem:[#allocation109_spill] sm:$0xff] }
 0x8ad   :  { %8284 = vmatprep.subr.mxu1 %v6358_v22 }
 0x8ae   :  { %8285 = vmatpush3.msra.mxu1 %v6342_v54 }
 0x8af   :  { %8286 = vmatprep.subr.mxu1 %v6357_v7  ;;  %v9693_v7 = vld [vmem:[#allocation106_spill] sm:$0xff] }
 0x8b0   :  { %6128 = vperm.xlu1 %8531, %v6095_v56   ;;  %8287 = vmatpush3.msra.mxu1 %v6341_v43 }
 0x8b1   :  { %8288 = vmatprep.subr.mxu1 %v6356_v9  ;;  %v9694_v9 = vld [vmem:[#allocation105_spill] sm:$0xff] }
 0x8b2   :  { %8289 = vmatpush3.msra.mxu1 %v6340_v26 }
 0x8b3   :  { %8290 = vmatprep.subr.mxu1 %v6355_v36  ;;  %v9695_v36 = vld [vmem:[#allocation104_spill] sm:$0xff] }
 0x8b4   :  { %6123 = vperm.xlu1 %8531, %v6094_v29   ;;  %8291 = vmatpush3.msra.mxu1 %v6339_v25 }
 0x8b5   :  { %8292 = vmatprep.subr.mxu1 %v6354_v4  ;;  %v9696_v4 = vld [vmem:[#allocation103_spill] sm:$0xff] }
 0x8b6   :  { %8293 = vmatpush3.msra.mxu1 %v6338_v52 }
 0x8b7   :  { %8294 = vmatprep.subr.mxu1 %v6353_v28  ;;  %v9697_v28 = vld [vmem:[#allocation101_spill] sm:$0xff] }
 0x8b8   :  { %6118 = vperm.xlu1 %8531, %v6093_v1   ;;  %8295 = vmatpush3.msra.mxu1 %v6337_v44 }
 0x8b9   :  { %8296 = vmatprep.subr.mxu1 %v6352_v47  ;;  %v9698_v47 = vld [vmem:[#allocation99_spill] sm:$0xff] }
 0x8ba   :  { %8297 = vmatpush3.msra.mxu1 %v6336_v49 }
 0x8bb   :  { %8298 = vmatprep.subr.mxu1 %v6351_v51  ;;  %v9699_v51 = vld [vmem:[#allocation98_spill] sm:$0xff] }
 0x8bc   :  { %6113 = vperm.xlu1 %8531, %v6092_v62   ;;  %8299 = vmatpush3.msra.mxu1 %v6335_v19 }
 0x8bd   :  { %8300 = vmatprep.subr.mxu1 %v6350_v21  ;;  %v8584_v21 = vld [vmem:[#allocation2 + $0x10] sm:$0xff] }
 0x8be   :  { %8301 = vmatpush3.msra.mxu1 %v6334_v27 }
 0x8bf   :  { %8302 = vmatprep.subr.mxu1 %v6349_v32  ;;  %v6367_v32 = vld [vmem:[%s9647_s5 + $0x128] sm:$0xf] }
 0x8c0   :  { %6108 = vperm.xlu1 %8531, %v6091_v33   ;;  %8303 = vmatpush3.msra.mxu1 %v6333_v40  ;;  %v6347_v40 = vld [vmem:[%s9647_s5 + $0x88] sm:$0xff] }
 0x8c1   :  { %8304 = vmatprep.subr.mxu1 %v6348_v45  ;;  %v6331_v45 = vld [vmem:[%s9647_s5 + $0x8] sm:$0xff] }
 0x8c2   :  { %8305 = vmatpush3.msra.mxu1 %v6332_v50  ;;  %v6346_v50 = vld [vmem:[%s9647_s5 + $0x80] sm:$0xff] }
 0x8c3   :  { %8306 = vmatprep.subr.mxu1 %v6347_v40  ;;  %v6696_v40 = vld [vmem:[%s9655_s13] sm:$0xff] }
 0x8c4   :  { %6103 = vperm.xlu1 %8531, %v6090_v34   ;;  %8307 = vmatpush3.msra.mxu1 %v6331_v45  ;;  %v8150_v45 = vld [vmem:[%s9652_s10] ss:$0 sm:$0xff] }
 0x8c5   :  { %8308 = vmatprep.subr.mxu1 %v6346_v50 }
 0x91b   :  { %v6149_v23 = vpop.permute.xlu1 %6148 }
 0x91c   :  { %v6184_v59 = vmul.f32 %v6149_v23, %v9195_v14  ;;  %v6183_v11 = vmul.f32 %v6149_v23, %v9199_v15 }
 0x91f   :  { %v6144_v24 = vpop.permute.xlu1 %6143  ;;  %v6154_v48 = vpop.permute.xlu0 %6153 }
 0x920   :  { %v6186_v20 = vmul.f32 %v6154_v48, %v9205_v17  ;;  %v6187_v56 = vmul.f32 %v6154_v48, %v9201_v16  ;;  %v6181_v1 = vmul.f32 %v6144_v24, %v9185_v12  ;;  %v6180_v46 = vmul.f32 %v6144_v24, %v9191_v13 }
 0x921   :  { %v6188_v22 = vmul.f32 %v6154_v48, %v9690_v53  ;;  %v6364_v48 = vld [vmem:[%s9647_s5 + $0x110] sm:$0xff] }
 0x922   :  { %6199 = vmatprep.subr.mxu0 %v6187_v56  ;;  %v6362_v56 = vld [vmem:[%s9647_s5 + $0x100] sm:$0xff] }
 0x923   :  { %v6139_v29 = vpop.permute.xlu1 %6138  ;;  %6200 = vmatpush1.msra.mxu0 %v6186_v20  ;;  %v6363_v20 = vld [vmem:[%s9647_s5 + $0x108] sm:$0xff] }
 0x924   :  { %6201 = vmatprep.subr.mxu0 %v6184_v59  ;;  %v6178_v62 = vmul.f32 %v6139_v29, %v9173_v8  ;;  %v6177_v17 = vmul.f32 %v6139_v29, %v9179_v10  ;;  %v6179_v43 = vmul.f32 %v6139_v29, %v9693_v7 }
 0x925   :  { %6202 = vmatpush1.msra.mxu0 %v6183_v11 }
 0x926   :  { %6203 = vmatprep.subr.mxu0 %v6181_v1 }
 0x927   :  { %v6134_v18 = vpop.permute.xlu1 %6133  ;;  %6204 = vmatpush1.msra.mxu0 %v6180_v46  ;;  %v6573_v46 = vld [vmem:[%s9651_s9 + $0x60] sm:$0xf] }
 0x928   :  { %v6174_v16 = vmul.f32 %v6134_v18, %v9167_v6  ;;  %v6175_v14 = vmul.f32 %v6134_v18, %v9161_v5  ;;  %6205 = vmatprep.subr.mxu0 %v6178_v62  ;;  %v6176_v26 = vmul.f32 %v6134_v18, %v9694_v9  ;;  %v6572_v62 = vld [vmem:[%s9651_s9 + $0x58] sm:$0xff]  ;;  %v6571_v18 = vld [vmem:[%s9651_s9 + $0x50] sm:$0xff] }
 0x929   :  { %6206 = vmatpush1.msra.mxu0 %v6177_v17  ;;  %v6570_v17 = vld [vmem:[%s9651_s9 + $0x48] sm:$0xff] }
 0x92a   :  { %6207 = vmatprep.subr.mxu0 %v6175_v14  ;;  %v6568_v14 = vld [vmem:[%s9651_s9 + $0x38] sm:$0xff] }
 0x92b   :  { %v6129_v15 = vpop.permute.xlu1 %6128  ;;  %6208 = vmatpush1.msra.mxu0 %v6174_v16  ;;  %v6569_v16 = vld [vmem:[%s9651_s9 + $0x40] sm:$0xff] }
 0x92c   :  { %v6171_v12 = vmul.f32 %v6129_v15, %v9155_v3  ;;  %v6172_v13 = vmul.f32 %v6129_v15, %v9149_v2  ;;  %v6173_v25 = vmul.f32 %v6129_v15, %v9695_v36  ;;  %v6567_v15 = vld [vmem:[%s9651_s9 + $0x30] sm:$0xff] }
 0x92e   :  { %6209 = vmatprep.subr.mxu0 %v6172_v13  ;;  %v6565_v13 = vld [vmem:[%s9651_s9 + $0x20] sm:$0xff] }
 0x92f   :  { %v6124_v8 = vpop.permute.xlu1 %6123  ;;  %6210 = vmatpush1.msra.mxu0 %v6171_v12  ;;  %v6566_v12 = vld [vmem:[%s9651_s9 + $0x28] sm:$0xff] }
 0x930   :  { %v6168_v33 = vmul.f32 %v6124_v8, %v9143_v0  ;;  %v6169_v10 = vmul.f32 %v6124_v8, %v9137_v63  ;;  %v9687_v63 = vld [vmem:[#allocation102_spill] sm:$0xff]  ;;  %v6170_v52 = vmul.f32 %v6124_v8, %v9696_v4 }
 0x931   :  { %v6564_v8 = vld [vmem:[%s9651_s9 + $0x18] sm:$0xff] }
 0x932   :  { %6211 = vmatprep.subr.mxu0 %v6169_v10  ;;  %v6562_v10 = vld [vmem:[%s9651_s9 + $0x8] sm:$0xff] }
 0x933   :  { %v6119_v6 = vpop.permute.xlu1 %6118  ;;  %6212 = vmatpush1.msra.mxu0 %v6168_v33  ;;  %v6563_v33 = vld [vmem:[%s9651_s9 + $0x10] sm:$0xff] }
 0x934   :  { %v6165_v5 = vmul.f32 %v6119_v6, %v9131_v61  ;;  %v6166_v31 = vmul.f32 %v6119_v6, %v9125_v60  ;;  %v9688_v61 = vld [vmem:[#allocation100_spill] sm:$0xff]  ;;  %v9689_v60 = vld [vmem:[#allocation97_spill] sm:$0xff]  ;;  %v6167_v44 = vmul.f32 %v6119_v6, %v9697_v28 }
 0x935   :  { %v6561_v6 = vld [vmem:[%s9651_s9] sm:$0xff] }
 0x936   :  { %6213 = vmatprep.subr.mxu0 %v6166_v31 }
 0x937   :  { %v6114_v34 = vpop.permute.xlu1 %6113  ;;  %6214 = vmatpush1.msra.mxu0 %v6165_v5 }
 0x938   :  { %v6162_v2 = vmul.f32 %v6114_v34, %v9119_v58  ;;  %v6163_v3 = vmul.f32 %v6114_v34, %v9113_v57  ;;  %v9691_v57 = vld [vmem:[#allocation108_spill] sm:$0xff]  ;;  %v9692_v58 = vld [vmem:[#allocation107_spill] sm:$0xff]  ;;  %v6164_v49 = vmul.f32 %v6114_v34, %v9698_v47 }
 0x939   :  { %v6182_v54 = vmul.f32 %v6144_v24, %v9692_v58  ;;  %v6365_v24 = vld [vmem:[%s9647_s5 + $0x118] sm:$0xff] }
 0x93a   :  { %6215 = vmatprep.subr.mxu0 %v6163_v3 }
 0x93b   :  { %v6109_v35 = vpop.permute.xlu1 %6108  ;;  %6216 = vmatpush1.msra.mxu0 %v6162_v2  ;;  %v8145_v2 = vld [vmem:[%s9648_s6] ss:$0 sm:$0xff] }
 0x93c   :  { %v6159_v0 = vmul.f32 %v6109_v35, %v9107_v55  ;;  %v6160_v37 = vmul.f32 %v6109_v35, %v9687_v63  ;;  %v6185_v55 = vmul.f32 %v6149_v23, %v9691_v57  ;;  %v6161_v19 = vmul.f32 %v6109_v35, %v9699_v51  ;;  %v6330_v23 = vld [vmem:[%s9647_s5] sm:$0xff] }
 0x93d   :  { %8309 = vmatpush3.msra.mxu1 %v6330_v23 }
 0x93e   :  { %6217 = vmatprep.subr.mxu0 %v6160_v37  ;;  %8484 = vmatprep.subr.mxu1 %v9686_v30 }
 0x93f   :  { %v6104_v38 = vpop.permute.xlu1 %6103  ;;  %6218 = vmatpush1.msra.mxu0 %v6159_v0 }
 0x940   :  { %v6156_v39 = vmul.f32 %v6104_v38, %v9688_v61  ;;  %v6157_v42 = vmul.f32 %v6104_v38, %v9689_v60  ;;  %v6158_v27 = vmul.f32 %v8584_v21, %v6104_v38  ;;  %v6699_v21 = vld [vmem:[%s9655_s13 + $0x18] sm:$0x1] }
 0x942   :  { %6219 = vmatprep.subr.mxu0 %v6157_v42 }
 0x943   :  { %6220 = vmatpush1.msra.mxu0 %v6156_v39 }
 0x944   :  { %8444 = vmatprep.subr.mxu0 %v9686_v30  ;;  %8143 = vmatmul.mubr.msk.f32.vlgmr.msra.gmra.mxu0 %vm5840_vm4, %v9282_v41 }
 0x945   :  { %8445 = vmatpush3.msra.mxu0 %v6188_v22  ;;  %8466 = vmatprep.mubr.msk.f32.mxu0 %vm8603_vm0, %v9686_v30 }
 0x946   :  { %8446 = vmatprep.subr.mxu0 %v9686_v30 }
 0x947   :  { %8447 = vmatpush3.msra.mxu0 %v6185_v55 }
 0x948   :  { %8448 = vmatprep.subr.mxu0 %v9686_v30 }
 0x949   :  { %8449 = vmatpush3.msra.mxu0 %v6182_v54 }
 0x94a   :  { %8450 = vmatprep.subr.mxu0 %v9686_v30 }
 0x94b   :  { %8451 = vmatpush3.msra.mxu0 %v6179_v43 }
 0x94c   :  { %8452 = vmatprep.subr.mxu0 %v9686_v30 }
 0x94d   :  { %8453 = vmatpush3.msra.mxu0 %v6176_v26 }
 0x94e   :  { %8454 = vmatprep.subr.mxu0 %v9686_v30 }
 0x94f   :  { %8455 = vmatpush3.msra.mxu0 %v6173_v25 }
 0x950   :  { %8456 = vmatprep.subr.mxu0 %v9686_v30 }
 0x951   :  { %8457 = vmatpush3.msra.mxu0 %v6170_v52 }
 0x952   :  { %8458 = vmatprep.subr.mxu0 %v9686_v30 }
 0x953   :  { %8459 = vmatpush3.msra.mxu0 %v6167_v44  ;;  %v8148_v44 = vld [vmem:[%s9649_s7] ss:$0 sm:$0xff] }
 0x954   :  { %8460 = vmatprep.subr.mxu0 %v9686_v30 }
 0x955   :  { %8461 = vmatpush3.msra.mxu0 %v6164_v49  ;;  %v8149_v49 = vld [vmem:[%s9650_s8] ss:$0 sm:$0xff] }
 0x956   :  { %8462 = vmatprep.subr.mxu0 %v9686_v30 }
 0x957   :  { %8463 = vmatpush3.msra.mxu0 %v6161_v19 }
 0x958   :  { %8464 = vmatprep.subr.mxu0 %v9686_v30 }
 0x959   :  { %8465 = vmatpush3.msra.mxu0 %v6158_v27  ;;  %v6698_v27 = vld [vmem:[%s9655_s13 + $0x10] sm:$0xff] }
 0x95a   :  { %8467 = vmatmul.mubr.msk.f32.vlgmr.msra.gmra.mxu0 %vm5840_vm4, %v9282_v41  ;;  %8469 = vmatprep.subr.mxu0 %v9686_v30  ;;  %v6366_v41 = vld [vmem:[%s9647_s5 + $0x120] sm:$0xff] }
 0x95b   :  { %8470 = vmatpush3.msk.msra.mxu0 %vm5530_vm1, %v6367_v32  ;;  %8481 = vmatprep.mubr.msk.f32.mxu0 %vm8603_vm0, %v9686_v30  ;;  %v6697_v32 = vld [vmem:[%s9655_s13 + $0x8] sm:$0xff] }
 0x95c   :  { %8471 = vmatprep.subr.mxu0 %v9686_v30 }
 0x95d   :  { %8472 = vmatpush3.msra.mxu0 %v6366_v41 }
 0x95e   :  { %8473 = vmatprep.subr.mxu0 %v9686_v30 }
 0x95f   :  { %8474 = vmatpush3.msra.mxu0 %v6365_v24 }
 0x960   :  { %8475 = vmatprep.subr.mxu0 %v9686_v30 }
 0x961   :  { %8476 = vmatpush3.msra.mxu0 %v6364_v48 }
 0x962   :  { %8477 = vmatprep.subr.mxu0 %v9686_v30 }
 0x963   :  { %8478 = vmatpush3.msra.mxu0 %v6363_v20 }
 0x964   :  { %8479 = vmatprep.subr.mxu0 %v9686_v30 }
 0x965   :  { %8480 = vmatpush3.msra.mxu0 %v6362_v56 }
 0x966   :  { %8513 = vmatprep.subr.mxu0 %v9686_v30 }
 0xa04   :  { %v6255_v59 = vpop.f32.mrf.mxu0 }
 0xa06   :  { %v6257_v29 = vpop.f32.mrf.mxu0 }
 0xa07   :  { %6445 = vmatprep.mubr.f32.mxu1 %v6257_v29 }
 0xa08   :  { %6446 = vmatmul.mubr.f32.vlgmr.msra.gmra.mxu1 %v6255_v59 }
 0xa09   :  { %8510 = vmatprep.mubr.msk.f32.mxu1 %vm8603_vm0, %v9686_v30  ;;  %8485 = vmatpush3.msk.msra.mxu1 %vm5530_vm1, %v6573_v46 }
 0xa0a   :  { %8486 = vmatprep.subr.mxu1 %v9686_v30 }
 0xa0b   :  { %8487 = vmatpush3.msra.mxu1 %v6572_v62 }
 0xa0c   :  { %8488 = vmatprep.subr.mxu1 %v9686_v30 }
 0xa0d   :  { %8489 = vmatpush3.msra.mxu1 %v6571_v18 }
 0xa0e   :  { %8490 = vmatprep.subr.mxu1 %v9686_v30 }
 0xa0f   :  { %8491 = vmatpush3.msra.mxu1 %v6570_v17 }
 0xa10   :  { %8492 = vmatprep.subr.mxu1 %v9686_v30 }
 0xa11   :  { %8493 = vmatpush3.msra.mxu1 %v6569_v16 }
 0xa12   :  { %8494 = vmatprep.subr.mxu1 %v9686_v30 }
 0xa13   :  { %8495 = vmatpush3.msra.mxu1 %v6568_v14 }
 0xa14   :  { %8496 = vmatprep.subr.mxu1 %v9686_v30 }
 0xa15   :  { %8497 = vmatpush3.msra.mxu1 %v6567_v15 }
 0xa16   :  { %8498 = vmatprep.subr.mxu1 %v9686_v30 }
 0xa17   :  { %8499 = vmatpush3.msra.mxu1 %v6566_v12 }
 0xa18   :  { %8500 = vmatprep.subr.mxu1 %v9686_v30 }
 0xa19   :  { %8501 = vmatpush3.msra.mxu1 %v6565_v13 }
 0xa1a   :  { %v6326_v11 = vpop.f32.mrf.mxu0  ;;  %8502 = vmatprep.subr.mxu1 %v9686_v30 }
 0xa1b   :  { %8482 = vmatmul.mubr.msk.f32.vlgmr.msra.gmra.mxu0 %vm5496_vm2, %v6326_v11  ;;  %8503 = vmatpush3.msra.mxu1 %v6564_v8 }
 0xa1c   :  { %v8468_v1 = vpop.f32.mrf.mxu0  ;;  %8521 = vmatprep.mubr.msk.f32.mxu0 %vm8603_vm0, %v9686_v30  ;;  %8504 = vmatprep.subr.mxu1 %v9686_v30 }
 0xa1d   :  { %8505 = vmatpush3.msra.mxu1 %v6563_v33  ;;  %8514 = vmatpush3.msk.msra.mxu0 %vm6710_vm7, %v6699_v21 }
 0xa1e   :  { %8506 = vmatprep.subr.mxu1 %v9686_v30  ;;  %8515 = vmatprep.subr.mxu0 %v9686_v30 }
 0xa1f   :  { %8507 = vmatpush3.msra.mxu1 %v6562_v10  ;;  %8516 = vmatpush3.msra.mxu0 %v6698_v27 }
 0xa20   :  { %8508 = vmatprep.subr.mxu1 %v9686_v30  ;;  %8517 = vmatprep.subr.mxu0 %v9686_v30 }
 0xa21   :  { %8509 = vmatpush3.msra.mxu1 %v6561_v6  ;;  %8518 = vmatpush3.msra.mxu0 %v6697_v32  ;;  %v8153_v6 = vld [vmem:[%s9653_s11] ss:$0 sm:$0xff] }
 0xa22   :  { %8519 = vmatprep.subr.mxu0 %v9686_v30 }
 0xa23   :  { %8520 = vmatpush3.msra.mxu0 %v6696_v40 }
 0xac8   :  { %v8310_v5 = vpop.f32.mrf.mxu1 }
 0xaca   :  { %v8311_v31 = vpop.f32.mrf.mxu1 }
 0xacb   :  { %v8312_v34 = vadd.f32 %v8311_v31, %v8310_v5  ;;  %v8154_v31 = vld [vmem:[%s9654_s12] ss:$0 sm:$0xff] }
 0xacd   :  { %v6448_v3 = vadd.f32 %v8312_v34, %v8145_v2 }
 0xadb   :  { %v6517_v35 = vpop.f32.mrf.mxu0 }
 0xadc   :  { %v6518_v0 = vadd.f32 %v6517_v35, %v6448_v3  ;;  %v8155_v3 = vld [vmem:[#allocation6] ss:$0 sm:$0xff] }
 0xadd   :  { %v8483_v63 = vpop.f32.mrf.mxu0 }
 0xade   :  { %v6521_v37 = vmax.f32 %v6518_v0, 0.0 }
 0xae0   :  { %v6523_v38 = vsel %vm6522_vm6, %v6521_v37, 0.0 }
 0xae1   :  { %v6524_v61 = vrot.slane %v6523_v38, 4 }
 0xae3   :  { %v6525_v39 = vadd.f32 %v6524_v61, %v6523_v38 }
 0xae5   :  { %v6526_v60 = vrot.slane %v6525_v39, 2 }
 0xae7   :  { %v6527_v42 = vadd.f32 %v6526_v60, %v6525_v39 }
 0xae9   :  { %v6528_v53 = vrot.slane %v6527_v42, 1 }
 0xaeb   :  { %v6529_v22 = vadd.f32 %v6528_v53, %v6527_v42 }
 0xaed   :  { %v6531_v57 = vmul.f32 0.125, %v6529_v22 }
 0xaef   :  { %v6532_v55 = vsub.f32 %v6521_v37, %v6531_v57 }
 0xaf1   :  { %v6533_v58 = vmul.f32 %v6532_v55, %v6532_v55 }
 0xaf3   :  { %v6534_v54 = vsel %vm6522_vm6, %v6533_v58, 0.0 }
 0xaf4   :  { %v6535_v7 = vrot.slane %v6534_v54, 4 }
 0xaf6   :  { %v6536_v43 = vadd.f32 %v6535_v7, %v6534_v54 }
 0xaf8   :  { %v6537_v9 = vrot.slane %v6536_v43, 2 }
 0xafa   :  { %v6538_v26 = vadd.f32 %v6537_v9, %v6536_v43 }
 0xafc   :  { %v6539_v36 = vrot.slane %v6538_v26, 1 }
 0xafe   :  { %v6540_v25 = vadd.f32 %v6539_v36, %v6538_v26 }
 0xb00   :  { %v6541_v4 = vmul.f32 0.125, %v6540_v25 }
 0xb02   :  { %v6542_v52 = vadd.f32 1e-05, %v6541_v4 }
 0xb04   :  { %8576 = vrsqrt.f32 %v6542_v52 }
 0xb11   :  { %v8577_v28 = vpop.eup %8576 }
 0xb12   :  { %v6544_v47 = vmul.f32 %v8577_v28, %v6532_v55 }
 0xb14   :  { %v6552_v51 = vmul.f32 %v8148_v44, %v6544_v47 }
 0xb16   :  { %v6560_v19 = vadd.f32 %v8149_v49, %v6552_v51 }
 0xb18   :  { %8511 = vmatmul.mubr.msk.f32.vlgmr.msra.gmra.mxu1 %vm6522_vm6, %v6560_v19 }
 0xbd8   :  { %v6653_v41 = vpop.f32.mrf.mxu1 }
 0xbd9   :  { %v6654_v50 = vadd.f32 %v8150_v45, %v6653_v41 }
 0xbda   :  { %v8512_v23 = vpop.f32.mrf.mxu1 }
 0xbdb   :  { %v6657_v24 = vmax.f32 %v6654_v50, 0.0 }
 0xbdd   :  { %v6659_v48 = vsel %vm6658_vm8, %v6657_v24, 0.0 }
 0xbde   :  { %v6660_v20 = vrot.slane %v6659_v48, 4 }
 0xbe0   :  { %v6661_v56 = vadd.f32 %v6660_v20, %v6659_v48 }
 0xbe2   :  { %v6662_v59 = vrot.slane %v6661_v56, 2 }
 0xbe4   :  { %v6663_v29 = vadd.f32 %v6662_v59, %v6661_v56 }
 0xbe6   :  { %v6664_v11 = vrot.slane %v6663_v29, 1 }
 0xbe8   :  { %v6665_v1 = vadd.f32 %v6664_v11, %v6663_v29 }
 0xbea   :  { %v6666_v46 = vmul.f32 0.125, %v6665_v1 }
 0xbec   :  { %v6667_v30 = vsub.f32 %v6657_v24, %v6666_v46 }
 0xbee   :  { %v6668_v62 = vmul.f32 %v6667_v30, %v6667_v30 }
 0xbf0   :  { %v6669_v18 = vsel %vm6658_vm8, %v6668_v62, 0.0 }
 0xbf1   :  { %v6670_v17 = vrot.slane %v6669_v18, 4 }
 0xbf3   :  { %v6671_v16 = vadd.f32 %v6670_v17, %v6669_v18 }
 0xbf5   :  { %v6672_v14 = vrot.slane %v6671_v16, 2 }
 0xbf7   :  { %v6673_v15 = vadd.f32 %v6672_v14, %v6671_v16 }
 0xbf9   :  { %v6674_v12 = vrot.slane %v6673_v15, 1 }
 0xbfb   :  { %v6675_v13 = vadd.f32 %v6674_v12, %v6673_v15 }
 0xbfd   :  { %v6676_v8 = vmul.f32 0.125, %v6675_v13 }
 0xbff   :  { %v6677_v33 = vadd.f32 1e-05, %v6676_v8 }
 0xc01   :  { %8578 = vrsqrt.f32 %v6677_v33 }
 0xc0e   :  { %v8579_v10 = vpop.eup %8578 }
 0xc0f   :  { %v6679_v5 = vmul.f32 %v8579_v10, %v6667_v30 }
 0xc11   :  { %v6687_v34 = vmul.f32 %v8153_v6, %v6679_v5 }
 0xc13   :  { %v6695_v2 = vadd.f32 %v8154_v31, %v6687_v34 }
 0xc15   :  { %8522 = vmatmul.mubr.msk.f32.vlgmr.msra.gmra.mxu0 %vm6658_vm8, %v6695_v2 }
 0xcd5   :  { %v6780_v35 = vpop.f32.mrf.mxu0 }
 0xcd6   :  { %v6781_v0 = vadd.f32 %v8155_v3, %v6780_v35 }
 0xcd7   :  { %v8523_v63 = vpop.f32.mrf.mxu0 }
 0xcd8   :  { %v8158_v37 = vmul.f32 -1.442695, %v6781_v0 }
 0xcda   :  { %8580 = vpow2.f32 %v8158_v37 }
 0xce7   :  { %v8581_v38 = vpop.eup %8580 }
 0xce8   :  { %v6787_v61 = vadd.f32 1.0, %v8581_v38 }
 0xcea   :  { %8582 = vrcp.f32 %v6787_v61 }
 0xcf7   :  { %v8583_v39 = vpop.eup %8582 }
 0xcf8   :  { %6790 = vst.msk [vmem:[%s9656_s15] sm:$0xff] %vm5774_vm3, %v8583_v39 }
 0xcf9   :  { %6795 = vsyncmov [#allocation3] }
 0xcfc   :  { %s6796_s12 = vpop.sfrf %6795 }
 0xcfd   :  { %p8159_p5 = scmp.ne.s32.totalorder %s6796_s12, 0 }
 0xcff   :  { %6800 = shalt.err (%p8159_p5)  }

</bundles_post_ra>
